<compile_context>
chip_gen: v7x
topology: tpu7x:2x2x1
jax: 0.10.0
libtpu: 0.0.40
codegen_flags: <defaults>
</compile_context>

<pallas_src>
import numpy as np
import jax
import jax.numpy as jnp
from jax.experimental import pallas as pl
from jax.experimental.pallas import tpu as pltpu

# ----------------------------- model constants ------------------------------
RADIUS = 0.4
NUM_BASIS = 20                    # mlp_num_neurons[0]
M_IN = 5                          # '5x0e'
M_HID = 10                        # '10x0e + 10x1o'
M_OUT = 20                        # '20x0e'
DIM_IN = M_IN
DIM_OUT = M_OUT
EPS = 1e-5

SQ2 = float(np.sqrt(2.0))
SQ3 = float(np.sqrt(3.0))
SQ5 = float(np.sqrt(5.0))
SQ6 = float(np.sqrt(6.0))
SQ15 = float(np.sqrt(15.0))

# packed tensor-product weight layout: every path block starts on a 128-lane
# boundary so all in-kernel slices of tpw are lane-aligned.
BW_10 = 128                       # padded width of an (m1<=10, mo=10) path block
BW_20 = 256                       # padded width of an (m1=10, mo=20) path block
OFF_1A, OFF_1B = 0, 128                                   # layer 1 paths
OFF_2A, OFF_2D, OFF_2B, OFF_2C, OFF_2E = 256, 384, 512, 640, 768   # layer 2 paths
OFF_3A, OFF_3B = 896, 1152                                # layer 3 paths
WTOT = 1408


# --------------------------------- parameters ---------------------------------
def init_params(key):
    """Random weights in the packed / 128-lane-aligned layout the kernel consumes."""
    pw1 = float(np.sqrt(1.0 / 5.0))          # layer-1 path norm (both paths)
    pw2_s = float(np.sqrt(1.0 / 20.0))       # layer-2 scalar-output paths
    pw2_v = float(np.sqrt(3.0 / 30.0))       # layer-2 vector-output paths
    pw3 = float(np.sqrt(1.0 / 20.0))         # layer-3 paths
    cg1 = 1.0 / SQ3                          # CG(1o,1o->0e) / (0e,1o->1o)
    cg2 = 1.0 / SQ5                          # CG(1o,2e->1o)

    keys = jax.random.split(key, 13)
    nrm = lambda k, s: np.asarray(jax.random.normal(k, s, jnp.float32))

    w1 = [nrm(keys[i], (NUM_BASIS, NUM_BASIS)) for i in range(3)]
    w2 = [nrm(keys[3 + i], (NUM_BASIS, NUM_BASIS)) for i in range(3)]
    w3_1 = nrm(keys[6], (NUM_BASIS, 100))     # FullyConnectedTP weight_numel = 100
    w3_2 = nrm(keys[7], (NUM_BASIS, 500))     # 500
    w3_3 = nrm(keys[8], (NUM_BASIS, 400))     # 400
    si1_raw = nrm(keys[9], (M_IN, M_HID))     # o3.Linear 0e->0e blocks only
    si2s_raw = nrm(keys[10], (M_HID, M_HID))
    si2v_raw = nrm(keys[11], (M_HID, M_HID))
    si3_raw = nrm(keys[12], (M_HID, M_OUT))

    # fused radial-MLP weights: [20,60], block-diag [60,60]
    W1p = np.concatenate(w1, axis=1)
    W2p = np.zeros((3 * NUM_BASIS, 3 * NUM_BASIS), np.float32)
    for l in range(3):
        W2p[l * NUM_BASIS:(l + 1) * NUM_BASIS, l * NUM_BASIS:(l + 1) * NUM_BASIS] = w2[l]

    # packed third MLP layer -> per-edge TP weights, path constants folded in
    W3p = np.zeros((3 * NUM_BASIS, WTOT), np.float32)
    W3p[0:20, OFF_1A:OFF_1A + 50] = w3_1[:, 0:50] * pw1               # (0e,0e,0e)
    W3p[0:20, OFF_1B:OFF_1B + 50] = w3_1[:, 50:100] * pw1             # (0e,1o,1o)
    W3p[20:40, OFF_2A:OFF_2A + 100] = w3_2[:, 0:100] * pw2_s          # (0e,0e,0e)
    W3p[20:40, OFF_2D:OFF_2D + 100] = w3_2[:, 300:400] * (pw2_s * cg1)  # (1o,1o,0e)
    W3p[20:40, OFF_2B:OFF_2B + 100] = w3_2[:, 100:200] * (pw2_v * cg1)  # (0e,1o,1o)
    W3p[20:40, OFF_2C:OFF_2C + 100] = w3_2[:, 200:300] * (pw2_v * cg1)  # (1o,0e,1o)
    W3p[20:40, OFF_2E:OFF_2E + 100] = w3_2[:, 400:500] * (pw2_v * cg2)  # (1o,2e,1o)
    W3p[40:60, OFF_3A:OFF_3A + 200] = w3_3[:, 0:200] * pw3            # (0e,0e,0e)
    W3p[40:60, OFF_3B:OFF_3B + 200] = w3_3[:, 200:400] * (pw3 * cg1)  # (1o,1o,0e)

    return dict(
        W1p=jnp.asarray(W1p), W2p=jnp.asarray(W2p), W3p=jnp.asarray(W3p),
        si1=jnp.asarray(si1_raw / np.sqrt(M_IN)),
        si2s=jnp.asarray(si2s_raw / np.sqrt(M_HID)),
        si2v=jnp.asarray(si2v_raw / np.sqrt(M_HID)),
        si3=jnp.asarray(si3_raw / np.sqrt(M_HID)))


# ------------------------------- fused forward -------------------------------
def build_forward(n_node, n_graph, n_batch):
    N, B, G = n_node, n_graph, n_batch
    E = N * N

    # constant selector matrices for the per-edge TP contraction:
    #   out = ((x @ P) * Wblk) @ S   with  P[u, u*mo+w]=1,  S[u*mo+w, w]=1
    def make_P(m1, mo, bw):
        P = np.zeros((m1, bw), np.float32)
        for u in range(m1):
            P[u, u * mo:(u + 1) * mo] = 1.0
        return P

    def make_S(m1, mo, bw):
        S = np.zeros((bw, mo), np.float32)
        for u in range(m1):
            S[u * mo:(u + 1) * mo, :] = np.eye(mo, dtype=np.float32)
        return S

    P510, S510 = jnp.asarray(make_P(5, 10, BW_10)), jnp.asarray(make_S(5, 10, BW_10))
    P1010, S1010 = jnp.asarray(make_P(10, 10, BW_10)), jnp.asarray(make_S(10, 10, BW_10))
    P1020, S1020 = jnp.asarray(make_P(10, 20, BW_20)), jnp.asarray(make_S(10, 20, BW_20))

    def kernel(vec_ref, allow_ref, onehot_ref, x_ref,
               w1_ref, w2_ref, w3_ref,
               si1_ref, si2s_ref, si2v_ref, si3_ref,
               p510_ref, s510_ref, p1010_ref, s1010_ref, p1020_ref, s1020_ref,
               out_ref):
        f32 = jnp.float32

        def mm(a, b):
            return jnp.dot(a, b, preferred_element_type=f32)

        # ---- edge featurisation: spherical harmonics + radial basis --------
        vec = vec_ref[...]                                    # [E, 3]
        ex_, ey_, ez_ = vec[:, 0:1], vec[:, 1:2], vec[:, 2:3]
        r2 = ex_ * ex_ + ey_ * ey_ + ez_ * ez_
        r = jnp.sqrt(r2)
        inv_r = jax.lax.rsqrt(r2 + 1e-12)                     # safe on self pairs
        nx, ny, nz = ex_ * inv_r, ey_ * inv_r, ez_ * inv_r

        # component-normalized real spherical harmonics, l = 1, 2
        # TODO(synk): e3nn o3.spherical_harmonics component order / sign may differ.
        sh1x, sh1y, sh1z = SQ3 * nx, SQ3 * ny, SQ3 * nz       # [E, 1] each
        q_xy = SQ15 * nx * ny
        q_yz = SQ15 * ny * nz
        q_xz = SQ15 * nx * nz
        q_zz = 0.5 * SQ5 * (3.0 * nz * nz - 1.0)
        q_dd = 0.5 * SQ15 * (nx * nx - ny * ny)
        # CG(1o,2e->1o) baked as a per-edge symmetric traceless matrix
        m_xx = -q_zz / SQ6 + q_dd / SQ2
        m_yy = -q_zz / SQ6 - q_dd / SQ2
        m_zz = 2.0 * q_zz / SQ6
        m_xy = q_xy / SQ2
        m_yz = q_yz / SQ2
        m_xz = q_xz / SQ2

        # soft_one_hot_linspace(0, R, 20, 'smooth_finite', cutoff=True) * sqrt(20)
        step = RADIUS / (NUM_BASIS + 1)
        idx = jax.lax.broadcasted_iota(jnp.int32, (1, NUM_BASIS), 1).astype(f32)
        centers = (idx + 1.0) * step
        diff = (r - centers) / step

        def soft_unit_step(t):
            ts = jnp.where(t > 0.0, t, 1.0)
            return jnp.where(t > 0.0, jnp.exp(-1.0 / ts), 0.0)

        emb = (1.14136 * float(np.exp(2.0))) * soft_unit_step(diff + 1.0) \
            * soft_unit_step(1.0 - diff)
        emb = emb * float(np.sqrt(NUM_BASIS))                 # [E, 20]

        # radius_graph(loop=False) mask, folded into the embedding ONCE: the MLP
        # has no bias so zero rows stay zero through relu and the (linear) TP.
        mask_e = allow_ref[...] * jnp.where(r < RADIUS, 1.0, 0.0)   # [E, 1]
        emb = emb * mask_e

        # ---- fused radial MLPs of all three layers (block-diagonal weights) --
        inv_fan = 1.0 / float(np.sqrt(NUM_BASIS))
        h = mm(emb, w1_ref[...]) * inv_fan
        h = jnp.maximum(h, 0.0) * SQ2
        h = mm(h, w2_ref[...]) * inv_fan
        h = jnp.maximum(h, 0.0) * SQ2
        tpw = mm(h, w3_ref[...]) * inv_fan                    # [E, 1408] all layers

        # ---- constant structure: src tile + dst segment-sum selector --------
        def tile_src(f):                     # f[N, C] -> f[edge_src], e = dst*N + src
            return jnp.concatenate([f] * N, axis=0)

        d_i = jax.lax.broadcasted_iota(jnp.int32, (N, E), 0)
        e_i = jax.lax.broadcasted_iota(jnp.int32, (N, E), 1)
        seg = jnp.where(jnp.logical_and(e_i >= d_i * N, e_i < d_i * N + N), 1.0, 0.0)

        P510c, S510c = p510_ref[...], s510_ref[...]
        P1010c, S1010c = p1010_ref[...], s1010_ref[...]
        P1020c, S1020c = p1020_ref[...], s1020_ref[...]

        def bn_hidden(s, vx, vy, vz):
            # e3nn BatchNorm (training batch stats, identity affine) on 10x0e+10x1o
            # TODO(synk): running-stat updates / exact e3nn eps placement not reproduced.
            mu = jnp.mean(s, axis=0, keepdims=True)
            sc = s - mu
            var = jnp.mean(sc * sc, axis=0, keepdims=True)
            s_out = sc * jax.lax.rsqrt(var + EPS)
            n2 = jnp.mean(vx * vx + vy * vy + vz * vz, axis=0, keepdims=True) / 3.0
            inv = jax.lax.rsqrt(n2 + EPS)
            return s_out, vx * inv, vy * inv, vz * inv

        # ================================ layer 1 ============================
        xs = x_ref[...]                                       # [N, 5]
        s_src = tile_src(xs)                                  # [E, 5]
        exp_s = mm(s_src, P510c)                              # [E, 128]
        msg_s = mm(exp_s * tpw[:, OFF_1A:OFF_1A + BW_10], S510c)   # [E, 10]
        a_v = mm(exp_s * tpw[:, OFF_1B:OFF_1B + BW_10], S510c)     # [E, 10]
        f_s = mm(seg, msg_s) + mm(xs, si1_ref[...])           # scatter-sum + o3.Linear
        f_vx = mm(seg, sh1x * a_v)
        f_vy = mm(seg, sh1y * a_v)
        f_vz = mm(seg, sh1z * a_v)
        f_s, f_vx, f_vy, f_vz = bn_hidden(f_s, f_vx, f_vy, f_vz)

        # ================================ layer 2 ============================
        s_src = tile_src(f_s)
        vx_src, vy_src, vz_src = tile_src(f_vx), tile_src(f_vy), tile_src(f_vz)
        gd = vx_src * sh1x + vy_src * sh1y + vz_src * sh1z    # (1o x 1o -> 0e)
        gex = vx_src * m_xx + vy_src * m_xy + vz_src * m_xz   # (1o x 2e -> 1o)
        gey = vx_src * m_xy + vy_src * m_yy + vz_src * m_yz
        gez = vx_src * m_xz + vy_src * m_yz + vz_src * m_zz

        exp_s = mm(s_src, P1010c)
        exp_gd = mm(gd, P1010c)
        exp_vx, exp_vy, exp_vz = mm(vx_src, P1010c), mm(vy_src, P1010c), mm(vz_src, P1010c)
        exp_gx, exp_gy, exp_gz = mm(gex, P1010c), mm(gey, P1010c), mm(gez, P1010c)

        tA = tpw[:, OFF_2A:OFF_2A + BW_10]
        tD = tpw[:, OFF_2D:OFF_2D + BW_10]
        tB = tpw[:, OFF_2B:OFF_2B + BW_10]
        tC = tpw[:, OFF_2C:OFF_2C + BW_10]
        tE = tpw[:, OFF_2E:OFF_2E + BW_10]

        msg_s = mm(exp_s * tA + exp_gd * tD, S1010c)          # [E, 10]
        a_b = mm(exp_s * tB, S1010c)                          # [E, 10]
        msg_vx = mm(exp_vx * tC + exp_gx * tE, S1010c) + sh1x * a_b
        msg_vy = mm(exp_vy * tC + exp_gy * tE, S1010c) + sh1y * a_b
        msg_vz = mm(exp_vz * tC + exp_gz * tE, S1010c) + sh1z * a_b

        f2_s = mm(seg, msg_s) + mm(f_s, si2s_ref[...])
        f2_vx = mm(seg, msg_vx) + mm(f_vx, si2v_ref[...])
        f2_vy = mm(seg, msg_vy) + mm(f_vy, si2v_ref[...])
        f2_vz = mm(seg, msg_vz) + mm(f_vz, si2v_ref[...])
        f_s, f_vx, f_vy, f_vz = bn_hidden(f2_s, f2_vx, f2_vy, f2_vz)

        # ================================ layer 3 ============================
        s_src = tile_src(f_s)
        vx_src, vy_src, vz_src = tile_src(f_vx), tile_src(f_vy), tile_src(f_vz)
        g = vx_src * sh1x + vy_src * sh1y + vz_src * sh1z

        exp_s = mm(s_src, P1020c)                             # [E, 256]
        exp_g = mm(g, P1020c)
        msg = mm(exp_s * tpw[:, OFF_3A:OFF_3A + BW_20]
                 + exp_g * tpw[:, OFF_3B:OFF_3B + BW_20], S1020c)   # [E, 20]
        f3 = mm(seg, msg) + mm(f_s, si3_ref[...])             # [N, 20]

        # scalar BatchNorm ('20x0e')
        mu = jnp.mean(f3, axis=0, keepdims=True)
        c = f3 - mu
        var = jnp.mean(c * c, axis=0, keepdims=True)
        f3 = c * jax.lax.rsqrt(var + EPS)

        # ---- graph pooling (scatter 'sum' over batch) + softmax -------------
        pooled = mm(onehot_ref[...], f3)                      # [B, 20]
        mx = jnp.max(pooled, axis=-1, keepdims=True)
        exv = jnp.exp(pooled - mx)
        out_ref[...] = exv / jnp.sum(exv, axis=-1, keepdims=True)

    # ------------------------------ BlockSpecs -------------------------------
    def batched(shape):          # per-graph-batch data: [G, ...], one slice per step
        nd = len(shape)
        return pl.BlockSpec((None,) + shape, lambda g, _nd=nd: (g,) + (0,) * _nd)

    def shared(shape):           # weights / constants: same block every step
        nd = len(shape)
        return pl.BlockSpec(shape, lambda g, _nd=nd: (0,) * _nd)

    in_specs = [batched((E, 3)), batched((E, 1)), batched((B, N)), batched((N, DIM_IN)),
                shared((NUM_BASIS, 3 * NUM_BASIS)),
                shared((3 * NUM_BASIS, 3 * NUM_BASIS)),
                shared((3 * NUM_BASIS, WTOT)),
                shared((M_IN, M_HID)), shared((M_HID, M_HID)),
                shared((M_HID, M_HID)), shared((M_HID, M_OUT)),
                shared((5, BW_10)), shared((BW_10, 10)),
                shared((10, BW_10)), shared((BW_10, 10)),
                shared((10, BW_20)), shared((BW_20, 20))]

    call = pl.pallas_call(
        kernel,
        grid=(G,),
        in_specs=in_specs,
        out_specs=batched((B, DIM_OUT)),
        out_shape=jax.ShapeDtypeStruct((G, B, DIM_OUT), jnp.float32),
        compiler_params=pltpu.CompilerParams(
            dimension_semantics=("parallel",),   # shard graph-batches across TCs (v7x)
            vmem_limit_bytes=32 * 1024 * 1024),
    )

    sel = (P510, S510, P1010, S1010, P1020, S1020)

    def forward(params, pos, batch, x_input):
        # graph-construction glue only (inputs of the fused kernel)
        vec = (pos[:, :, None, :] - pos[:, None, :, :]).reshape(G, E, 3)  # pos[dst]-pos[src]
        same = batch[:, :, None] == batch[:, None, :]
        allow = jnp.logical_and(same, ~jnp.eye(N, dtype=bool)[None])
        allow = allow.astype(jnp.float32).reshape(G, E, 1)
        onehot = (jnp.arange(B)[None, :, None] == batch[:, None, :]).astype(jnp.float32)
        return call(vec, allow, onehot, x_input,
                    params['W1p'], params['W2p'], params['W3p'],
                    params['si1'], params['si2s'], params['si2v'], params['si3'],
                    *sel)

    return forward


if __name__ == "__main__":
    G_BATCH, N_NODE, N_GRAPH = 4, 8, 2      # 4 graph-batches, 8 nodes over 2 graphs each
    key = jax.random.PRNGKey(0)
    key, kp, kx = jax.random.split(key, 3)
    pos = jax.random.uniform(kp, (G_BATCH, N_NODE, 3), jnp.float32) * 0.5  # radius=0.4 finds edges
    batch = jnp.tile(jnp.array([0, 0, 0, 0, 1, 1, 1, 1], jnp.int32)[None], (G_BATCH, 1))
    x_input = jax.random.normal(kx, (G_BATCH, N_NODE, DIM_IN), jnp.float32)  # '5x0e'

    params = init_params(key)
    forward = build_forward(N_NODE, N_GRAPH, G_BATCH)
    out = jax.block_until_ready(forward(params, pos, batch, x_input))

    assert out.shape == (G_BATCH, N_GRAPH, DIM_OUT)
    assert bool(jnp.all(jnp.isfinite(out)))
    assert bool(jnp.allclose(jnp.sum(out, axis=-1), 1.0, atol=1e-4))
    print("KERNEL_OK")
</pallas_src>

<mosaic_0001>
module attributes {stable_mosaic.version = 11 : i64} {
  func.func @kernel(%arg0: i32, %arg1: memref<1x64x3xf32, #tpu.memory_space<vmem>>, %arg2: memref<1x64x1xf32, #tpu.memory_space<vmem>>, %arg3: memref<1x2x8xf32, #tpu.memory_space<vmem>>, %arg4: memref<1x8x5xf32, #tpu.memory_space<vmem>>, %arg5: memref<20x60xf32, #tpu.memory_space<vmem>>, %arg6: memref<60x60xf32, #tpu.memory_space<vmem>>, %arg7: memref<60x1408xf32, #tpu.memory_space<vmem>>, %arg8: memref<5x10xf32, #tpu.memory_space<vmem>>, %arg9: memref<10x10xf32, #tpu.memory_space<vmem>>, %arg10: memref<10x10xf32, #tpu.memory_space<vmem>>, %arg11: memref<10x20xf32, #tpu.memory_space<vmem>>, %arg12: memref<5x128xf32, #tpu.memory_space<vmem>>, %arg13: memref<128x10xf32, #tpu.memory_space<vmem>>, %arg14: memref<10x128xf32, #tpu.memory_space<vmem>>, %arg15: memref<128x10xf32, #tpu.memory_space<vmem>>, %arg16: memref<10x256xf32, #tpu.memory_space<vmem>>, %arg17: memref<256x20xf32, #tpu.memory_space<vmem>>, %arg18: memref<1x2x20xf32, #tpu.memory_space<vmem>>) attributes {dimension_semantics = [#tpu.dimension_semantics<parallel>], iteration_bounds = array<i64: 4>, scalar_prefetch = 0 : i64, scratch_operands = 0 : i64, tpu.core_type = #tpu.core_type<tc>, window_params = [{transform_indices = @transform_0, window_bounds = array<i64: 1, 64, 3>}, {transform_indices = @transform_1, window_bounds = array<i64: 1, 64, 1>}, {transform_indices = @transform_2, window_bounds = array<i64: 1, 2, 8>}, {transform_indices = @transform_3, window_bounds = array<i64: 1, 8, 5>}, {pipeline_mode = #tpu.pipeline_mode<synchronous>, transform_indices = @transform_4, window_bounds = array<i64: 20, 60>}, {pipeline_mode = #tpu.pipeline_mode<synchronous>, transform_indices = @transform_5, window_bounds = array<i64: 60, 60>}, {pipeline_mode = #tpu.pipeline_mode<synchronous>, transform_indices = @transform_6, window_bounds = array<i64: 60, 1408>}, {pipeline_mode = #tpu.pipeline_mode<synchronous>, transform_indices = @transform_7, window_bounds = array<i64: 5, 10>}, {pipeline_mode = #tpu.pipeline_mode<synchronous>, transform_indices = @transform_8, window_bounds = array<i64: 10, 10>}, {pipeline_mode = #tpu.pipeline_mode<synchronous>, transform_indices = @transform_9, window_bounds = array<i64: 10, 10>}, {pipeline_mode = #tpu.pipeline_mode<synchronous>, transform_indices = @transform_10, window_bounds = array<i64: 10, 20>}, {pipeline_mode = #tpu.pipeline_mode<synchronous>, transform_indices = @transform_11, window_bounds = array<i64: 5, 128>}, {pipeline_mode = #tpu.pipeline_mode<synchronous>, transform_indices = @transform_12, window_bounds = array<i64: 128, 10>}, {pipeline_mode = #tpu.pipeline_mode<synchronous>, transform_indices = @transform_13, window_bounds = array<i64: 10, 128>}, {pipeline_mode = #tpu.pipeline_mode<synchronous>, transform_indices = @transform_14, window_bounds = array<i64: 128, 10>}, {pipeline_mode = #tpu.pipeline_mode<synchronous>, transform_indices = @transform_15, window_bounds = array<i64: 10, 256>}, {pipeline_mode = #tpu.pipeline_mode<synchronous>, transform_indices = @transform_16, window_bounds = array<i64: 256, 20>}, {transform_indices = @transform_17, window_bounds = array<i64: 1, 2, 20>}]} {
    %c0 = arith.constant 0 : index
    %c0_0 = arith.constant 0 : index
    %c0_1 = arith.constant 0 : index
    %0 = vector.load %arg1[%c0, %c0_0, %c0_1] : memref<1x64x3xf32, #tpu.memory_space<vmem>>, vector<1x64x3xf32>
    %1 = vector.shape_cast %0 : vector<1x64x3xf32> to vector<64x3xf32>
    %2 = vector.extract_strided_slice %1 {offsets = [0, 0], sizes = [64, 1], strides = [1, 1]} : vector<64x3xf32> to vector<64x1xf32>
    %3 = vector.extract_strided_slice %1 {offsets = [0, 1], sizes = [64, 1], strides = [1, 1]} : vector<64x3xf32> to vector<64x1xf32>
    %4 = vector.extract_strided_slice %1 {offsets = [0, 2], sizes = [64, 1], strides = [1, 1]} : vector<64x3xf32> to vector<64x1xf32>
    %5 = arith.mulf %2, %2 : vector<64x1xf32>
    %6 = arith.mulf %3, %3 : vector<64x1xf32>
    %7 = arith.addf %5, %6 : vector<64x1xf32>
    %8 = arith.mulf %4, %4 : vector<64x1xf32>
    %9 = arith.addf %7, %8 : vector<64x1xf32>
    %10 = math.sqrt %9 : vector<64x1xf32>
    %cst = arith.constant 9.99999996E-13 : f32
    %11 = vector.broadcast %cst : f32 to vector<64x1xf32>
    %12 = arith.addf %9, %11 : vector<64x1xf32>
    %13 = math.rsqrt %12 : vector<64x1xf32>
    %14 = arith.mulf %2, %13 : vector<64x1xf32>
    %15 = arith.mulf %3, %13 : vector<64x1xf32>
    %16 = arith.mulf %4, %13 : vector<64x1xf32>
    %cst_2 = arith.constant 1.73205078 : f32
    %17 = vector.broadcast %cst_2 : f32 to vector<64x1xf32>
    %18 = arith.mulf %17, %14 : vector<64x1xf32>
    %cst_3 = arith.constant 1.73205078 : f32
    %19 = vector.broadcast %cst_3 : f32 to vector<64x1xf32>
    %20 = arith.mulf %19, %15 : vector<64x1xf32>
    %cst_4 = arith.constant 1.73205078 : f32
    %21 = vector.broadcast %cst_4 : f32 to vector<64x1xf32>
    %22 = arith.mulf %21, %16 : vector<64x1xf32>
    %cst_5 = arith.constant 3.87298346 : f32
    %23 = vector.broadcast %cst_5 : f32 to vector<64x1xf32>
    %24 = arith.mulf %23, %14 : vector<64x1xf32>
    %25 = arith.mulf %24, %15 : vector<64x1xf32>
    %cst_6 = arith.constant 3.87298346 : f32
    %26 = vector.broadcast %cst_6 : f32 to vector<64x1xf32>
    %27 = arith.mulf %26, %15 : vector<64x1xf32>
    %28 = arith.mulf %27, %16 : vector<64x1xf32>
    %cst_7 = arith.constant 3.87298346 : f32
    %29 = vector.broadcast %cst_7 : f32 to vector<64x1xf32>
    %30 = arith.mulf %29, %14 : vector<64x1xf32>
    %31 = arith.mulf %30, %16 : vector<64x1xf32>
    %cst_8 = arith.constant 3.000000e+00 : f32
    %32 = vector.broadcast %cst_8 : f32 to vector<64x1xf32>
    %33 = arith.mulf %32, %16 : vector<64x1xf32>
    %34 = arith.mulf %33, %16 : vector<64x1xf32>
    %cst_9 = arith.constant 1.000000e+00 : f32
    %35 = vector.broadcast %cst_9 : f32 to vector<64x1xf32>
    %36 = arith.subf %34, %35 : vector<64x1xf32>
    %cst_10 = arith.constant 1.11803401 : f32
    %37 = vector.broadcast %cst_10 : f32 to vector<64x1xf32>
    %38 = arith.mulf %37, %36 : vector<64x1xf32>
    %39 = arith.mulf %14, %14 : vector<64x1xf32>
    %40 = arith.mulf %15, %15 : vector<64x1xf32>
    %41 = arith.subf %39, %40 : vector<64x1xf32>
    %cst_11 = arith.constant 1.93649173 : f32
    %42 = vector.broadcast %cst_11 : f32 to vector<64x1xf32>
    %43 = arith.mulf %42, %41 : vector<64x1xf32>
    %cst_12 = arith.constant 0.000000e+00 : f32
    %44 = vector.broadcast %cst_12 : f32 to vector<64x1xf32>
    %45 = arith.subf %44, %38 : vector<64x1xf32>
    %cst_13 = arith.constant 2.44948983 : f32
    %46 = vector.broadcast %cst_13 : f32 to vector<64x1xf32>
    %47 = arith.divf %45, %46 : vector<64x1xf32>
    %cst_14 = arith.constant 1.41421354 : f32
    %48 = vector.broadcast %cst_14 : f32 to vector<64x1xf32>
    %49 = arith.divf %43, %48 : vector<64x1xf32>
    %50 = arith.addf %47, %49 : vector<64x1xf32>
    %cst_15 = arith.constant 0.000000e+00 : f32
    %51 = vector.broadcast %cst_15 : f32 to vector<64x1xf32>
    %52 = arith.subf %51, %38 : vector<64x1xf32>
    %cst_16 = arith.constant 2.44948983 : f32
    %53 = vector.broadcast %cst_16 : f32 to vector<64x1xf32>
    %54 = arith.divf %52, %53 : vector<64x1xf32>
    %cst_17 = arith.constant 1.41421354 : f32
    %55 = vector.broadcast %cst_17 : f32 to vector<64x1xf32>
    %56 = arith.divf %43, %55 : vector<64x1xf32>
    %57 = arith.subf %54, %56 : vector<64x1xf32>
    %cst_18 = arith.constant 2.000000e+00 : f32
    %58 = vector.broadcast %cst_18 : f32 to vector<64x1xf32>
    %59 = arith.mulf %58, %38 : vector<64x1xf32>
    %cst_19 = arith.constant 2.44948983 : f32
    %60 = vector.broadcast %cst_19 : f32 to vector<64x1xf32>
    %61 = arith.divf %59, %60 : vector<64x1xf32>
    %cst_20 = arith.constant 1.41421354 : f32
    %62 = vector.broadcast %cst_20 : f32 to vector<64x1xf32>
    %63 = arith.divf %25, %62 : vector<64x1xf32>
    %cst_21 = arith.constant 1.41421354 : f32
    %64 = vector.broadcast %cst_21 : f32 to vector<64x1xf32>
    %65 = arith.divf %28, %64 : vector<64x1xf32>
    %cst_22 = arith.constant 1.41421354 : f32
    %66 = vector.broadcast %cst_22 : f32 to vector<64x1xf32>
    %67 = arith.divf %31, %66 : vector<64x1xf32>
    %68 = tpu.iota {dimensions = array<i32: 1>} : vector<1x20xi32>
    %69 = arith.sitofp %68 : vector<1x20xi32> to vector<1x20xf32>
    %cst_23 = arith.constant 1.000000e+00 : f32
    %70 = vector.broadcast %cst_23 : f32 to vector<1x20xf32>
    %71 = arith.addf %69, %70 : vector<1x20xf32>
    %cst_24 = arith.constant 0.0190476198 : f32
    %72 = vector.broadcast %cst_24 : f32 to vector<1x20xf32>
    %73 = arith.mulf %71, %72 : vector<1x20xf32>
    %74 = vector.broadcast %10 : vector<64x1xf32> to vector<64x20xf32>
    %75 = vector.broadcast %73 : vector<1x20xf32> to vector<64x20xf32>
    %76 = arith.subf %74, %75 : vector<64x20xf32>
    %cst_25 = arith.constant 0.0190476198 : f32
    %77 = vector.broadcast %cst_25 : f32 to vector<64x20xf32>
    %78 = arith.divf %76, %77 : vector<64x20xf32>
    %cst_26 = arith.constant 1.000000e+00 : f32
    %79 = vector.broadcast %cst_26 : f32 to vector<64x20xf32>
    %80 = arith.addf %78, %79 : vector<64x20xf32>
    %cst_27 = arith.constant 0.000000e+00 : f32
    %81 = vector.broadcast %cst_27 : f32 to vector<64x20xf32>
    %82 = arith.cmpf ogt, %80, %81 : vector<64x20xf32>
    %cst_28 = arith.constant 1.000000e+00 : f32
    %83 = vector.broadcast %cst_28 : f32 to vector<64x20xf32>
    %84 = arith.select %82, %80, %83 : vector<64x20xi1>, vector<64x20xf32>
    %cst_29 = arith.constant 0.000000e+00 : f32
    %85 = vector.broadcast %cst_29 : f32 to vector<64x20xf32>
    %86 = arith.cmpf ogt, %80, %85 : vector<64x20xf32>
    %cst_30 = arith.constant -1.000000e+00 : f32
    %87 = vector.broadcast %cst_30 : f32 to vector<64x20xf32>
    %88 = arith.divf %87, %84 : vector<64x20xf32>
    %89 = math.exp %88 : vector<64x20xf32>
    %cst_31 = arith.constant 0.000000e+00 : f32
    %90 = vector.broadcast %cst_31 : f32 to vector<64x20xf32>
    %91 = arith.select %86, %89, %90 : vector<64x20xi1>, vector<64x20xf32>
    %cst_32 = arith.constant 8.43357276 : f32
    %92 = vector.broadcast %cst_32 : f32 to vector<64x20xf32>
    %93 = arith.mulf %92, %91 : vector<64x20xf32>
    %cst_33 = arith.constant 1.000000e+00 : f32
    %94 = vector.broadcast %cst_33 : f32 to vector<64x20xf32>
    %95 = arith.subf %94, %78 : vector<64x20xf32>
    %cst_34 = arith.constant 0.000000e+00 : f32
    %96 = vector.broadcast %cst_34 : f32 to vector<64x20xf32>
    %97 = arith.cmpf ogt, %95, %96 : vector<64x20xf32>
    %cst_35 = arith.constant 1.000000e+00 : f32
    %98 = vector.broadcast %cst_35 : f32 to vector<64x20xf32>
    %99 = arith.select %97, %95, %98 : vector<64x20xi1>, vector<64x20xf32>
    %cst_36 = arith.constant 0.000000e+00 : f32
    %100 = vector.broadcast %cst_36 : f32 to vector<64x20xf32>
    %101 = arith.cmpf ogt, %95, %100 : vector<64x20xf32>
    %cst_37 = arith.constant -1.000000e+00 : f32
    %102 = vector.broadcast %cst_37 : f32 to vector<64x20xf32>
    %103 = arith.divf %102, %99 : vector<64x20xf32>
    %104 = math.exp %103 : vector<64x20xf32>
    %cst_38 = arith.constant 0.000000e+00 : f32
    %105 = vector.broadcast %cst_38 : f32 to vector<64x20xf32>
    %106 = arith.select %101, %104, %105 : vector<64x20xi1>, vector<64x20xf32>
    %107 = arith.mulf %93, %106 : vector<64x20xf32>
    %cst_39 = arith.constant 4.47213602 : f32
    %108 = vector.broadcast %cst_39 : f32 to vector<64x20xf32>
    %109 = arith.mulf %107, %108 : vector<64x20xf32>
    %c0_40 = arith.constant 0 : index
    %c0_41 = arith.constant 0 : index
    %c0_42 = arith.constant 0 : index
    %110 = vector.load %arg2[%c0_40, %c0_41, %c0_42] : memref<1x64x1xf32, #tpu.memory_space<vmem>>, vector<1x64x1xf32>
    %111 = vector.shape_cast %110 : vector<1x64x1xf32> to vector<64x1xf32>
    %cst_43 = arith.constant 4.000000e-01 : f32
    %112 = vector.broadcast %cst_43 : f32 to vector<64x1xf32>
    %113 = arith.cmpf olt, %10, %112 : vector<64x1xf32>
    %cst_44 = arith.constant 1.000000e+00 : f32
    %cst_45 = arith.constant 0.000000e+00 : f32
    %114 = vector.broadcast %cst_44 : f32 to vector<64x1xf32>
    %115 = vector.broadcast %cst_45 : f32 to vector<64x1xf32>
    %116 = arith.select %113, %114, %115 : vector<64x1xi1>, vector<64x1xf32>
    %117 = arith.mulf %111, %116 : vector<64x1xf32>
    %118 = vector.broadcast %117 : vector<64x1xf32> to vector<64x20xf32>
    %119 = arith.mulf %109, %118 : vector<64x20xf32>
    %c0_46 = arith.constant 0 : index
    %c0_47 = arith.constant 0 : index
    %120 = vector.load %arg5[%c0_46, %c0_47] : memref<20x60xf32, #tpu.memory_space<vmem>>, vector<20x60xf32>
    %cst_48 = arith.constant dense<0.000000e+00> : vector<64x60xf32>
    %121 = tpu.matmul %119, %120, %cst_48 {dimension_numbers = #tpu.dot_dimension_numbers<[1], [0], [0], [1], [0, 0, 1, 1], [], []>} : vector<64x20xf32>, vector<20x60xf32>, vector<64x60xf32> -> vector<64x60xf32>
    %cst_49 = arith.constant 0.223606795 : f32
    %122 = vector.broadcast %cst_49 : f32 to vector<64x60xf32>
    %123 = arith.mulf %121, %122 : vector<64x60xf32>
    %cst_50 = arith.constant 0.000000e+00 : f32
    %124 = vector.broadcast %cst_50 : f32 to vector<64x60xf32>
    %125 = arith.maximumf %123, %124 : vector<64x60xf32>
    %cst_51 = arith.constant 1.41421354 : f32
    %126 = vector.broadcast %cst_51 : f32 to vector<64x60xf32>
    %127 = arith.mulf %125, %126 : vector<64x60xf32>
    %c0_52 = arith.constant 0 : index
    %c0_53 = arith.constant 0 : index
    %128 = vector.load %arg6[%c0_52, %c0_53] : memref<60x60xf32, #tpu.memory_space<vmem>>, vector<60x60xf32>
    %cst_54 = arith.constant dense<0.000000e+00> : vector<64x60xf32>
    %129 = tpu.matmul %127, %128, %cst_54 {dimension_numbers = #tpu.dot_dimension_numbers<[1], [0], [0], [1], [0, 0, 1, 1], [], []>} : vector<64x60xf32>, vector<60x60xf32>, vector<64x60xf32> -> vector<64x60xf32>
    %cst_55 = arith.constant 0.223606795 : f32
    %130 = vector.broadcast %cst_55 : f32 to vector<64x60xf32>
    %131 = arith.mulf %129, %130 : vector<64x60xf32>
    %cst_56 = arith.constant 0.000000e+00 : f32
    %132 = vector.broadcast %cst_56 : f32 to vector<64x60xf32>
    %133 = arith.maximumf %131, %132 : vector<64x60xf32>
    %cst_57 = arith.constant 1.41421354 : f32
    %134 = vector.broadcast %cst_57 : f32 to vector<64x60xf32>
    %135 = arith.mulf %133, %134 : vector<64x60xf32>
    %c0_58 = arith.constant 0 : index
    %c0_59 = arith.constant 0 : index
    %136 = vector.load %arg7[%c0_58, %c0_59] : memref<60x1408xf32, #tpu.memory_space<vmem>>, vector<60x1408xf32>
    %cst_60 = arith.constant dense<0.000000e+00> : vector<64x1408xf32>
    %137 = tpu.matmul %135, %136, %cst_60 {dimension_numbers = #tpu.dot_dimension_numbers<[1], [0], [0], [1], [0, 0, 1, 1], [], []>} : vector<64x60xf32>, vector<60x1408xf32>, vector<64x1408xf32> -> vector<64x1408xf32>
    %cst_61 = arith.constant 0.223606795 : f32
    %138 = vector.broadcast %cst_61 : f32 to vector<64x1408xf32>
    %139 = arith.mulf %137, %138 : vector<64x1408xf32>
    %140 = tpu.iota {dimensions = array<i32: 0>} : vector<8x64xi32>
    %141 = tpu.iota {dimensions = array<i32: 1>} : vector<8x64xi32>
    %c8_i32 = arith.constant 8 : i32
    %142 = vector.broadcast %c8_i32 : i32 to vector<8x64xi32>
    %143 = arith.muli %140, %142 : vector<8x64xi32>
    %144 = arith.cmpi sge, %141, %143 : vector<8x64xi32>
    %c8_i32_62 = arith.constant 8 : i32
    %145 = vector.broadcast %c8_i32_62 : i32 to vector<8x64xi32>
    %146 = arith.muli %140, %145 : vector<8x64xi32>
    %c8_i32_63 = arith.constant 8 : i32
    %147 = vector.broadcast %c8_i32_63 : i32 to vector<8x64xi32>
    %148 = arith.addi %146, %147 : vector<8x64xi32>
    %149 = arith.cmpi slt, %141, %148 : vector<8x64xi32>
    %150 = arith.andi %144, %149 : vector<8x64xi1>
    %cst_64 = arith.constant 1.000000e+00 : f32
    %cst_65 = arith.constant 0.000000e+00 : f32
    %151 = vector.broadcast %cst_64 : f32 to vector<8x64xf32>
    %152 = vector.broadcast %cst_65 : f32 to vector<8x64xf32>
    %153 = arith.select %150, %151, %152 : vector<8x64xi1>, vector<8x64xf32>
    %c0_66 = arith.constant 0 : index
    %c0_67 = arith.constant 0 : index
    %154 = vector.load %arg12[%c0_66, %c0_67] : memref<5x128xf32, #tpu.memory_space<vmem>>, vector<5x128xf32>
    %c0_68 = arith.constant 0 : index
    %c0_69 = arith.constant 0 : index
    %155 = vector.load %arg13[%c0_68, %c0_69] : memref<128x10xf32, #tpu.memory_space<vmem>>, vector<128x10xf32>
    %c0_70 = arith.constant 0 : index
    %c0_71 = arith.constant 0 : index
    %156 = vector.load %arg14[%c0_70, %c0_71] : memref<10x128xf32, #tpu.memory_space<vmem>>, vector<10x128xf32>
    %c0_72 = arith.constant 0 : index
    %c0_73 = arith.constant 0 : index
    %157 = vector.load %arg15[%c0_72, %c0_73] : memref<128x10xf32, #tpu.memory_space<vmem>>, vector<128x10xf32>
    %c0_74 = arith.constant 0 : index
    %c0_75 = arith.constant 0 : index
    %158 = vector.load %arg16[%c0_74, %c0_75] : memref<10x256xf32, #tpu.memory_space<vmem>>, vector<10x256xf32>
    %c0_76 = arith.constant 0 : index
    %c0_77 = arith.constant 0 : index
    %159 = vector.load %arg17[%c0_76, %c0_77] : memref<256x20xf32, #tpu.memory_space<vmem>>, vector<256x20xf32>
    %c0_78 = arith.constant 0 : index
    %c0_79 = arith.constant 0 : index
    %c0_80 = arith.constant 0 : index
    %160 = vector.load %arg4[%c0_78, %c0_79, %c0_80] : memref<1x8x5xf32, #tpu.memory_space<vmem>>, vector<1x8x5xf32>
    %161 = vector.shape_cast %160 : vector<1x8x5xf32> to vector<8x5xf32>
    %162 = tpu.concatenate %161, %161, %161, %161, %161, %161, %161, %161 in 0 : vector<8x5xf32>, vector<8x5xf32>, vector<8x5xf32>, vector<8x5xf32>, vector<8x5xf32>, vector<8x5xf32>, vector<8x5xf32>, vector<8x5xf32> -> vector<64x5xf32>
    %cst_81 = arith.constant dense<0.000000e+00> : vector<64x128xf32>
    %163 = tpu.matmul %162, %154, %cst_81 {dimension_numbers = #tpu.dot_dimension_numbers<[1], [0], [0], [1], [0, 0, 1, 1], [], []>} : vector<64x5xf32>, vector<5x128xf32>, vector<64x128xf32> -> vector<64x128xf32>
    %164 = vector.extract_strided_slice %139 {offsets = [0, 0], sizes = [64, 128], strides = [1, 1]} : vector<64x1408xf32> to vector<64x128xf32>
    %165 = arith.mulf %163, %164 : vector<64x128xf32>
    %cst_82 = arith.constant dense<0.000000e+00> : vector<64x10xf32>
    %166 = tpu.matmul %165, %155, %cst_82 {dimension_numbers = #tpu.dot_dimension_numbers<[1], [0], [0], [1], [0, 0, 1, 1], [], []>} : vector<64x128xf32>, vector<128x10xf32>, vector<64x10xf32> -> vector<64x10xf32>
    %167 = vector.extract_strided_slice %139 {offsets = [0, 128], sizes = [64, 128], strides = [1, 1]} : vector<64x1408xf32> to vector<64x128xf32>
    %168 = arith.mulf %163, %167 : vector<64x128xf32>
    %cst_83 = arith.constant dense<0.000000e+00> : vector<64x10xf32>
    %169 = tpu.matmul %168, %155, %cst_83 {dimension_numbers = #tpu.dot_dimension_numbers<[1], [0], [0], [1], [0, 0, 1, 1], [], []>} : vector<64x128xf32>, vector<128x10xf32>, vector<64x10xf32> -> vector<64x10xf32>
    %cst_84 = arith.constant dense<0.000000e+00> : vector<8x10xf32>
    %170 = tpu.matmul %153, %166, %cst_84 {dimension_numbers = #tpu.dot_dimension_numbers<[1], [0], [0], [1], [0, 0, 1, 1], [], []>} : vector<8x64xf32>, vector<64x10xf32>, vector<8x10xf32> -> vector<8x10xf32>
    %c0_85 = arith.constant 0 : index
    %c0_86 = arith.constant 0 : index
    %171 = vector.load %arg8[%c0_85, %c0_86] : memref<5x10xf32, #tpu.memory_space<vmem>>, vector<5x10xf32>
    %cst_87 = arith.constant dense<0.000000e+00> : vector<8x10xf32>
    %172 = tpu.matmul %161, %171, %cst_87 {dimension_numbers = #tpu.dot_dimension_numbers<[1], [0], [0], [1], [0, 0, 1, 1], [], []>} : vector<8x5xf32>, vector<5x10xf32>, vector<8x10xf32> -> vector<8x10xf32>
    %173 = arith.addf %170, %172 : vector<8x10xf32>
    %174 = vector.broadcast %18 : vector<64x1xf32> to vector<64x10xf32>
    %175 = arith.mulf %174, %169 : vector<64x10xf32>
    %cst_88 = arith.constant dense<0.000000e+00> : vector<8x10xf32>
    %176 = tpu.matmul %153, %175, %cst_88 {dimension_numbers = #tpu.dot_dimension_numbers<[1], [0], [0], [1], [0, 0, 1, 1], [], []>} : vector<8x64xf32>, vector<64x10xf32>, vector<8x10xf32> -> vector<8x10xf32>
    %177 = vector.broadcast %20 : vector<64x1xf32> to vector<64x10xf32>
    %178 = arith.mulf %177, %169 : vector<64x10xf32>
    %cst_89 = arith.constant dense<0.000000e+00> : vector<8x10xf32>
    %179 = tpu.matmul %153, %178, %cst_89 {dimension_numbers = #tpu.dot_dimension_numbers<[1], [0], [0], [1], [0, 0, 1, 1], [], []>} : vector<8x64xf32>, vector<64x10xf32>, vector<8x10xf32> -> vector<8x10xf32>
    %180 = vector.broadcast %22 : vector<64x1xf32> to vector<64x10xf32>
    %181 = arith.mulf %180, %169 : vector<64x10xf32>
    %cst_90 = arith.constant dense<0.000000e+00> : vector<8x10xf32>
    %182 = tpu.matmul %153, %181, %cst_90 {dimension_numbers = #tpu.dot_dimension_numbers<[1], [0], [0], [1], [0, 0, 1, 1], [], []>} : vector<8x64xf32>, vector<64x10xf32>, vector<8x10xf32> -> vector<8x10xf32>
    %cst_91 = arith.constant dense<0.000000e+00> : vector<10xf32>
    %183 = vector.multi_reduction <add>, %173, %cst_91 [0] : vector<8x10xf32> to vector<10xf32>
    %184 = vector.shape_cast %183 : vector<10xf32> to vector<1x10xf32>
    %cst_92 = arith.constant 8.000000e+00 : f32
    %185 = vector.broadcast %cst_92 : f32 to vector<1x10xf32>
    %186 = arith.divf %184, %185 : vector<1x10xf32>
    %187 = vector.broadcast %186 : vector<1x10xf32> to vector<8x10xf32>
    %188 = arith.subf %173, %187 : vector<8x10xf32>
    %189 = arith.mulf %188, %188 : vector<8x10xf32>
    %cst_93 = arith.constant dense<0.000000e+00> : vector<10xf32>
    %190 = vector.multi_reduction <add>, %189, %cst_93 [0] : vector<8x10xf32> to vector<10xf32>
    %191 = vector.shape_cast %190 : vector<10xf32> to vector<1x10xf32>
    %cst_94 = arith.constant 8.000000e+00 : f32
    %192 = vector.broadcast %cst_94 : f32 to vector<1x10xf32>
    %193 = arith.divf %191, %192 : vector<1x10xf32>
    %cst_95 = arith.constant 9.99999974E-6 : f32
    %194 = vector.broadcast %cst_95 : f32 to vector<1x10xf32>
    %195 = arith.addf %193, %194 : vector<1x10xf32>
    %196 = math.rsqrt %195 : vector<1x10xf32>
    %197 = vector.broadcast %196 : vector<1x10xf32> to vector<8x10xf32>
    %198 = arith.mulf %188, %197 : vector<8x10xf32>
    %199 = arith.mulf %176, %176 : vector<8x10xf32>
    %200 = arith.mulf %179, %179 : vector<8x10xf32>
    %201 = arith.addf %199, %200 : vector<8x10xf32>
    %202 = arith.mulf %182, %182 : vector<8x10xf32>
    %203 = arith.addf %201, %202 : vector<8x10xf32>
    %cst_96 = arith.constant dense<0.000000e+00> : vector<10xf32>
    %204 = vector.multi_reduction <add>, %203, %cst_96 [0] : vector<8x10xf32> to vector<10xf32>
    %205 = vector.shape_cast %204 : vector<10xf32> to vector<1x10xf32>
    %cst_97 = arith.constant 8.000000e+00 : f32
    %206 = vector.broadcast %cst_97 : f32 to vector<1x10xf32>
    %207 = arith.divf %205, %206 : vector<1x10xf32>
    %cst_98 = arith.constant 3.000000e+00 : f32
    %208 = vector.broadcast %cst_98 : f32 to vector<1x10xf32>
    %209 = arith.divf %207, %208 : vector<1x10xf32>
    %cst_99 = arith.constant 9.99999974E-6 : f32
    %210 = vector.broadcast %cst_99 : f32 to vector<1x10xf32>
    %211 = arith.addf %209, %210 : vector<1x10xf32>
    %212 = math.rsqrt %211 : vector<1x10xf32>
    %213 = vector.broadcast %212 : vector<1x10xf32> to vector<8x10xf32>
    %214 = arith.mulf %176, %213 : vector<8x10xf32>
    %215 = vector.broadcast %212 : vector<1x10xf32> to vector<8x10xf32>
    %216 = arith.mulf %179, %215 : vector<8x10xf32>
    %217 = vector.broadcast %212 : vector<1x10xf32> to vector<8x10xf32>
    %218 = arith.mulf %182, %217 : vector<8x10xf32>
    %219 = tpu.concatenate %198, %198, %198, %198, %198, %198, %198, %198 in 0 : vector<8x10xf32>, vector<8x10xf32>, vector<8x10xf32>, vector<8x10xf32>, vector<8x10xf32>, vector<8x10xf32>, vector<8x10xf32>, vector<8x10xf32> -> vector<64x10xf32>
    %220 = tpu.concatenate %214, %214, %214, %214, %214, %214, %214, %214 in 0 : vector<8x10xf32>, vector<8x10xf32>, vector<8x10xf32>, vector<8x10xf32>, vector<8x10xf32>, vector<8x10xf32>, vector<8x10xf32>, vector<8x10xf32> -> vector<64x10xf32>
    %221 = tpu.concatenate %216, %216, %216, %216, %216, %216, %216, %216 in 0 : vector<8x10xf32>, vector<8x10xf32>, vector<8x10xf32>, vector<8x10xf32>, vector<8x10xf32>, vector<8x10xf32>, vector<8x10xf32>, vector<8x10xf32> -> vector<64x10xf32>
    %222 = tpu.concatenate %218, %218, %218, %218, %218, %218, %218, %218 in 0 : vector<8x10xf32>, vector<8x10xf32>, vector<8x10xf32>, vector<8x10xf32>, vector<8x10xf32>, vector<8x10xf32>, vector<8x10xf32>, vector<8x10xf32> -> vector<64x10xf32>
    %223 = vector.broadcast %18 : vector<64x1xf32> to vector<64x10xf32>
    %224 = arith.mulf %220, %223 : vector<64x10xf32>
    %225 = vector.broadcast %20 : vector<64x1xf32> to vector<64x10xf32>
    %226 = arith.mulf %221, %225 : vector<64x10xf32>
    %227 = arith.addf %224, %226 : vector<64x10xf32>
    %228 = vector.broadcast %22 : vector<64x1xf32> to vector<64x10xf32>
    %229 = arith.mulf %222, %228 : vector<64x10xf32>
    %230 = arith.addf %227, %229 : vector<64x10xf32>
    %231 = vector.broadcast %50 : vector<64x1xf32> to vector<64x10xf32>
    %232 = arith.mulf %220, %231 : vector<64x10xf32>
    %233 = vector.broadcast %63 : vector<64x1xf32> to vector<64x10xf32>
    %234 = arith.mulf %221, %233 : vector<64x10xf32>
    %235 = arith.addf %232, %234 : vector<64x10xf32>
    %236 = vector.broadcast %67 : vector<64x1xf32> to vector<64x10xf32>
    %237 = arith.mulf %222, %236 : vector<64x10xf32>
    %238 = arith.addf %235, %237 : vector<64x10xf32>
    %239 = vector.broadcast %63 : vector<64x1xf32> to vector<64x10xf32>
    %240 = arith.mulf %220, %239 : vector<64x10xf32>
    %241 = vector.broadcast %57 : vector<64x1xf32> to vector<64x10xf32>
    %242 = arith.mulf %221, %241 : vector<64x10xf32>
    %243 = arith.addf %240, %242 : vector<64x10xf32>
    %244 = vector.broadcast %65 : vector<64x1xf32> to vector<64x10xf32>
    %245 = arith.mulf %222, %244 : vector<64x10xf32>
    %246 = arith.addf %243, %245 : vector<64x10xf32>
    %247 = vector.broadcast %67 : vector<64x1xf32> to vector<64x10xf32>
    %248 = arith.mulf %220, %247 : vector<64x10xf32>
    %249 = vector.broadcast %65 : vector<64x1xf32> to vector<64x10xf32>
    %250 = arith.mulf %221, %249 : vector<64x10xf32>
    %251 = arith.addf %248, %250 : vector<64x10xf32>
    %252 = vector.broadcast %61 : vector<64x1xf32> to vector<64x10xf32>
    %253 = arith.mulf %222, %252 : vector<64x10xf32>
    %254 = arith.addf %251, %253 : vector<64x10xf32>
    %cst_100 = arith.constant dense<0.000000e+00> : vector<64x128xf32>
    %255 = tpu.matmul %219, %156, %cst_100 {dimension_numbers = #tpu.dot_dimension_numbers<[1], [0], [0], [1], [0, 0, 1, 1], [], []>} : vector<64x10xf32>, vector<10x128xf32>, vector<64x128xf32> -> vector<64x128xf32>
    %cst_101 = arith.constant dense<0.000000e+00> : vector<64x128xf32>
    %256 = tpu.matmul %230, %156, %cst_101 {dimension_numbers = #tpu.dot_dimension_numbers<[1], [0], [0], [1], [0, 0, 1, 1], [], []>} : vector<64x10xf32>, vector<10x128xf32>, vector<64x128xf32> -> vector<64x128xf32>
    %cst_102 = arith.constant dense<0.000000e+00> : vector<64x128xf32>
    %257 = tpu.matmul %220, %156, %cst_102 {dimension_numbers = #tpu.dot_dimension_numbers<[1], [0], [0], [1], [0, 0, 1, 1], [], []>} : vector<64x10xf32>, vector<10x128xf32>, vector<64x128xf32> -> vector<64x128xf32>
    %cst_103 = arith.constant dense<0.000000e+00> : vector<64x128xf32>
    %258 = tpu.matmul %221, %156, %cst_103 {dimension_numbers = #tpu.dot_dimension_numbers<[1], [0], [0], [1], [0, 0, 1, 1], [], []>} : vector<64x10xf32>, vector<10x128xf32>, vector<64x128xf32> -> vector<64x128xf32>
    %cst_104 = arith.constant dense<0.000000e+00> : vector<64x128xf32>
    %259 = tpu.matmul %222, %156, %cst_104 {dimension_numbers = #tpu.dot_dimension_numbers<[1], [0], [0], [1], [0, 0, 1, 1], [], []>} : vector<64x10xf32>, vector<10x128xf32>, vector<64x128xf32> -> vector<64x128xf32>
    %cst_105 = arith.constant dense<0.000000e+00> : vector<64x128xf32>
    %260 = tpu.matmul %238, %156, %cst_105 {dimension_numbers = #tpu.dot_dimension_numbers<[1], [0], [0], [1], [0, 0, 1, 1], [], []>} : vector<64x10xf32>, vector<10x128xf32>, vector<64x128xf32> -> vector<64x128xf32>
    %cst_106 = arith.constant dense<0.000000e+00> : vector<64x128xf32>
    %261 = tpu.matmul %246, %156, %cst_106 {dimension_numbers = #tpu.dot_dimension_numbers<[1], [0], [0], [1], [0, 0, 1, 1], [], []>} : vector<64x10xf32>, vector<10x128xf32>, vector<64x128xf32> -> vector<64x128xf32>
    %cst_107 = arith.constant dense<0.000000e+00> : vector<64x128xf32>
    %262 = tpu.matmul %254, %156, %cst_107 {dimension_numbers = #tpu.dot_dimension_numbers<[1], [0], [0], [1], [0, 0, 1, 1], [], []>} : vector<64x10xf32>, vector<10x128xf32>, vector<64x128xf32> -> vector<64x128xf32>
    %263 = vector.extract_strided_slice %139 {offsets = [0, 256], sizes = [64, 128], strides = [1, 1]} : vector<64x1408xf32> to vector<64x128xf32>
    %264 = vector.extract_strided_slice %139 {offsets = [0, 384], sizes = [64, 128], strides = [1, 1]} : vector<64x1408xf32> to vector<64x128xf32>
    %265 = vector.extract_strided_slice %139 {offsets = [0, 512], sizes = [64, 128], strides = [1, 1]} : vector<64x1408xf32> to vector<64x128xf32>
    %266 = vector.extract_strided_slice %139 {offsets = [0, 640], sizes = [64, 128], strides = [1, 1]} : vector<64x1408xf32> to vector<64x128xf32>
    %267 = vector.extract_strided_slice %139 {offsets = [0, 768], sizes = [64, 128], strides = [1, 1]} : vector<64x1408xf32> to vector<64x128xf32>
    %268 = arith.mulf %255, %263 : vector<64x128xf32>
    %269 = arith.mulf %256, %264 : vector<64x128xf32>
    %270 = arith.addf %268, %269 : vector<64x128xf32>
    %cst_108 = arith.constant dense<0.000000e+00> : vector<64x10xf32>
    %271 = tpu.matmul %270, %157, %cst_108 {dimension_numbers = #tpu.dot_dimension_numbers<[1], [0], [0], [1], [0, 0, 1, 1], [], []>} : vector<64x128xf32>, vector<128x10xf32>, vector<64x10xf32> -> vector<64x10xf32>
    %272 = arith.mulf %255, %265 : vector<64x128xf32>
    %cst_109 = arith.constant dense<0.000000e+00> : vector<64x10xf32>
    %273 = tpu.matmul %272, %157, %cst_109 {dimension_numbers = #tpu.dot_dimension_numbers<[1], [0], [0], [1], [0, 0, 1, 1], [], []>} : vector<64x128xf32>, vector<128x10xf32>, vector<64x10xf32> -> vector<64x10xf32>
    %274 = arith.mulf %257, %266 : vector<64x128xf32>
    %275 = arith.mulf %260, %267 : vector<64x128xf32>
    %276 = arith.addf %274, %275 : vector<64x128xf32>
    %cst_110 = arith.constant dense<0.000000e+00> : vector<64x10xf32>
    %277 = tpu.matmul %276, %157, %cst_110 {dimension_numbers = #tpu.dot_dimension_numbers<[1], [0], [0], [1], [0, 0, 1, 1], [], []>} : vector<64x128xf32>, vector<128x10xf32>, vector<64x10xf32> -> vector<64x10xf32>
    %278 = vector.broadcast %18 : vector<64x1xf32> to vector<64x10xf32>
    %279 = arith.mulf %278, %273 : vector<64x10xf32>
    %280 = arith.addf %277, %279 : vector<64x10xf32>
    %281 = arith.mulf %258, %266 : vector<64x128xf32>
    %282 = arith.mulf %261, %267 : vector<64x128xf32>
    %283 = arith.addf %281, %282 : vector<64x128xf32>
    %cst_111 = arith.constant dense<0.000000e+00> : vector<64x10xf32>
    %284 = tpu.matmul %283, %157, %cst_111 {dimension_numbers = #tpu.dot_dimension_numbers<[1], [0], [0], [1], [0, 0, 1, 1], [], []>} : vector<64x128xf32>, vector<128x10xf32>, vector<64x10xf32> -> vector<64x10xf32>
    %285 = vector.broadcast %20 : vector<64x1xf32> to vector<64x10xf32>
    %286 = arith.mulf %285, %273 : vector<64x10xf32>
    %287 = arith.addf %284, %286 : vector<64x10xf32>
    %288 = arith.mulf %259, %266 : vector<64x128xf32>
    %289 = arith.mulf %262, %267 : vector<64x128xf32>
    %290 = arith.addf %288, %289 : vector<64x128xf32>
    %cst_112 = arith.constant dense<0.000000e+00> : vector<64x10xf32>
    %291 = tpu.matmul %290, %157, %cst_112 {dimension_numbers = #tpu.dot_dimension_numbers<[1], [0], [0], [1], [0, 0, 1, 1], [], []>} : vector<64x128xf32>, vector<128x10xf32>, vector<64x10xf32> -> vector<64x10xf32>
    %292 = vector.broadcast %22 : vector<64x1xf32> to vector<64x10xf32>
    %293 = arith.mulf %292, %273 : vector<64x10xf32>
    %294 = arith.addf %291, %293 : vector<64x10xf32>
    %cst_113 = arith.constant dense<0.000000e+00> : vector<8x10xf32>
    %295 = tpu.matmul %153, %271, %cst_113 {dimension_numbers = #tpu.dot_dimension_numbers<[1], [0], [0], [1], [0, 0, 1, 1], [], []>} : vector<8x64xf32>, vector<64x10xf32>, vector<8x10xf32> -> vector<8x10xf32>
    %c0_114 = arith.constant 0 : index
    %c0_115 = arith.constant 0 : index
    %296 = vector.load %arg9[%c0_114, %c0_115] : memref<10x10xf32, #tpu.memory_space<vmem>>, vector<10x10xf32>
    %cst_116 = arith.constant dense<0.000000e+00> : vector<8x10xf32>
    %297 = tpu.matmul %198, %296, %cst_116 {dimension_numbers = #tpu.dot_dimension_numbers<[1], [0], [0], [1], [0, 0, 1, 1], [], []>} : vector<8x10xf32>, vector<10x10xf32>, vector<8x10xf32> -> vector<8x10xf32>
    %298 = arith.addf %295, %297 : vector<8x10xf32>
    %cst_117 = arith.constant dense<0.000000e+00> : vector<8x10xf32>
    %299 = tpu.matmul %153, %280, %cst_117 {dimension_numbers = #tpu.dot_dimension_numbers<[1], [0], [0], [1], [0, 0, 1, 1], [], []>} : vector<8x64xf32>, vector<64x10xf32>, vector<8x10xf32> -> vector<8x10xf32>
    %c0_118 = arith.constant 0 : index
    %c0_119 = arith.constant 0 : index
    %300 = vector.load %arg10[%c0_118, %c0_119] : memref<10x10xf32, #tpu.memory_space<vmem>>, vector<10x10xf32>
    %cst_120 = arith.constant dense<0.000000e+00> : vector<8x10xf32>
    %301 = tpu.matmul %214, %300, %cst_120 {dimension_numbers = #tpu.dot_dimension_numbers<[1], [0], [0], [1], [0, 0, 1, 1], [], []>} : vector<8x10xf32>, vector<10x10xf32>, vector<8x10xf32> -> vector<8x10xf32>
    %302 = arith.addf %299, %301 : vector<8x10xf32>
    %cst_121 = arith.constant dense<0.000000e+00> : vector<8x10xf32>
    %303 = tpu.matmul %153, %287, %cst_121 {dimension_numbers = #tpu.dot_dimension_numbers<[1], [0], [0], [1], [0, 0, 1, 1], [], []>} : vector<8x64xf32>, vector<64x10xf32>, vector<8x10xf32> -> vector<8x10xf32>
    %c0_122 = arith.constant 0 : index
    %c0_123 = arith.constant 0 : index
    %304 = vector.load %arg10[%c0_122, %c0_123] : memref<10x10xf32, #tpu.memory_space<vmem>>, vector<10x10xf32>
    %cst_124 = arith.constant dense<0.000000e+00> : vector<8x10xf32>
    %305 = tpu.matmul %216, %304, %cst_124 {dimension_numbers = #tpu.dot_dimension_numbers<[1], [0], [0], [1], [0, 0, 1, 1], [], []>} : vector<8x10xf32>, vector<10x10xf32>, vector<8x10xf32> -> vector<8x10xf32>
    %306 = arith.addf %303, %305 : vector<8x10xf32>
    %cst_125 = arith.constant dense<0.000000e+00> : vector<8x10xf32>
    %307 = tpu.matmul %153, %294, %cst_125 {dimension_numbers = #tpu.dot_dimension_numbers<[1], [0], [0], [1], [0, 0, 1, 1], [], []>} : vector<8x64xf32>, vector<64x10xf32>, vector<8x10xf32> -> vector<8x10xf32>
    %c0_126 = arith.constant 0 : index
    %c0_127 = arith.constant 0 : index
    %308 = vector.load %arg10[%c0_126, %c0_127] : memref<10x10xf32, #tpu.memory_space<vmem>>, vector<10x10xf32>
    %cst_128 = arith.constant dense<0.000000e+00> : vector<8x10xf32>
    %309 = tpu.matmul %218, %308, %cst_128 {dimension_numbers = #tpu.dot_dimension_numbers<[1], [0], [0], [1], [0, 0, 1, 1], [], []>} : vector<8x10xf32>, vector<10x10xf32>, vector<8x10xf32> -> vector<8x10xf32>
    %310 = arith.addf %307, %309 : vector<8x10xf32>
    %cst_129 = arith.constant dense<0.000000e+00> : vector<10xf32>
    %311 = vector.multi_reduction <add>, %298, %cst_129 [0] : vector<8x10xf32> to vector<10xf32>
    %312 = vector.shape_cast %311 : vector<10xf32> to vector<1x10xf32>
    %cst_130 = arith.constant 8.000000e+00 : f32
    %313 = vector.broadcast %cst_130 : f32 to vector<1x10xf32>
    %314 = arith.divf %312, %313 : vector<1x10xf32>
    %315 = vector.broadcast %314 : vector<1x10xf32> to vector<8x10xf32>
    %316 = arith.subf %298, %315 : vector<8x10xf32>
    %317 = arith.mulf %316, %316 : vector<8x10xf32>
    %cst_131 = arith.constant dense<0.000000e+00> : vector<10xf32>
    %318 = vector.multi_reduction <add>, %317, %cst_131 [0] : vector<8x10xf32> to vector<10xf32>
    %319 = vector.shape_cast %318 : vector<10xf32> to vector<1x10xf32>
    %cst_132 = arith.constant 8.000000e+00 : f32
    %320 = vector.broadcast %cst_132 : f32 to vector<1x10xf32>
    %321 = arith.divf %319, %320 : vector<1x10xf32>
    %cst_133 = arith.constant 9.99999974E-6 : f32
    %322 = vector.broadcast %cst_133 : f32 to vector<1x10xf32>
    %323 = arith.addf %321, %322 : vector<1x10xf32>
    %324 = math.rsqrt %323 : vector<1x10xf32>
    %325 = vector.broadcast %324 : vector<1x10xf32> to vector<8x10xf32>
    %326 = arith.mulf %316, %325 : vector<8x10xf32>
    %327 = arith.mulf %302, %302 : vector<8x10xf32>
    %328 = arith.mulf %306, %306 : vector<8x10xf32>
    %329 = arith.addf %327, %328 : vector<8x10xf32>
    %330 = arith.mulf %310, %310 : vector<8x10xf32>
    %331 = arith.addf %329, %330 : vector<8x10xf32>
    %cst_134 = arith.constant dense<0.000000e+00> : vector<10xf32>
    %332 = vector.multi_reduction <add>, %331, %cst_134 [0] : vector<8x10xf32> to vector<10xf32>
    %333 = vector.shape_cast %332 : vector<10xf32> to vector<1x10xf32>
    %cst_135 = arith.constant 8.000000e+00 : f32
    %334 = vector.broadcast %cst_135 : f32 to vector<1x10xf32>
    %335 = arith.divf %333, %334 : vector<1x10xf32>
    %cst_136 = arith.constant 3.000000e+00 : f32
    %336 = vector.broadcast %cst_136 : f32 to vector<1x10xf32>
    %337 = arith.divf %335, %336 : vector<1x10xf32>
    %cst_137 = arith.constant 9.99999974E-6 : f32
    %338 = vector.broadcast %cst_137 : f32 to vector<1x10xf32>
    %339 = arith.addf %337, %338 : vector<1x10xf32>
    %340 = math.rsqrt %339 : vector<1x10xf32>
    %341 = vector.broadcast %340 : vector<1x10xf32> to vector<8x10xf32>
    %342 = arith.mulf %302, %341 : vector<8x10xf32>
    %343 = vector.broadcast %340 : vector<1x10xf32> to vector<8x10xf32>
    %344 = arith.mulf %306, %343 : vector<8x10xf32>
    %345 = vector.broadcast %340 : vector<1x10xf32> to vector<8x10xf32>
    %346 = arith.mulf %310, %345 : vector<8x10xf32>
    %347 = tpu.concatenate %326, %326, %326, %326, %326, %326, %326, %326 in 0 : vector<8x10xf32>, vector<8x10xf32>, vector<8x10xf32>, vector<8x10xf32>, vector<8x10xf32>, vector<8x10xf32>, vector<8x10xf32>, vector<8x10xf32> -> vector<64x10xf32>
    %348 = tpu.concatenate %342, %342, %342, %342, %342, %342, %342, %342 in 0 : vector<8x10xf32>, vector<8x10xf32>, vector<8x10xf32>, vector<8x10xf32>, vector<8x10xf32>, vector<8x10xf32>, vector<8x10xf32>, vector<8x10xf32> -> vector<64x10xf32>
    %349 = tpu.concatenate %344, %344, %344, %344, %344, %344, %344, %344 in 0 : vector<8x10xf32>, vector<8x10xf32>, vector<8x10xf32>, vector<8x10xf32>, vector<8x10xf32>, vector<8x10xf32>, vector<8x10xf32>, vector<8x10xf32> -> vector<64x10xf32>
    %350 = tpu.concatenate %346, %346, %346, %346, %346, %346, %346, %346 in 0 : vector<8x10xf32>, vector<8x10xf32>, vector<8x10xf32>, vector<8x10xf32>, vector<8x10xf32>, vector<8x10xf32>, vector<8x10xf32>, vector<8x10xf32> -> vector<64x10xf32>
    %351 = vector.broadcast %18 : vector<64x1xf32> to vector<64x10xf32>
    %352 = arith.mulf %348, %351 : vector<64x10xf32>
    %353 = vector.broadcast %20 : vector<64x1xf32> to vector<64x10xf32>
    %354 = arith.mulf %349, %353 : vector<64x10xf32>
    %355 = arith.addf %352, %354 : vector<64x10xf32>
    %356 = vector.broadcast %22 : vector<64x1xf32> to vector<64x10xf32>
    %357 = arith.mulf %350, %356 : vector<64x10xf32>
    %358 = arith.addf %355, %357 : vector<64x10xf32>
    %cst_138 = arith.constant dense<0.000000e+00> : vector<64x256xf32>
    %359 = tpu.matmul %347, %158, %cst_138 {dimension_numbers = #tpu.dot_dimension_numbers<[1], [0], [0], [1], [0, 0, 1, 1], [], []>} : vector<64x10xf32>, vector<10x256xf32>, vector<64x256xf32> -> vector<64x256xf32>
    %cst_139 = arith.constant dense<0.000000e+00> : vector<64x256xf32>
    %360 = tpu.matmul %358, %158, %cst_139 {dimension_numbers = #tpu.dot_dimension_numbers<[1], [0], [0], [1], [0, 0, 1, 1], [], []>} : vector<64x10xf32>, vector<10x256xf32>, vector<64x256xf32> -> vector<64x256xf32>
    %361 = vector.extract_strided_slice %139 {offsets = [0, 896], sizes = [64, 256], strides = [1, 1]} : vector<64x1408xf32> to vector<64x256xf32>
    %362 = arith.mulf %359, %361 : vector<64x256xf32>
    %363 = vector.extract_strided_slice %139 {offsets = [0, 1152], sizes = [64, 256], strides = [1, 1]} : vector<64x1408xf32> to vector<64x256xf32>
    %364 = arith.mulf %360, %363 : vector<64x256xf32>
    %365 = arith.addf %362, %364 : vector<64x256xf32>
    %cst_140 = arith.constant dense<0.000000e+00> : vector<64x20xf32>
    %366 = tpu.matmul %365, %159, %cst_140 {dimension_numbers = #tpu.dot_dimension_numbers<[1], [0], [0], [1], [0, 0, 1, 1], [], []>} : vector<64x256xf32>, vector<256x20xf32>, vector<64x20xf32> -> vector<64x20xf32>
    %cst_141 = arith.constant dense<0.000000e+00> : vector<8x20xf32>
    %367 = tpu.matmul %153, %366, %cst_141 {dimension_numbers = #tpu.dot_dimension_numbers<[1], [0], [0], [1], [0, 0, 1, 1], [], []>} : vector<8x64xf32>, vector<64x20xf32>, vector<8x20xf32> -> vector<8x20xf32>
    %c0_142 = arith.constant 0 : index
    %c0_143 = arith.constant 0 : index
    %368 = vector.load %arg11[%c0_142, %c0_143] : memref<10x20xf32, #tpu.memory_space<vmem>>, vector<10x20xf32>
    %cst_144 = arith.constant dense<0.000000e+00> : vector<8x20xf32>
    %369 = tpu.matmul %326, %368, %cst_144 {dimension_numbers = #tpu.dot_dimension_numbers<[1], [0], [0], [1], [0, 0, 1, 1], [], []>} : vector<8x10xf32>, vector<10x20xf32>, vector<8x20xf32> -> vector<8x20xf32>
    %370 = arith.addf %367, %369 : vector<8x20xf32>
    %cst_145 = arith.constant dense<0.000000e+00> : vector<20xf32>
    %371 = vector.multi_reduction <add>, %370, %cst_145 [0] : vector<8x20xf32> to vector<20xf32>
    %372 = vector.shape_cast %371 : vector<20xf32> to vector<1x20xf32>
    %cst_146 = arith.constant 8.000000e+00 : f32
    %373 = vector.broadcast %cst_146 : f32 to vector<1x20xf32>
    %374 = arith.divf %372, %373 : vector<1x20xf32>
    %375 = vector.broadcast %374 : vector<1x20xf32> to vector<8x20xf32>
    %376 = arith.subf %370, %375 : vector<8x20xf32>
    %377 = arith.mulf %376, %376 : vector<8x20xf32>
    %cst_147 = arith.constant dense<0.000000e+00> : vector<20xf32>
    %378 = vector.multi_reduction <add>, %377, %cst_147 [0] : vector<8x20xf32> to vector<20xf32>
    %379 = vector.shape_cast %378 : vector<20xf32> to vector<1x20xf32>
    %cst_148 = arith.constant 8.000000e+00 : f32
    %380 = vector.broadcast %cst_148 : f32 to vector<1x20xf32>
    %381 = arith.divf %379, %380 : vector<1x20xf32>
    %cst_149 = arith.constant 9.99999974E-6 : f32
    %382 = vector.broadcast %cst_149 : f32 to vector<1x20xf32>
    %383 = arith.addf %381, %382 : vector<1x20xf32>
    %384 = math.rsqrt %383 : vector<1x20xf32>
    %385 = vector.broadcast %384 : vector<1x20xf32> to vector<8x20xf32>
    %386 = arith.mulf %376, %385 : vector<8x20xf32>
    %c0_150 = arith.constant 0 : index
    %c0_151 = arith.constant 0 : index
    %c0_152 = arith.constant 0 : index
    %387 = vector.load %arg3[%c0_150, %c0_151, %c0_152] : memref<1x2x8xf32, #tpu.memory_space<vmem>>, vector<1x2x8xf32>
    %388 = vector.shape_cast %387 : vector<1x2x8xf32> to vector<2x8xf32>
    %cst_153 = arith.constant dense<0.000000e+00> : vector<2x20xf32>
    %389 = tpu.matmul %388, %386, %cst_153 {dimension_numbers = #tpu.dot_dimension_numbers<[1], [0], [0], [1], [0, 0, 1, 1], [], []>} : vector<2x8xf32>, vector<8x20xf32>, vector<2x20xf32> -> vector<2x20xf32>
    %cst_154 = arith.constant dense<0xFF800000> : vector<2xf32>
    %390 = vector.multi_reduction <maximumf>, %389, %cst_154 [1] : vector<2x20xf32> to vector<2xf32>
    %391 = vector.shape_cast %390 : vector<2xf32> to vector<2x1xf32>
    %392 = vector.broadcast %391 : vector<2x1xf32> to vector<2x20xf32>
    %393 = arith.subf %389, %392 : vector<2x20xf32>
    %394 = math.exp %393 : vector<2x20xf32>
    %cst_155 = arith.constant dense<0.000000e+00> : vector<2xf32>
    %395 = vector.multi_reduction <add>, %394, %cst_155 [1] : vector<2x20xf32> to vector<2xf32>
    %396 = vector.shape_cast %395 : vector<2xf32> to vector<2x1xf32>
    %397 = vector.broadcast %396 : vector<2x1xf32> to vector<2x20xf32>
    %398 = arith.divf %394, %397 : vector<2x20xf32>
    %c0_156 = arith.constant 0 : index
    %c0_157 = arith.constant 0 : index
    %c0_158 = arith.constant 0 : index
    %399 = vector.load %arg18[%c0_156, %c0_157, %c0_158] : memref<1x2x20xf32, #tpu.memory_space<vmem>>, vector<1x2x20xf32>
    %400 = vector.shape_cast %399 : vector<1x2x20xf32> to vector<2x20xf32>
    %401 = vector.shape_cast %398 : vector<2x20xf32> to vector<1x2x20xf32>
    tpu.vector_store %arg18[%c0_156, %c0_157, %c0_158], %401 {strides = array<i32>} : memref<1x2x20xf32, #tpu.memory_space<vmem>>, vector<1x2x20xf32>,
    return
  }
  func.func @transform_0(%arg0: i32) -> (i32, i32, i32) {
    %c0_i32 = arith.constant 0 : i32
    %c0_i32_0 = arith.constant 0 : i32
    %c0_i32_1 = arith.constant 0 : i32
    return %arg0, %c0_i32, %c0_i32_0 : i32, i32, i32
  }
  func.func @transform_1(%arg0: i32) -> (i32, i32, i32) {
    %c0_i32 = arith.constant 0 : i32
    %c0_i32_0 = arith.constant 0 : i32
    %c0_i32_1 = arith.constant 0 : i32
    return %arg0, %c0_i32, %c0_i32_0 : i32, i32, i32
  }
  func.func @transform_2(%arg0: i32) -> (i32, i32, i32) {
    %c0_i32 = arith.constant 0 : i32
    %c0_i32_0 = arith.constant 0 : i32
    %c0_i32_1 = arith.constant 0 : i32
    return %arg0, %c0_i32, %c0_i32_0 : i32, i32, i32
  }
  func.func @transform_3(%arg0: i32) -> (i32, i32, i32) {
    %c0_i32 = arith.constant 0 : i32
    %c0_i32_0 = arith.constant 0 : i32
    %c0_i32_1 = arith.constant 0 : i32
    return %arg0, %c0_i32, %c0_i32_0 : i32, i32, i32
  }
  func.func @transform_4(%arg0: i32) -> (i32, i32) {
    %c0_i32 = arith.constant 0 : i32
    %c0_i32_0 = arith.constant 0 : i32
    %c0_i32_1 = arith.constant 0 : i32
    return %c0_i32, %c0_i32_0 : i32, i32
  }
  func.func @transform_5(%arg0: i32) -> (i32, i32) {
    %c0_i32 = arith.constant 0 : i32
    %c0_i32_0 = arith.constant 0 : i32
    %c0_i32_1 = arith.constant 0 : i32
    return %c0_i32, %c0_i32_0 : i32, i32
  }
  func.func @transform_6(%arg0: i32) -> (i32, i32) {
    %c0_i32 = arith.constant 0 : i32
    %c0_i32_0 = arith.constant 0 : i32
    %c0_i32_1 = arith.constant 0 : i32
    return %c0_i32, %c0_i32_0 : i32, i32
  }
  func.func @transform_7(%arg0: i32) -> (i32, i32) {
    %c0_i32 = arith.constant 0 : i32
    %c0_i32_0 = arith.constant 0 : i32
    %c0_i32_1 = arith.constant 0 : i32
    return %c0_i32, %c0_i32_0 : i32, i32
  }
  func.func @transform_8(%arg0: i32) -> (i32, i32) {
    %c0_i32 = arith.constant 0 : i32
    %c0_i32_0 = arith.constant 0 : i32
    %c0_i32_1 = arith.constant 0 : i32
    return %c0_i32, %c0_i32_0 : i32, i32
  }
  func.func @transform_9(%arg0: i32) -> (i32, i32) {
    %c0_i32 = arith.constant 0 : i32
    %c0_i32_0 = arith.constant 0 : i32
    %c0_i32_1 = arith.constant 0 : i32
    return %c0_i32, %c0_i32_0 : i32, i32
  }
  func.func @transform_10(%arg0: i32) -> (i32, i32) {
    %c0_i32 = arith.constant 0 : i32
    %c0_i32_0 = arith.constant 0 : i32
    %c0_i32_1 = arith.constant 0 : i32
    return %c0_i32, %c0_i32_0 : i32, i32
  }
  func.func @transform_11(%arg0: i32) -> (i32, i32) {
    %c0_i32 = arith.constant 0 : i32
    %c0_i32_0 = arith.constant 0 : i32
    %c0_i32_1 = arith.constant 0 : i32
    return %c0_i32, %c0_i32_0 : i32, i32
  }
  func.func @transform_12(%arg0: i32) -> (i32, i32) {
    %c0_i32 = arith.constant 0 : i32
    %c0_i32_0 = arith.constant 0 : i32
    %c0_i32_1 = arith.constant 0 : i32
    return %c0_i32, %c0_i32_0 : i32, i32
  }
  func.func @transform_13(%arg0: i32) -> (i32, i32) {
    %c0_i32 = arith.constant 0 : i32
    %c0_i32_0 = arith.constant 0 : i32
    %c0_i32_1 = arith.constant 0 : i32
    return %c0_i32, %c0_i32_0 : i32, i32
  }
  func.func @transform_14(%arg0: i32) -> (i32, i32) {
    %c0_i32 = arith.constant 0 : i32
    %c0_i32_0 = arith.constant 0 : i32
    %c0_i32_1 = arith.constant 0 : i32
    return %c0_i32, %c0_i32_0 : i32, i32
  }
  func.func @transform_15(%arg0: i32) -> (i32, i32) {
    %c0_i32 = arith.constant 0 : i32
    %c0_i32_0 = arith.constant 0 : i32
    %c0_i32_1 = arith.constant 0 : i32
    return %c0_i32, %c0_i32_0 : i32, i32
  }
  func.func @transform_16(%arg0: i32) -> (i32, i32) {
    %c0_i32 = arith.constant 0 : i32
    %c0_i32_0 = arith.constant 0 : i32
    %c0_i32_1 = arith.constant 0 : i32
    return %c0_i32, %c0_i32_0 : i32, i32
  }
  func.func @transform_17(%arg0: i32) -> (i32, i32, i32) {
    %c0_i32 = arith.constant 0 : i32
    %c0_i32_0 = arith.constant 0 : i32
    %c0_i32_1 = arith.constant 0 : i32
    return %arg0, %c0_i32, %c0_i32_0 : i32, i32, i32
  }
}

</mosaic_0001>

<bundles_post_ra>
// kernel: tpu_custom_call.1
= control target key start
LH: loop header
LB: loop body
LE: loop exit
PB: predicated region body
PF: predicated region fallthrough
CT: control target
= control target key end

     0   :  { %s12343_s0 = inlined_call_operand.vmem [shape: f32[4,64,3], index: 0, kind: input, shape index: {}]   ;;  %s12344_s1 = inlined_call_operand.vmem [shape: f32[4,64,1], index: 1, kind: input, shape index: {}]   ;;  %s12345_s2 = inlined_call_operand.vmem [shape: f32[4,2,8], index: 2, kind: input, shape index: {}]   ;;  %s12346_s3 = inlined_call_operand.vmem [shape: f32[4,8,5], index: 3, kind: input, shape index: {}]   ;;  %s12347_s4 = inlined_call_operand.vmem [shape: f32[20,60], index: 4, kind: input, shape index: {}]   ;;  %s12348_s5 = inlined_call_operand.vmem [shape: f32[60,60], index: 5, kind: input, shape index: {}]   ;;  %s12349_s6 = inlined_call_operand.vmem [shape: f32[60,1408], index: 6, kind: input, shape index: {}]   ;;  %s12350_s7 = inlined_call_operand.vmem [shape: f32[5,10], index: 7, kind: input, shape index: {}]   ;;  %s12351_s8 = inlined_call_operand.vmem [shape: f32[10,10], index: 8, kind: input, shape index: {}]   ;;  %s12352_s9 = inlined_call_operand.vmem [shape: f32[10,10], index: 9, kind: input, shape index: {}]   ;;  %s12353_s10 = inlined_call_operand.vmem [shape: f32[10,20], index: 10, kind: input, shape index: {}]   ;;  %s12354_s11 = inlined_call_operand.vmem [shape: f32[5,128], index: 11, kind: input, shape index: {}]   ;;  %s12355_s12 = inlined_call_operand.vmem [shape: f32[128,10], index: 12, kind: input, shape index: {}]   ;;  %s12356_s13 = inlined_call_operand.vmem [shape: f32[10,128], index: 13, kind: input, shape index: {}]   ;;  %s12357_s14 = inlined_call_operand.vmem [shape: f32[128,10], index: 14, kind: input, shape index: {}]   ;;  %s12358_s15 = inlined_call_operand.vmem [shape: f32[10,256], index: 15, kind: input, shape index: {}]   ;;  %s12359_s16 = inlined_call_operand.vmem [shape: f32[256,20], index: 16, kind: input, shape index: {}]   ;;  %s12360_s17 = inlined_call_operand.hbm [shape: f32[4,2,20], index: 17, kind: output, shape index: {}]  }
   0x1   :  { %12447 = sst [smem:[#allocation133_spill]] %s12343_s0 }
   0x2   :  { %12448 = sst [smem:[#allocation134_spill]] %s12344_s1 }
   0x3   :  { %12449 = sst [smem:[#allocation135_spill]] %s12347_s4 }
   0x4   :  { %12450 = sst [smem:[#allocation136_spill]] %s12348_s5 }
   0x5   :  { %22 = vsyncpa [#allocation3], 0 }
   0x6   :  { %24 = vsyncpa [#allocation3 + $0x1], 0  ;;  %s9486_s24 = smov 0   ;;  %s9488_s25 = smov 0  }
   0x7   :  { %s9490_s26 = smov 0   ;;  %s9492_s27 = smov 0  }
   0x8 LB: > { %12451 = sst [smem:[#allocation5_spill]] %s9378_s26  ;;  %s9507_s28 = sadd.s32 4294967295, %s9382_s27   ;;  %s9382_s27 = sphi %s9492_s27, %s12753_s27   ;;  %s9378_s26 = sphi %s9490_s26, %s12755_s26   ;;  %s9374_s25 = sphi %s9488_s25, %s12757_s25   ;;  %s9370_s24 = sphi %s9486_s24, %s12756_s24  }
   0x9   : > { %s7120_s29 = sadd.s32 4294967294, %s9382_s27   ;;  %s9511_s0 = sadd.s32 1, %s9382_s27  }
   0xa   : > { %12452 = sst [smem:[#allocation6_spill]] %s9511_s0  ;;  %s414_s30 = sadd.s32 1, %s9378_s26 }
   0xb   : > { %s411_s18 = ssub.s32 %s9382_s27, %s9511_s0  ;;  %p424_p0 = scmp.ne.s32.totalorder %s9378_s26, %s9374_s25 }
   0xc   : > { %p412_p1 = scmp.eq.s32.totalorder %s411_s18, 0  ;;  %p425_p2 = scmp.eq.s32.totalorder %s9507_s28, 3 }
   0xd   : > { %p430_p3 = scmp.ne.s32.totalorder %s9374_s25, %s9370_s24  ;;  %p431_p4 = scmp.eq.s32.totalorder %s7120_s29, 3 }
   0xe   : > { %s9522_s19 = scalar_select %p412_p1, %s9378_s26, %s414_s30  }
   0xf   : > { %p9524_p5 = por %p425_p2, %p424_p0  ;;  %p9528_p6 = por %p431_p4, %p430_p3 }
  0x10   : > { %12453 = sst [smem:[#allocation7_spill]] %s9522_s19  ;;  %p7123_p7 = scmp.ge.s32.totalorder %s9382_s27, 1 }
  0x11   : > { %s12455_s20 = scalar_select %p9528_p6, 1, 0 }
  0x12   : > { %p518_p8 = scmp.lt.s32.totalorder %s9382_s27, 5 }
  0x13   : > { %12456 = sst [smem:[#allocation8_spill]] %s12455_s20 }
  0x14   : > { %p519_p9 = pnand %p7123_p7, %p518_p8 }
  0x16   : > { %522 = sbr.rel (%p519_p9) target bundleno = 3654 (0xe46), region = 88 }
  0x1d   : > { %p583_p10 = scmp.lt.s32.totalorder %s9507_s28, 3  ;;  %s12457_s30 = sld [smem:[#allocation133_spill]]  ;;  %v9386_v8 = vmov 0  }
  0x1e   : > { %s12362_s19 = smov 126   ;;  %s12364_s26 = smov 127   ;;  %9177 = vset.pattern.permute.xlu0 %v9386_v8  ;;  %9178 = vset.pattern.permute.xlu1 %v9386_v8 }
  0x1f   : > { %s9536_s21 = scalar_select %p583_p10, %s9507_s28, 3 }
  0x20   : > { %s12459_s4 = sld [smem:[#allocation135_spill]]  ;;  %s12478_s5 = sld [smem:[#allocation136_spill]] }
  0x21   : > { %s7343_s22 = sshll.u32 %s9536_s21, 6  ;;  %s7340_s23 = sshll.u32 %s9507_s28, 5 }
  0x22   : > { %s9395_s28 = smov [#allocation2]  }
  0x23   : > { %s9544_s18 = scalar_lea.vmem %s12457_s30, %s7343_s22  ;;  %s12458_s30 = sld [smem:[#allocation134_spill]] }
  0x24   : > { %v9547_v0 = vld [vmem:[%s9544_s18] sm:$0xff]  ;;  %v9550_v1 = vld [vmem:[%s9544_s18 + $0x8] sm:$0xff]  ;;  %v9559_v4 = vld [vmem:[%s9544_s18 + $0x18] sm:$0xff] }
  0x25   : > { %v609_v2 = vmul.f32 %v9547_v0, %v9547_v0  ;;  %v610_v3 = vmul.f32 %v9550_v1, %v9550_v1  ;;  %v9562_v5 = vld [vmem:[%s9544_s18 + $0x10] sm:$0xff]  ;;  %v612_v6 = vmul.f32 %v9559_v4, %v9559_v4  ;;  %v9575_v9 = vld [vmem:[%s9544_s18 + $0x28] sm:$0xff]  ;;  %v9578_v10 = vld [vmem:[%s9544_s18 + $0x20] sm:$0xff] }
  0x26   : > { %v611_v7 = vmul.f32 %v9562_v5, %v9562_v5  ;;  %v614_v11 = vmul.f32 %v9575_v9, %v9575_v9  ;;  %v613_v12 = vmul.f32 %v9578_v10, %v9578_v10  ;;  %v9589_v13 = vld [vmem:[%s9544_s18 + $0x38] sm:$0xff]  ;;  %v9592_v14 = vld [vmem:[%s9544_s18 + $0x30] sm:$0xff] }
  0x27   : > { %657 = vrot.lane.b32.xlu1 %v609_v2, %s12362_s19  ;;  %625 = vrot.lane.b32.xlu0 %v609_v2, %s12364_s26  ;;  %v616_v15 = vmul.f32 %v9589_v13, %v9589_v13  ;;  %v615_v16 = vmul.f32 %v9592_v14, %v9592_v14 }
  0x2b   : > { %659 = vrot.lane.b32.xlu1 %v610_v3, %s12362_s19  ;;  %627 = vrot.lane.b32.xlu0 %v610_v3, %s12364_s26 }
  0x2f   : > { %631 = vrot.lane.b32.xlu1 %v612_v6, %s12364_s26  ;;  %629 = vrot.lane.b32.xlu0 %v611_v7, %s12364_s26 }
  0x33   : > { %663 = vrot.lane.b32.xlu1 %v612_v6, %s12362_s19  ;;  %661 = vrot.lane.b32.xlu0 %v611_v7, %s12362_s19 }
  0x37   : > { %635 = vrot.lane.b32.xlu1 %v614_v11, %s12364_s26  ;;  %633 = vrot.lane.b32.xlu0 %v613_v12, %s12364_s26 }
  0x3b   : > { %667 = vrot.lane.b32.xlu1 %v614_v11, %s12362_s19  ;;  %665 = vrot.lane.b32.xlu0 %v613_v12, %s12362_s19 }
  0x3f   : > { %639 = vrot.lane.b32.xlu1 %v616_v15, %s12364_s26  ;;  %637 = vrot.lane.b32.xlu0 %v615_v16, %s12364_s26  ;;  %s12367_s26 = smov 2  }
  0x43   : > { %671 = vrot.lane.b32.xlu1 %v616_v15, %s12362_s19  ;;  %669 = vrot.lane.b32.xlu0 %v615_v16, %s12362_s19  ;;  %s9671_s19 = scalar_lea.vmem %s12458_s30, %s7343_s22  ;;  %s9388_s22 = smov 1  }
  0x44   : > { %s7129_s30 = sshll.u32 %s9536_s21, 1 }
  0x45   : > { %s596_s0 = scalar_lea.vmem %s12345_s2, %s7129_s30 }
  0x99   : > { %v658_v17 = vpop.permute.xlu1 %657  ;;  %v626_v18 = vpop.permute.xlu0 %625 }
  0x9a   : > { %v649_v19 = vadd.f32 %v626_v18, %v609_v2 }
  0x9c   : > { %v9604_v20 = vadd.f32 %v658_v17, %v649_v19 }
  0x9d   : > { %v660_v21 = vpop.permute.xlu1 %659  ;;  %v628_v22 = vpop.permute.xlu0 %627 }
  0x9e   : > { %v650_v23 = vadd.f32 %v628_v22, %v610_v3  ;;  %9205 = vrsqrt.f32 %v9604_v20  ;;  %vm691_vm0 = vcmp.eq.f32.partialorder %v9604_v20, inf  ;;  %v694_v39 = vand.u32 2147483648, %v9604_v20 }
  0x9f   : > { %vm693_vm1 = vcmp.eq.f32.partialorder %v9604_v20, 0.0 }
  0xa0   : > { %v9607_v24 = vadd.f32 %v660_v21, %v650_v23 }
  0xa1   : > { %v632_v25 = vpop.permute.xlu1 %631  ;;  %v630_v26 = vpop.permute.xlu0 %629 }
  0xa2   : > { %v652_v27 = vadd.f32 %v632_v25, %v612_v6  ;;  %v651_v28 = vadd.f32 %v630_v26, %v611_v7  ;;  %9207 = vrsqrt.f32 %v9607_v24  ;;  %vm698_vm2 = vcmp.eq.f32.partialorder %v9607_v24, inf }
  0xa3   : > { %v701_v48 = vand.u32 2147483648, %v9607_v24  ;;  %vm700_vm3 = vcmp.eq.f32.partialorder %v9607_v24, 0.0 }
  0xa5   : > { %v664_v29 = vpop.permute.xlu1 %663  ;;  %v662_v30 = vpop.permute.xlu0 %661 }
  0xa6   : > { %v9610_v31 = vadd.f32 %v664_v29, %v652_v27  ;;  %v9612_v32 = vadd.f32 %v662_v30, %v651_v28 }
  0xa8   : > { %v9206_v33 = vpop.eup %9205  ;;  %9209 = vrsqrt.f32 %v9610_v31  ;;  %vm712_vm4 = vcmp.eq.f32.partialorder %v9610_v31, inf  ;;  %vm714_vm5 = vcmp.eq.f32.partialorder %v9610_v31, 0.0  ;;  %v715_v58 = vand.u32 2147483648, %v9610_v31 }
  0xa9   : > { %v636_v34 = vpop.permute.xlu1 %635  ;;  %v634_v35 = vpop.permute.xlu0 %633  ;;  %v690_v36 = vmul.f32 %v9206_v33, %v9604_v20  ;;  %9211 = vrsqrt.f32 %v9612_v32  ;;  %vm705_vm6 = vcmp.eq.f32.partialorder %v9612_v32, inf  ;;  %vm707_vm7 = vcmp.eq.f32.partialorder %v9612_v32, 0.0 }
  0xaa   : > { %v654_v37 = vadd.f32 %v636_v34, %v614_v11  ;;  %v653_v38 = vadd.f32 %v634_v35, %v613_v12  ;;  %v708_v63 = vand.u32 2147483648, %v9612_v32  ;;  %v12375_v35 = vmov 0.0  }
  0xab   : > { %v692_v40 = vsel %vm691_vm0, %v9604_v20, %v690_v36 }
  0xac   : > { %v9208_v41 = vpop.eup %9207  ;;  %v9621_v42 = vsel %vm693_vm1, %v694_v39, %v692_v40  ;;  %v1418_v39 = vld [vmem:[%s9671_s19 + $0x8] sm:$0xff] }
  0xad   : > { %v668_v43 = vpop.permute.xlu1 %667  ;;  %1210 = vperm.xlu0 %9177, %v9621_v42   ;;  %v666_v44 = vpop.permute.xlu0 %665  ;;  %v697_v45 = vmul.f32 %v9208_v41, %v9607_v24  ;;  %vm1425_vm13 = vcmp.lt.f32.partialorder %v9621_v42, 0.4  ;;  %v1417_v42 = vld [vmem:[%s9671_s19] sm:$0xff] }
  0xae   : > { %v9625_v46 = vadd.f32 %v668_v43, %v654_v37  ;;  %v9627_v47 = vadd.f32 %v666_v44, %v653_v38  ;;  %v1433_v40 = vsel %vm1425_vm13, 1.0, %v12375_v35 }
  0xaf   : > { %v699_v49 = vsel %vm698_vm2, %v9607_v24, %v697_v45  ;;  %v1441_v45 = vmul.f32 %v1433_v40, %v1417_v42 }
  0xb0   : > { %v702_v50 = vsel %vm700_vm3, %v701_v48, %v699_v49  ;;  %9213 = vrsqrt.f32 %v9625_v46  ;;  %vm726_vm8 = vcmp.eq.f32.partialorder %v9625_v46, inf  ;;  %v729_v17 = vand.u32 2147483648, %v9625_v46  ;;  %v1420_v48 = vld [vmem:[%s9671_s19 + $0x18] sm:$0xff] }
  0xb1   : > { %v640_v51 = vpop.permute.xlu1 %639  ;;  %1215 = vperm.xlu1 %9178, %v702_v50   ;;  %v638_v52 = vpop.permute.xlu0 %637  ;;  %9215 = vrsqrt.f32 %v9627_v47  ;;  %vm728_vm9 = vcmp.eq.f32.partialorder %v9625_v46, 0.0  ;;  %vm719_vm10 = vcmp.eq.f32.partialorder %v9627_v47, inf  ;;  %v722_v21 = vand.u32 2147483648, %v9627_v47 }
  0xb2   : > { %v9210_v53 = vpop.eup %9209  ;;  %v656_v54 = vadd.f32 %v640_v51, %v616_v15  ;;  %v655_v55 = vadd.f32 %v638_v52, %v615_v16  ;;  %vm721_vm11 = vcmp.eq.f32.partialorder %v9627_v47, 0.0  ;;  %vm1426_vm12 = vcmp.lt.f32.partialorder %v702_v50, 0.4  ;;  %v1419_v50 = vld [vmem:[%s9671_s19 + $0x10] sm:$0xff] }
  0xb3   : > { %v9212_v56 = vpop.eup %9211  ;;  %v711_v57 = vmul.f32 %v9210_v53, %v9610_v31  ;;  %v1434_v36 = vsel %vm1426_vm12, 1.0, %v12375_v35  ;;  %v746_v51 = vadd.f32 1e-12, %v9607_v24  ;;  %v745_v53 = vadd.f32 1e-12, %v9604_v20 }
  0xb4   : > { %v704_v59 = vmul.f32 %v9212_v56, %v9612_v32  ;;  %v1442_v43 = vmul.f32 %v1434_v36, %v1418_v39  ;;  %v1422_v56 = vld [vmem:[%s9671_s19 + $0x28] sm:$0xff] }
  0xb5   : > { %v672_v60 = vpop.permute.xlu1 %671  ;;  %v670_v61 = vpop.permute.xlu0 %669  ;;  %v713_v62 = vsel %vm712_vm4, %v9610_v31, %v711_v57 }
  0xb6   : > { %v9644_v2 = vadd.f32 %v672_v60, %v656_v54  ;;  %v9646_v3 = vadd.f32 %v670_v61, %v655_v55  ;;  %v716_v6 = vsel %vm714_vm5, %v715_v58, %v713_v62  ;;  %v706_v7 = vsel %vm705_vm6, %v9612_v32, %v704_v59  ;;  %v1421_v58 = vld [vmem:[%s9671_s19 + $0x20] sm:$0xff]  ;;  %v1424_v61 = vld [vmem:[%s9671_s19 + $0x38] sm:$0xff]  ;;  %v1423_v62 = vld [vmem:[%s9671_s19 + $0x30] sm:$0xff] }
  0xb7   : > { %1225 = vperm.xlu0 %9177, %v716_v6   ;;  %v709_v11 = vsel %vm707_vm7, %v708_v63, %v706_v7  ;;  %vm1428_vm2 = vcmp.lt.f32.partialorder %v716_v6, 0.4  ;;  %v748_v63 = vadd.f32 1e-12, %v9610_v31  ;;  %v747_v7 = vadd.f32 1e-12, %v9612_v32 }
  0xb8   : > { %1220 = vperm.xlu1 %9178, %v709_v11   ;;  %9217 = vrsqrt.f32 %v9644_v2  ;;  %vm740_vm14 = vcmp.eq.f32.partialorder %v9644_v2, inf  ;;  %v743_v29 = vand.u32 2147483648, %v9644_v2  ;;  %vm742_vm15 = vcmp.eq.f32.partialorder %v9644_v2, 0.0  ;;  %v1498_v31 = vld [vmem:[%s12459_s4 + $0x8] sm:$0xff] }
  0xb9   : > { %9219 = vrsqrt.f32 %v9646_v3  ;;  %vm733_vm0 = vcmp.eq.f32.partialorder %v9646_v3, inf  ;;  %v736_v34 = vand.u32 2147483648, %v9646_v3  ;;  %vm735_vm1 = vcmp.eq.f32.partialorder %v9646_v3, 0.0 }
  0xba   : > { %v9214_v12 = vpop.eup %9213  ;;  %vm1427_vm3 = vcmp.lt.f32.partialorder %v709_v11, 0.4  ;;  %v1436_v44 = vsel %vm1428_vm2, 1.0, %v12375_v35  ;;  %9221 = vrsqrt.f32 %v746_v51  ;;  %v750_v32 = vadd.f32 1e-12, %v9625_v46 }
  0xbb   : > { %v9216_v15 = vpop.eup %9215  ;;  %v725_v16 = vmul.f32 %v9214_v12, %v9625_v46  ;;  %v1435_v49 = vsel %vm1427_vm3, 1.0, %v12375_v35  ;;  %v1444_v52 = vmul.f32 %v1436_v44, %v1420_v48  ;;  %9223 = vrsqrt.f32 %v745_v53 }
  0xbc   : > { %v718_v18 = vmul.f32 %v9216_v15, %v9627_v47  ;;  %v1443_v55 = vmul.f32 %v1435_v49, %v1419_v50  ;;  %9225 = vrsqrt.f32 %v748_v63 }
  0xbd   : > { %v727_v19 = vsel %vm726_vm8, %v9625_v46, %v725_v16  ;;  %9227 = vrsqrt.f32 %v747_v7  ;;  %v1497_v16 = vld [vmem:[%s12459_s4] sm:$0xff]  ;;  %vm12366_vm8 = vcmask 1043456  }
  0xbe   : > { %v730_v22 = vsel %vm728_vm9, %v729_v17, %v727_v19  ;;  %v720_v23 = vsel %vm719_vm10, %v9627_v47, %v718_v18  ;;  %v8541_v17 = vpack.c.bf16 %v1498_v31, %v1497_v16  ;;  %v749_v18 = vadd.f32 1e-12, %v9627_v47  ;;  %v1499_v19 = vld [vmem:[%s12459_s4 + $0x10] sm:$0xf] }
  0xbf   : > { %1235 = vperm.xlu0 %9177, %v730_v22   ;;  %v723_v25 = vsel %vm721_vm11, %v722_v21, %v720_v23  ;;  %vm1430_vm4 = vcmp.lt.f32.partialorder %v730_v22, 0.4  ;;  %9229 = vrsqrt.f32 %v750_v32  ;;  %v752_v47 = vadd.f32 1e-12, %v9644_v2 }
  0xc0   : > { %1230 = vperm.xlu1 %9178, %v723_v25   ;;  %vm1429_vm5 = vcmp.lt.f32.partialorder %v723_v25, 0.4  ;;  %v1438_v54 = vsel %vm1430_vm4, 1.0, %v12375_v35  ;;  %8542 = vmatprep.subr.bf16.mxu0 %v8541_v17  ;;  %9231 = vrsqrt.f32 %v749_v18  ;;  %v751_v22 = vadd.f32 1e-12, %v9646_v3 }
  0xc1   : > { %v1437_v57 = vsel %vm1429_vm5, 1.0, %v12375_v35  ;;  %v1446_v59 = vmul.f32 %v1438_v54, %v1422_v56  ;;  %8544 = vmatpush3.bf16.msra.mxu0 %v8541_v17  ;;  %9233 = vrsqrt.f32 %v752_v47 }
  0xc2   : > { %v9218_v26 = vpop.eup %9217  ;;  %v1445_v60 = vmul.f32 %v1437_v57, %v1421_v58  ;;  %7805 = vmatprep.subr.msk.mxu0 %vm12366_vm8, %v1499_v19  ;;  %9235 = vrsqrt.f32 %v751_v22 }
  0xc3   : > { %v9220_v27 = vpop.eup %9219  ;;  %v739_v28 = vmul.f32 %v9218_v26, %v9644_v2 }
  0xc4   : > { %v732_v30 = vmul.f32 %v9220_v27, %v9646_v3  ;;  %v9222_v12 = vpop.eup %9221 }
  0xc5   : > { %v741_v33 = vsel %vm740_vm14, %v9644_v2, %v739_v28  ;;  %v9224_v15 = vpop.eup %9223  ;;  %7806 = vmatpush3.msk.msra.mxu0 %vm12366_vm8, %v1499_v19 }
  0xc6   : > { %v744_v37 = vsel %vm742_vm15, %v743_v29, %v741_v33  ;;  %v734_v38 = vsel %vm733_vm0, %v9646_v3, %v732_v30  ;;  %v9226_v21 = vpop.eup %9225  ;;  %v9729_v3 = vmul.f32 %v9222_v12, %v9550_v1  ;;  %v9732_v27 = vmul.f32 %v9224_v15, %v9547_v0 }
  0xc7   : > { %1245 = vperm.xlu0 %9177, %v744_v37   ;;  %v737_v41 = vsel %vm735_vm1, %v736_v34, %v734_v38  ;;  %vm1432_vm6 = vcmp.lt.f32.partialorder %v744_v37, 0.4  ;;  %v9228_v46 = vpop.eup %9227  ;;  %v9738_v29 = vmul.f32 %v9226_v21, %v9559_v4 }
  0xc8   : > { %1240 = vperm.xlu1 %9178, %v737_v41   ;;  %vm1431_vm7 = vcmp.lt.f32.partialorder %v737_v41, 0.4  ;;  %v1440_v24 = vsel %vm1432_vm6, 1.0, %v12375_v35  ;;  %v842_v28 = vmul.f32 1.7320508, %v9729_v3  ;;  %v9742_v33 = vmul.f32 %v9228_v46, %v9562_v5 }
  0xc9   : > { %v1439_v20 = vsel %vm1431_vm7, 1.0, %v12375_v35  ;;  %v1448_v6 = vmul.f32 %v1440_v24, %v1424_v61  ;;  %v9230_v23 = vpop.eup %9229  ;;  %v841_v30 = vmul.f32 1.7320508, %v9732_v27  ;;  %v844_v34 = vmul.f32 1.7320508, %v9738_v29 }
  0xca   : > { %v1447_v11 = vmul.f32 %v1439_v20, %v1423_v62  ;;  %v9232_v25 = vpop.eup %9231  ;;  %v9746_v36 = vmul.f32 %v9230_v23, %v9575_v9  ;;  %v843_v37 = vmul.f32 1.7320508, %v9742_v33 }
  0xcb   : > { %1456 = vperm.xlu0 %9177, %v1442_v43   ;;  %v9234_v26 = vpop.eup %9233  ;;  %v9750_v38 = vmul.f32 %v9232_v25, %v9578_v10  ;;  %v12377_v10 = vmov 1  }
  0xcc   : > { %1451 = vperm.xlu1 %9178, %v1441_v45   ;;  %v9236_v2 = vpop.eup %9235  ;;  %v846_v39 = vmul.f32 1.7320508, %v9746_v36  ;;  %v9754_v40 = vmul.f32 %v9234_v26, %v9589_v13  ;;  %v12372_v13 = vlaneseq }
  0xcd   : > { %v845_v41 = vmul.f32 1.7320508, %v9750_v38  ;;  %v9758_v42 = vmul.f32 %v9236_v2, %v9592_v14 }
  0xce   : > { %v848_v43 = vmul.f32 1.7320508, %v9754_v40  ;;  %v9765_v45 = vand.u32 127, %v12372_v13 }
  0xcf   : > { %1466 = vperm.xlu0 %9177, %v1444_v52   ;;  %v847_v44 = vmul.f32 1.7320508, %v9758_v42 }
  0xd0   : > { %1461 = vperm.xlu1 %9178, %v1443_v55   ;;  %v1205_v14 = vcvt.s32.f32 %v9765_v45 }
  0xd2   : > { %v1206_v48 = vadd.f32 1.0, %v1205_v14 }
  0xd3   : > { %1476 = vperm.xlu0 %9177, %v1446_v59  }
  0xd4   : > { %1471 = vperm.xlu1 %9178, %v1445_v60   ;;  %v9768_v49 = vmul.f32 0.01904762, %v1206_v48 }
  0xd7   : > { %1486 = vperm.xlu0 %9177, %v1448_v6  }
  0xd8   : > { %1481 = vperm.xlu1 %9178, %v1447_v11  }
  0xdb   : > { %779 = vrot.lane.b32.xlu0 %v9222_v12, %s9388_s22 }
  0xdc   : > { %777 = vrot.lane.b32.xlu1 %v9224_v15, %s9388_s22 }
  0xdf   : > { %811 = vrot.lane.b32.xlu0 %v9222_v12, %s12367_s26 }
  0xe0   : > { %809 = vrot.lane.b32.xlu1 %v9224_v15, %s12367_s26 }
  0xe3   : > { %783 = vrot.lane.b32.xlu0 %v9226_v21, %s9388_s22 }
  0xe4   : > { %781 = vrot.lane.b32.xlu1 %v9228_v46, %s9388_s22 }
  0xe7   : > { %815 = vrot.lane.b32.xlu0 %v9226_v21, %s12367_s26 }
  0xe8   : > { %813 = vrot.lane.b32.xlu1 %v9228_v46, %s12367_s26 }
  0xeb   : > { %787 = vrot.lane.b32.xlu0 %v9230_v23, %s9388_s22 }
  0xec   : > { %785 = vrot.lane.b32.xlu1 %v9232_v25, %s9388_s22 }
  0xef   : > { %819 = vrot.lane.b32.xlu0 %v9230_v23, %s12367_s26 }
  0xf0   : > { %817 = vrot.lane.b32.xlu1 %v9232_v25, %s12367_s26 }
  0xf3   : > { %791 = vrot.lane.b32.xlu0 %v9234_v26, %s9388_s22 }
  0xf4   : > { %789 = vrot.lane.b32.xlu1 %v9236_v2, %s9388_s22  ;;  %s12476_s22 = smov 127  }
  0xf7   : > { %823 = vrot.lane.b32.xlu0 %v9234_v26, %s12367_s26 }
  0xf8   : > { %821 = vrot.lane.b32.xlu1 %v9236_v2, %s12367_s26  ;;  %s9324_s26 = sshll.u32 %s9395_s28, 4  ;;  %s9325_s26 = int_to_ptr.vmem [resolvable:$false] %s9324_s26 }
  0xfb   : > { %3300 = vperm.xlu0 %9177, %v842_v28  }
  0xfc   : > { %3295 = vperm.xlu1 %9178, %v841_v30  }
  0xff   : > { %3310 = vperm.xlu0 %9177, %v844_v34  }
 0x100   : > { %3305 = vperm.xlu1 %9178, %v843_v37  }
 0x103   : > { %3320 = vperm.xlu0 %9177, %v846_v39  }
 0x104   : > { %3315 = vperm.xlu1 %9178, %v845_v41  }
 0x107   : > { %3330 = vperm.xlu0 %9177, %v848_v43  }
 0x108   : > { %3325 = vperm.xlu1 %9178, %v847_v44  }
 0x10b   : > { %9180 = vset.pattern.permute.xlu0 %v12377_v10 }
 0x10c   : > { %9179 = vset.pattern.permute.xlu1 %v12377_v10 }
 0x12c   : > { %v1211_v50 = vpop.permute.xlu0 %1210 }
 0x12d   : > { %v1248_v51 = vsub.f32 %v1211_v50, %v9768_v49 }
 0x12f   : > { %v1257_v52 = vmul.f32 52.499996, %v1248_v51 }
 0x130   : > { %v1216_v53 = vpop.permute.xlu1 %1215 }
 0x131   : > { %v9771_v54 = vadd.f32 1.0, %v1257_v52  ;;  %v1337_v55 = vsub.f32 1.0, %v1257_v52  ;;  %v1249_v56 = vsub.f32 %v1216_v53, %v9768_v49 }
 0x133   : > { %vm1273_vm9 = vcmp.gt.f32.partialorder %v9771_v54, 0.0  ;;  %v1258_v57 = vmul.f32 52.499996, %v1249_v56  ;;  %vm9775_vm10 = vcmp.gt.f32.partialorder %v1337_v55, 0.0 }
 0x134   : > { %v1281_v59 = vsel %vm1273_vm9, %v9771_v54, 1.0  ;;  %v1353_v24 = vsel %vm9775_vm10, %v1337_v55, 1.0 }
 0x135   : > { %9237 = vrcp.f32 %v1281_v59  ;;  %v9784_v60 = vadd.f32 1.0, %v1258_v57  ;;  %v1338_v61 = vsub.f32 1.0, %v1258_v57 }
 0x136   : > { %v1226_v20 = vpop.permute.xlu0 %1225  ;;  %9239 = vrcp.f32 %v1353_v24 }
 0x137   : > { %vm1274_vm11 = vcmp.gt.f32.partialorder %v9784_v60, 0.0  ;;  %vm9787_vm12 = vcmp.gt.f32.partialorder %v1338_v61, 0.0  ;;  %v1221_v63 = vpop.permute.xlu1 %1220  ;;  %v1251_v6 = vsub.f32 %v1226_v20, %v9768_v49 }
 0x138   : > { %v1282_v7 = vsel %vm1274_vm11, %v9784_v60, 1.0  ;;  %v1354_v11 = vsel %vm9787_vm12, %v1338_v61, 1.0  ;;  %v1250_v12 = vsub.f32 %v1221_v63, %v9768_v49 }
 0x139   : > { %9241 = vrcp.f32 %v1282_v7  ;;  %v1260_v15 = vmul.f32 52.499996, %v1251_v6 }
 0x13a   : > { %9243 = vrcp.f32 %v1354_v11  ;;  %v1259_v16 = vmul.f32 52.499996, %v1250_v12 }
 0x13b   : > { %v9798_v31 = vadd.f32 1.0, %v1260_v15  ;;  %v1340_v32 = vsub.f32 1.0, %v1260_v15 }
 0x13c   : > { %v9800_v17 = vadd.f32 1.0, %v1259_v16  ;;  %v1339_v18 = vsub.f32 1.0, %v1259_v16 }
 0x13d   : > { %vm1276_vm13 = vcmp.gt.f32.partialorder %v9798_v31, 0.0  ;;  %vm9803_vm14 = vcmp.gt.f32.partialorder %v1340_v32, 0.0 }
 0x13e   : > { %vm1275_vm15 = vcmp.gt.f32.partialorder %v9800_v17, 0.0  ;;  %vm9808_vm0 = vcmp.gt.f32.partialorder %v1339_v18, 0.0  ;;  %v1284_v46 = vsel %vm1276_vm13, %v9798_v31, 1.0  ;;  %v1356_v47 = vsel %vm9803_vm14, %v1340_v32, 1.0  ;;  %v1236_v22 = vpop.permute.xlu0 %1235 }
 0x13f   : > { %v9238_v23 = vpop.eup %9237  ;;  %v1283_v25 = vsel %vm1275_vm15, %v9800_v17, 1.0  ;;  %v1355_v26 = vsel %vm9808_vm0, %v1339_v18, 1.0  ;;  %9245 = vrcp.f32 %v1284_v46  ;;  %v1231_v2 = vpop.permute.xlu1 %1230  ;;  %v1253_v28 = vsub.f32 %v1236_v22, %v9768_v49 }
 0x140   : > { %v9240_v30 = vpop.eup %9239  ;;  %v1290_v34 = vmul.f32 -1.0, %v9238_v23  ;;  %9247 = vrcp.f32 %v1283_v25  ;;  %v1252_v37 = vsub.f32 %v1231_v2, %v9768_v49 }
 0x141   : > { %9249 = vrcp.f32 %v1355_v26  ;;  %v1262_v39 = vmul.f32 52.499996, %v1253_v28  ;;  %v1362_v41 = vmul.f32 -1.0, %v9240_v30 }
 0x142   : > { %v1305_v43 = vmul.f32 1.442695, %v1290_v34  ;;  %9251 = vrcp.f32 %v1356_v47  ;;  %v1261_v44 = vmul.f32 52.499996, %v1252_v37 }
 0x143   : > { %v9242_v14 = vpop.eup %9241  ;;  %v9824_v48 = vadd.f32 1.0, %v1262_v39  ;;  %v1342_v50 = vsub.f32 1.0, %v1262_v39  ;;  %v1377_v51 = vmul.f32 1.442695, %v1362_v41 }
 0x144   : > { %v9244_v52 = vpop.eup %9243  ;;  %9253 = vpow2.f32 %v1305_v43  ;;  %v1292_v53 = vmul.f32 -1.0, %v9242_v14  ;;  %v9826_v55 = vadd.f32 1.0, %v1261_v44  ;;  %v1341_v56 = vsub.f32 1.0, %v1261_v44 }
 0x145   : > { %v1364_v57 = vmul.f32 -1.0, %v9244_v52  ;;  %vm1278_vm1 = vcmp.gt.f32.partialorder %v9824_v48, 0.0  ;;  %vm9829_vm2 = vcmp.gt.f32.partialorder %v1342_v50, 0.0  ;;  %9255 = vpow2.f32 %v1377_v51 }
 0x146   : > { %v1307_v24 = vmul.f32 1.442695, %v1292_v53  ;;  %vm1277_vm3 = vcmp.gt.f32.partialorder %v9826_v55, 0.0  ;;  %vm9834_vm4 = vcmp.gt.f32.partialorder %v1341_v56, 0.0  ;;  %v1286_v20 = vsel %vm1278_vm1, %v9824_v48, 1.0  ;;  %v1246_v63 = vpop.permute.xlu0 %1245 }
 0x147   : > { %v1379_v6 = vmul.f32 1.442695, %v1364_v57  ;;  %v1285_v7 = vsel %vm1277_vm3, %v9826_v55, 1.0  ;;  %9257 = vrcp.f32 %v1286_v20  ;;  %v1241_v11 = vpop.permute.xlu1 %1240  ;;  %v1357_v12 = vsel %vm9834_vm4, %v1341_v56, 1.0 }
 0x148   : > { %9259 = vpow2.f32 %v1307_v24  ;;  %v1254_v15 = vsub.f32 %v1241_v11, %v9768_v49  ;;  %v1255_v16 = vsub.f32 %v1246_v63, %v9768_v49  ;;  %v1358_v18 = vsel %vm9829_vm2, %v1342_v50, 1.0 }
 0x149   : > { %v9246_v32 = vpop.eup %9245  ;;  %9261 = vpow2.f32 %v1379_v6  ;;  %v9317_v6 = vld [vmem:[%s9544_s18 + $0x30] sm:$0xff] }
 0x14a   : > { %v9248_v46 = vpop.eup %9247  ;;  %v1296_v47 = vmul.f32 -1.0, %v9246_v32  ;;  %9263 = vrcp.f32 %v1285_v7  ;;  %v1263_v22 = vmul.f32 52.499996, %v1254_v15  ;;  %v1264_v23 = vmul.f32 52.499996, %v1255_v16  ;;  %v9850_v25 = vpop.permute.xlu0 %1456 }
 0x14b   : > { %v9250_v26 = vpop.eup %9249  ;;  %v1294_v2 = vmul.f32 -1.0, %v9248_v46  ;;  %9265 = vrcp.f32 %v1357_v12  ;;  %v9852_v28 = vpop.permute.xlu1 %1451 }
 0x14c   : > { %v9252_v30 = vpop.eup %9251  ;;  %v1366_v34 = vmul.f32 -1.0, %v9250_v26  ;;  %v1311_v49 = vmul.f32 1.442695, %v1296_v47  ;;  %9267 = vrcp.f32 %v1358_v18  ;;  %v9854_v37 = vadd.f32 1.0, %v1263_v22 }
 0x14d   : > { %v1309_v39 = vmul.f32 1.442695, %v1294_v2  ;;  %v1368_v41 = vmul.f32 -1.0, %v9252_v30  ;;  %v1343_v43 = vsub.f32 1.0, %v1263_v22  ;;  %v9856_v44 = vadd.f32 1.0, %v1264_v23 }
 0x14e   : > { %v9254_v14 = vpop.eup %9253  ;;  %v1381_v50 = vmul.f32 1.442695, %v1366_v34  ;;  %9269 = vpow2.f32 %v1311_v49  ;;  %vm1279_vm5 = vcmp.gt.f32.partialorder %v9854_v37, 0.0  ;;  %v1344_v51 = vsub.f32 1.0, %v1264_v23  ;;  %v9859_v52 = vpop.permute.xlu0 %1466 }
 0x14f   : > { %v9256_v53 = vpop.eup %9255  ;;  %9271 = vpow2.f32 %v1309_v39  ;;  %v1383_v56 = vmul.f32 1.442695, %v1368_v41  ;;  %v1287_v57 = vsel %vm1279_vm5, %v9854_v37, 1.0  ;;  %vm9864_vm6 = vcmp.gt.f32.partialorder %v1343_v43, 0.0  ;;  %v9868_v20 = vpop.permute.xlu1 %1461 }
 0x150   : > { %9273 = vpow2.f32 %v1381_v50  ;;  %v1359_v63 = vsel %vm9864_vm6, %v1343_v43, 1.0  ;;  %vm1280_vm7 = vcmp.gt.f32.partialorder %v9856_v44, 0.0  ;;  %vm9873_vm8 = vcmp.gt.f32.partialorder %v1344_v51, 0.0 }
 0x151   : > { %v9258_v7 = vpop.eup %9257  ;;  %9275 = vpow2.f32 %v1383_v56  ;;  %v1288_v11 = vsel %vm1280_vm7, %v9856_v44, 1.0  ;;  %v1321_v12 = vsel %vm1273_vm9, %v9254_v14, 0.0  ;;  %v1360_v32 = vsel %vm9873_vm8, %v1344_v51, 1.0 }
 0x152   : > { %v9260_v15 = vpop.eup %9259  ;;  %v1300_v16 = vmul.f32 -1.0, %v9258_v7  ;;  %9277 = vrcp.f32 %v1287_v57  ;;  %v9884_v18 = vpop.permute.xlu0 %1476  ;;  %v1329_v46 = vmul.f32 8.433573, %v1321_v12  ;;  %v1393_v30 = vsel %vm9775_vm10, %v9256_v53, 0.0 }
 0x153   : > { %v9262_v47 = vpop.eup %9261  ;;  %9279 = vrcp.f32 %v1359_v63  ;;  %v1322_v22 = vsel %vm1274_vm11, %v9260_v15, 0.0  ;;  %v9888_v23 = vpop.permute.xlu1 %1471  ;;  %vm1500_vm9 = vcmask 162816   ;;  %vm12479_vm10 = vcmask 1043456  }
 0x154   : > { %v9264_v26 = vpop.eup %9263  ;;  %v1315_v2 = vmul.f32 1.442695, %v1300_v16  ;;  %9281 = vrcp.f32 %v1288_v11  ;;  %v1330_v54 = vmul.f32 8.433573, %v1322_v22  ;;  %v1394_v39 = vsel %vm9787_vm12, %v9262_v47, 0.0 }
 0x155   : > { %v9266_v34 = vpop.eup %9265  ;;  %v1298_v49 = vmul.f32 -1.0, %v9264_v26  ;;  %9283 = vrcp.f32 %v1360_v32  ;;  %v1401_v41 = vmul.f32 %v1393_v30, %v1329_v46  ;;  %vm1666_vm12 = vcmask 490496  }
 0x156   : > { %v9268_v43 = vpop.eup %9267  ;;  %v1370_v14 = vmul.f32 -1.0, %v9266_v34  ;;  %9285 = vpow2.f32 %v1315_v2  ;;  %v1402_v60 = vmul.f32 %v1394_v39, %v1330_v54  ;;  %v9894_v50 = vpop.permute.xlu0 %1486 }
 0x157   : > { %v1313_v51 = vmul.f32 1.442695, %v1298_v49  ;;  %v1372_v56 = vmul.f32 -1.0, %v9268_v43  ;;  %v9896_v57 = vpop.permute.xlu1 %1481  ;;  %v1409_v63 = vmul.f32 4.472136, %v1401_v41 }
 0x158   : > { %v9270_v58 = vpop.eup %9269  ;;  %v1385_v53 = vmul.f32 1.442695, %v1370_v14  ;;  %v1410_v7 = vmul.f32 4.472136, %v1402_v60 }
 0x159   : > { %v9272_v11 = vpop.eup %9271  ;;  %9287 = vpow2.f32 %v1313_v51  ;;  %v1387_v62 = vmul.f32 1.442695, %v1372_v56  ;;  %v1324_v12 = vsel %vm1276_vm13, %v9270_v58, 0.0  ;;  %v1489_v15 = vmul.f32 %v9852_v28, %v1409_v63 }
 0x15a   : > { %v9274_v16 = vpop.eup %9273  ;;  %9289 = vpow2.f32 %v1385_v53  ;;  %v1490_v32 = vmul.f32 %v9850_v25, %v1410_v7  ;;  %v1323_v46 = vsel %vm1275_vm15, %v9272_v11, 0.0  ;;  %v1332_v47 = vmul.f32 8.433573, %v1324_v12  ;;  %v780_v22 = vpop.permute.xlu0 %779 }
 0x15b   : > { %v9276_v26 = vpop.eup %9275  ;;  %9291 = vpow2.f32 %v1387_v62  ;;  %v1331_v2 = vmul.f32 8.433573, %v1323_v46  ;;  %7807 = vmatprep.mubr.msk.f32.mxu0 %vm1500_vm9, %v1489_v15  ;;  %v778_v54 = vpop.permute.xlu1 %777  ;;  %v9906_v31 = vmul.f32 %v780_v22, %v9550_v1  ;;  %v1395_v28 = vsel %vm9808_vm0, %v9274_v16, 0.0 }
 0x15c   : > { %v9278_v30 = vpop.eup %9277  ;;  %v1396_v25 = vsel %vm9803_vm14, %v9276_v26, 0.0  ;;  %v9913_v17 = vmul.f32 %v778_v54, %v9547_v0  ;;  %7808 = vmatmul.mubr.msk.f32.vlgmr.msra.gmra.mrb[0].mxu0 %vm1500_vm9, %v1490_v32  ;;  %vm2810_vm13 = vcmask 1044480   ;;  %vm2806_vm14 = vcmask 39936  }
 0x15d   : > { %v9280_v34 = vpop.eup %9279  ;;  %v1302_v49 = vmul.f32 -1.0, %v9278_v30  ;;  %v1403_v39 = vmul.f32 %v1395_v28, %v1331_v2  ;;  %v1404_v41 = vmul.f32 %v1396_v25, %v1332_v47  ;;  %v850_v43 = vmul.f32 1.7320508, %v9906_v31 }
 0x15e   : > { %v9282_v14 = vpop.eup %9281  ;;  %v1374_v60 = vmul.f32 -1.0, %v9280_v34  ;;  %v812_v51 = vpop.permute.xlu0 %811  ;;  %v849_v21 = vmul.f32 1.7320508, %v9913_v17  ;;  %vm9393_vm15 = vmmov 0  }
 0x15f   : > { %v9284_v56 = vpop.eup %9283  ;;  %v1317_v63 = vmul.f32 1.442695, %v1302_v49  ;;  %v1304_v19 = vmul.f32 -1.0, %v9282_v14  ;;  %v1411_v58 = vmul.f32 4.472136, %v1403_v39  ;;  %v810_v53 = vpop.permute.xlu1 %809  ;;  %3418 = vperm.xlu0 %9180, %v850_v43   ;;  %v9926_v30 = vmul.f32 %v812_v51, %v9550_v1 }
 0x160   : > { %v9286_v7 = vpop.eup %9285  ;;  %v1389_v11 = vmul.f32 1.442695, %v1374_v60  ;;  %v1376_v62 = vmul.f32 -1.0, %v9284_v56  ;;  %v1412_v12 = vmul.f32 4.472136, %v1404_v41  ;;  %v9919_v15 = vmul.f32 %v810_v53, %v9547_v0  ;;  %3413 = vperm.xlu1 %9179, %v849_v21  }
 0x161   : > { %9293 = vpow2.f32 %v1317_v63  ;;  %v1319_v16 = vmul.f32 1.442695, %v1304_v19  ;;  %v1491_v32 = vmul.f32 %v9868_v20, %v1411_v58  ;;  %v1326_v46 = vsel %vm1278_vm1, %v9286_v7, 0.0 }
 0x162   : > { %9295 = vpow2.f32 %v1389_v11  ;;  %v1391_v47 = vmul.f32 1.442695, %v1376_v62  ;;  %v1492_v22 = vmul.f32 %v9859_v52, %v1412_v12  ;;  %v784_v26 = vpop.permute.xlu0 %783  ;;  %v1334_v54 = vmul.f32 8.433573, %v1326_v46  ;;  %v9315_v46 = vld [vmem:[%s9544_s18 + $0x18] sm:$0xff] }
 0x163   : > { %v9288_v2 = vpop.eup %9287  ;;  %9297 = vpow2.f32 %v1319_v16  ;;  %v782_v0 = vpop.permute.xlu1 %781  ;;  %7810 = vmatprep.mubr.msk.f32.mxu0 %vm1500_vm9, %v1491_v32  ;;  %v857_v28 = vmul.f32 1.7320508, %v9919_v15  ;;  %v12373_v52 = vmov 2   ;;  %v858_v51 = vmul.f32 1.7320508, %v9926_v30 }
 0x164   : > { %v9290_v20 = vpop.eup %9289  ;;  %9299 = vpow2.f32 %v1391_v47  ;;  %v1325_v48 = vsel %vm1277_vm3, %v9288_v2, 0.0  ;;  %v9933_v25 = vmul.f32 %v782_v0, %v9562_v5  ;;  %9181 = vset.pattern.permute.xlu1 %v12373_v52  ;;  %7811 = vmatmul.mubr.msk.f32.gmra.mrb[2].mxu0 %vm1500_vm9, %v1492_v22  ;;  %v9947_v61 = vmul.f32 %v784_v26, %v9559_v4 }
 0x165   : > { %v9292_v1 = vpop.eup %9291  ;;  %v1333_v34 = vmul.f32 8.433573, %v1325_v48  ;;  %3531 = vperm.xlu1 %9181, %v857_v28   ;;  %v1397_v49 = vsel %vm9834_vm4, %v9290_v20, 0.0  ;;  %v9316_v48 = vld [vmem:[%s9544_s18 + $0x20] sm:$0xff]  ;;  %vm3219_vm3 = vcmask 523264   ;;  %vm4093_vm4 = vcmask 1041408  }
 0x166   : > { %v1398_v39 = vsel %vm9829_vm2, %v9292_v1, 0.0  ;;  %v816_v41 = vpop.permute.xlu0 %815  ;;  %v851_v55 = vmul.f32 1.7320508, %v9933_v25  ;;  %v852_v32 = vmul.f32 1.7320508, %v9947_v61 }
 0x167   : > { %v1405_v43 = vmul.f32 %v1397_v49, %v1333_v34  ;;  %v1406_v14 = vmul.f32 %v1398_v39, %v1334_v54  ;;  %v814_v60 = vpop.permute.xlu1 %813  ;;  %v9965_v47 = vmul.f32 %v9315_v46, %v816_v41 }
 0x168   : > { %v9944_v21 = vmul.f32 %v814_v60, %v9562_v5  ;;  %3423 = vperm.xlu0 %9180, %v851_v55  }
 0x169   : > { %v1413_v56 = vmul.f32 4.472136, %v1405_v43  ;;  %v1414_v63 = vmul.f32 4.472136, %v1406_v14  ;;  %3536 = vperm.xlu1 %9181, %v858_v51   ;;  %v860_v0 = vmul.f32 1.7320508, %v9965_v47 }
 0x16a   : > { %v788_v59 = vpop.permute.xlu0 %787  ;;  %v859_v19 = vmul.f32 1.7320508, %v9944_v21  ;;  %v9318_v51 = vld [vmem:[%s9544_s18 + $0x28] sm:$0xff] }
 0x16b   : > { %v9294_v58 = vpop.eup %9293  ;;  %v1493_v53 = vmul.f32 %v9888_v23, %v1413_v56  ;;  %v1494_v7 = vmul.f32 %v9884_v18, %v1414_v63  ;;  %v786_v11 = vpop.permute.xlu1 %785  ;;  %v9955_v12 = vmul.f32 %v788_v59, %v9575_v9 }
 0x16c   : > { %v9296_v62 = vpop.eup %9295  ;;  %v1327_v5 = vsel %vm1279_vm5, %v9294_v58, 0.0  ;;  %9183 = vset.pattern.permute.xlu0 %v12373_v52  ;;  %v9976_v1 = vmul.f32 %v9316_v48, %v786_v11 }
 0x16d   : > { %v9298_v4 = vpop.eup %9297  ;;  %v1335_v16 = vmul.f32 8.433573, %v1327_v5  ;;  %7813 = vmatprep.mubr.msk.f32.mxu0 %vm1500_vm9, %v1493_v53  ;;  %3541 = vperm.xlu0 %9183, %v859_v19   ;;  %v1399_v18 = vsel %vm9864_vm6, %v9296_v62, 0.0  ;;  %v854_v2 = vmul.f32 1.7320508, %v9955_v12  ;;  %v1034_v19 = vmul.f32 %v9906_v31, %v9906_v31  ;;  %v9319_v53 = vld [vmem:[%s9544_s18 + $0x38] sm:$0xff] }
 0x16e   : > { %v9300_v23 = vpop.eup %9299  ;;  %v1328_v37 = vsel %vm1280_vm7, %v9298_v4, 0.0  ;;  %7814 = vmatmul.mubr.msk.f32.gmra.mrb[4].mxu0 %vm1500_vm9, %v1494_v7  ;;  %9182 = vset.pattern.permute.xlu1 %v12377_v10  ;;  %v820_v55 = vpop.permute.xlu0 %819  ;;  %v853_v43 = vmul.f32 1.7320508, %v9976_v1  ;;  %v1036_v62 = vmul.f32 %v9947_v61, %v9947_v61  ;;  %v1037_v46 = vmul.f32 %v9976_v1, %v9976_v1  ;;  %s12477_s18 = smov 126  }
 0x16f   : > { %v1407_v9 = vmul.f32 %v1399_v18, %v1335_v16  ;;  %v1336_v22 = vmul.f32 8.433573, %v1328_v37  ;;  %3428 = vperm.xlu1 %9182, %v852_v32   ;;  %v818_v26 = vpop.permute.xlu1 %817  ;;  %v1400_v24 = vsel %vm9873_vm8, %v9300_v23, 0.0  ;;  %v9995_v56 = vmul.f32 %v9318_v51, %v820_v55 }
 0x170   : > { %v9987_v14 = vmul.f32 %v9316_v48, %v818_v26  ;;  %v1038_v16 = vmul.f32 %v9955_v12, %v9955_v12  ;;  %v1033_v18 = vmul.f32 %v9913_v17, %v9913_v17  ;;  %v1035_v37 = vmul.f32 %v9933_v25, %v9933_v25  ;;  %v1664_v48 = vld [vmem:[%s12478_s5 + $0x30] sm:$0xff] }
 0x171   : > { %v1415_v44 = vmul.f32 4.472136, %v1407_v9  ;;  %v1408_v54 = vmul.f32 %v1400_v24, %v1336_v22  ;;  %9186 = vset.pattern.permute.xlu0 %v12377_v10  ;;  %v862_v58 = vmul.f32 1.7320508, %v9995_v56  ;;  %v1659_v22 = vld [vmem:[%s12478_s5 + $0x8] sm:$0xff]  ;;  %v1660_v24 = vld [vmem:[%s12478_s5 + $0x10] sm:$0xff] }
 0x172   : > { %3438 = vperm.xlu0 %9186, %v854_v2   ;;  %v861_v63 = vmul.f32 1.7320508, %v9987_v14  ;;  %v792_v59 = vpop.permute.xlu0 %791  ;;  %v1661_v2 = vld [vmem:[%s12478_s5 + $0x18] sm:$0xff]  ;;  %vm9392_vm8 = vmmov 1   ;;  %vm3647_vm6 = vcmask 80896   ;;  %vm6924_vm7 = vcmask 64512  }
 0x173   : > { %v1495_v28 = vmul.f32 %v9896_v57, %v1415_v44  ;;  %v1416_v20 = vmul.f32 4.472136, %v1408_v54  ;;  %9184 = vset.pattern.permute.xlu1 %v12373_v52  ;;  %v790_v34 = vpop.permute.xlu1 %789  ;;  %v10004_v7 = vmul.f32 %v9319_v53, %v792_v59  ;;  %v8549_v44 = vpack.c.bf16 %v1661_v2, %v1660_v24  ;;  %v1662_v54 = vld [vmem:[%s12478_s5 + $0x20] sm:$0xff]  ;;  %vm10082_vm11 = vmpackc.low %vm12479_vm10, %vm9392_vm8 }
 0x174   : > { %v9980_v49 = vmul.f32 %v9317_v6, %v790_v34  ;;  %3546 = vperm.xlu1 %9184, %v860_v0   ;;  %v1663_v0 = vld [vmem:[%s12478_s5 + $0x28] sm:$0xff]  ;;  %v1665_v34 = vld [vmem:[%s12478_s5 + $0x38] sm:$0xf]  ;;  %vm11110_vm5 = vmpackc.low %vm4093_vm4, %vm9392_vm8 }
 0x175   : > { %v1496_v39 = vmul.f32 %v9894_v50, %v1416_v20  ;;  %7816 = vmatprep.mubr.msk.f32.mxu0 %vm1500_vm9, %v1495_v28  ;;  %v856_v5 = vmul.f32 1.7320508, %v10004_v7  ;;  %v1040_v23 = vmul.f32 %v10004_v7, %v10004_v7  ;;  %v8553_v28 = vpack.c.bf16 %v1663_v0, %v1662_v54 }
 0x176   : > { %v855_v41 = vmul.f32 1.7320508, %v9980_v49  ;;  %v824_v11 = vpop.permute.xlu0 %823  ;;  %v1039_v9 = vmul.f32 %v9980_v49, %v9980_v49  ;;  %v1026_v54 = vmul.f32 %v9729_v3, %v9729_v3  ;;  %v1025_v0 = vmul.f32 %v9732_v27, %v9732_v27 }
 0x177   : > { %7817 = vmatmul.mubr.msk.f32.gmra.mrb[6].mxu0 %vm1500_vm9, %v1496_v39  ;;  %v822_v57 = vpop.permute.xlu1 %821  ;;  %v10012_v4 = vmul.f32 %v9319_v53, %v824_v11 }
 0x178   : > { %v9989_v60 = vmul.f32 %v9317_v6, %v822_v57  ;;  %9185 = vset.pattern.permute.xlu1 %v12377_v10  ;;  %3443 = vperm.xlu0 %9186, %v855_v41   ;;  %v8557_v6 = vpack.c.bf16 %v1665_v34, %v1664_v48  ;;  %v866_v48 = vmul.f32 3.8729835, %v9729_v3 }
 0x179   : > { %3433 = vperm.xlu1 %9185, %v853_v43   ;;  %2032 = vmatprep.mubr.f32.mxu0 %v12375_v35  ;;  %v864_v32 = vmul.f32 1.7320508, %v10012_v4 }
 0x17a   : > { %v863_v50 = vmul.f32 1.7320508, %v9989_v60  ;;  %v10110_v41 = vpop.permute.xlu0 %3300 }
 0x17b   : > { %v10106_v39 = vpop.permute.xlu1 %3295  ;;  %12483 = vst [vmem:[#allocation10_spill] sm:$0xff] %v10110_v41 }
 0x17c   : > { %9189 = vset.pattern.permute.xlu0 %v12373_v52  ;;  %12482 = vst [vmem:[#allocation9_spill] sm:$0xff] %v10106_v39 }
 0x17d   : > { %9187 = vset.pattern.permute.xlu1 %v12373_v52  ;;  %3561 = vperm.xlu0 %9189, %v863_v50  }
 0x17e   : > { %3551 = vperm.xlu1 %9187, %v861_v63   ;;  %v10116_v57 = vpop.permute.xlu0 %3310 }
 0x17f   : > { %v10112_v55 = vpop.permute.xlu1 %3305  ;;  %12485 = vst [vmem:[#allocation12_spill] sm:$0xff] %v10116_v57 }
 0x180   : > { %12484 = vst [vmem:[#allocation11_spill] sm:$0xff] %v10112_v55 }
 0x181   : > { %1051 = vrot.lane.b32.xlu0 %v1034_v19, %s12476_s22 }
 0x182   : > { %3556 = vperm.xlu1 %9187, %v862_v58   ;;  %9191 = vset.pattern.permute.xlu0 %v9386_v8  ;;  %v10124_v50 = vpop.permute.xlu0 %3320 }
 0x183   : > { %v10120_v43 = vpop.permute.xlu1 %3315  ;;  %12487 = vst [vmem:[#allocation14_spill] sm:$0xff] %v10124_v50 }
 0x184   : > { %12486 = vst [vmem:[#allocation13_spill] sm:$0xff] %v10120_v43 }
 0x185   : > { %1055 = vrot.lane.b32.xlu0 %v1036_v62, %s12476_s22 }
 0x186   : > { %9188 = vset.pattern.permute.xlu1 %v12377_v10  ;;  %v10130_v63 = vpop.permute.xlu0 %3330  ;;  %v1027_v10 = vmul.f32 %v9742_v33, %v9742_v33 }
 0x187   : > { %3448 = vperm.xlu1 %9188, %v856_v5   ;;  %v10126_v51 = vpop.permute.xlu1 %3325  ;;  %12489 = vst [vmem:[#allocation16_spill] sm:$0xff] %v10130_v63  ;;  %v1028_v63 = vmul.f32 %v9738_v29, %v9738_v29 }
 0x188   : > { %12488 = vst [vmem:[#allocation15_spill] sm:$0xff] %v10126_v51 }
 0x189   : > { %1059 = vrot.lane.b32.xlu0 %v1038_v16, %s12476_s22 }
 0x18b   : > { %9190 = vset.pattern.permute.xlu1 %v12373_v52 }
 0x18c   : > { %3566 = vperm.xlu1 %9190, %v864_v32  }
 0x18d   : > { %1063 = vrot.lane.b32.xlu0 %v1040_v23, %s12476_s22 }
 0x190   : > { %1049 = vrot.lane.b32.xlu1 %v1033_v18, %s12476_s22 }
 0x191   : > { %883 = vrot.lane.b32.xlu0 %v9906_v31, %s12476_s22  ;;  %9192 = vset.pattern.permute.xlu1 %v9386_v8  ;;  %v1658_v8 = vld [vmem:[%s12478_s5] sm:$0xff] }
 0x192   : > { %v8545_v26 = vpack.c.bf16 %v1659_v22, %v1658_v8 }
 0x194   : > { %1053 = vrot.lane.b32.xlu1 %v1035_v37, %s12476_s22  ;;  %8546 = vmatprep.subr.bf16.mxu1 %v8545_v26 }
 0x195   : > { %887 = vrot.lane.b32.xlu0 %v9947_v61, %s12476_s22  ;;  %8548 = vmatpush3.bf16.msra.mxu1 %v8545_v26 }
 0x196   : > { %8550 = vmatprep.subr.bf16.mxu1 %v8549_v44 }
 0x198   : > { %1057 = vrot.lane.b32.xlu1 %v1037_v46, %s12476_s22 }
 0x199   : > { %891 = vrot.lane.b32.xlu0 %v9955_v12, %s12476_s22  ;;  %8552 = vmatpush3.bf16.msra.mxu1 %v8549_v44 }
 0x19a   : > { %8554 = vmatprep.subr.bf16.mxu1 %v8553_v28 }
 0x19c   : > { %1061 = vrot.lane.b32.xlu1 %v1039_v9, %s12476_s22 }
 0x19d   : > { %895 = vrot.lane.b32.xlu0 %v10004_v7, %s12476_s22  ;;  %8556 = vmatpush3.bf16.msra.mxu1 %v8553_v28 }
 0x19e   : > { %8559 = vmatprep.subr.msk.bf16.mxu1 %vm10082_vm11, %v8557_v6 }
 0x1a0   : > { %881 = vrot.lane.b32.xlu1 %v9913_v17, %s12476_s22 }
 0x1a1   : > { %931 = vrot.lane.b32.xlu0 %v9926_v30, %s12476_s22  ;;  %8562 = vmatpush3.bf16.msk.msra.mxu1 %vm10082_vm11, %v8557_v6 }
 0x1a4   : > { %961 = vrot.lane.b32.xlu1 %v9919_v15, %s12477_s18 }
 0x1a5   : > { %935 = vrot.lane.b32.xlu0 %v9965_v47, %s12476_s22 }
 0x1a8   : > { %963 = vrot.lane.b32.xlu1 %v9926_v30, %s12477_s18 }
 0x1a9   : > { %939 = vrot.lane.b32.xlu0 %v9995_v56, %s12476_s22 }
 0x1ac   : > { %885 = vrot.lane.b32.xlu1 %v9933_v25, %s12476_s22 }
 0x1b0   : > { %965 = vrot.lane.b32.xlu1 %v9944_v21, %s12477_s18 }
 0x1b4   : > { %967 = vrot.lane.b32.xlu1 %v9965_v47, %s12477_s18 }
 0x1b8   : > { %889 = vrot.lane.b32.xlu1 %v9976_v1, %s12476_s22 }
 0x1bc   : > { %969 = vrot.lane.b32.xlu1 %v9987_v14, %s12477_s18 }
 0x1c0   : > { %971 = vrot.lane.b32.xlu1 %v9995_v56, %s12477_s18 }
 0x1c4   : > { %893 = vrot.lane.b32.xlu1 %v9980_v49, %s12476_s22 }
 0x1c8   : > { %973 = vrot.lane.b32.xlu1 %v9989_v60, %s12477_s18 }
 0x1cc   : > { %975 = vrot.lane.b32.xlu1 %v10012_v4, %s12477_s18  ;;  %s12506_s18 = smov 2  }
 0x1d0   : > { %929 = vrot.lane.b32.xlu1 %v9919_v15, %s12476_s22 }
 0x1d4   : > { %933 = vrot.lane.b32.xlu1 %v9944_v21, %s12476_s22 }
 0x1d8   : > { %937 = vrot.lane.b32.xlu1 %v9987_v14, %s12476_s22 }
 0x1dc   : > { %941 = vrot.lane.b32.xlu1 %v9989_v60, %s12476_s22 }
 0x1de   : > { %v10134_v19 = vpop.permute.xlu0 %3418 }
 0x1df   : > { %v10132_v59 = vpop.permute.xlu1 %3413  ;;  %12491 = vst [vmem:[#allocation18_spill] sm:$0xff] %v10134_v19 }
 0x1e0   : > { %12490 = vst [vmem:[#allocation17_spill] sm:$0xff] %v10132_v59 }
 0x1e4   : > { %v10136_v58 = vpop.permute.xlu1 %3531 }
 0x1e5   : > { %12492 = vst [vmem:[#allocation19_spill] sm:$0xff] %v10136_v58 }
 0x1e7   : > { %v10138_v53 = vpop.permute.xlu0 %3423 }
 0x1e8   : > { %12493 = vst [vmem:[#allocation20_spill] sm:$0xff] %v10138_v53  ;;  %v10140_v11 = vpop.permute.xlu1 %3536 }
 0x1e9   : > { %12494 = vst [vmem:[#allocation21_spill] sm:$0xff] %v10140_v11 }
 0x1ec   : > { %v10142_v62 = vpop.permute.xlu0 %3541 }
 0x1ed   : > { %12495 = vst [vmem:[#allocation22_spill] sm:$0xff] %v10142_v62 }
 0x1ee   : > { %v10144_v5 = vpop.permute.xlu1 %3428 }
 0x1ef   : > { %12496 = vst [vmem:[#allocation23_spill] sm:$0xff] %v10144_v5 }
 0x1f1   : > { %v10146_v16 = vpop.permute.xlu0 %3438 }
 0x1f2   : > { %12497 = vst [vmem:[#allocation24_spill] sm:$0xff] %v10146_v16 }
 0x1f3   : > { %v10148_v32 = vpop.permute.xlu1 %3546 }
 0x1f4   : > { %12498 = vst [vmem:[#allocation25_spill] sm:$0xff] %v10148_v32 }
 0x1f7   : > { %v10150_v23 = vpop.permute.xlu0 %3443 }
 0x1f8   : > { %12499 = vst [vmem:[#allocation26_spill] sm:$0xff] %v10150_v23  ;;  %v10152_v18 = vpop.permute.xlu1 %3433 }
 0x1f9   : > { %12500 = vst [vmem:[#allocation27_spill] sm:$0xff] %v10152_v18 }
 0x1fc   : > { %v10154_v37 = vpop.permute.xlu0 %3561 }
 0x1fd   : > { %12501 = vst [vmem:[#allocation28_spill] sm:$0xff] %v10154_v37  ;;  %v10156_v46 = vpop.permute.xlu1 %3551 }
 0x1fe   : > { %12502 = vst [vmem:[#allocation29_spill] sm:$0xff] %v10156_v46 }
 0x200   : > { %v1052_v9 = vpop.permute.xlu0 %1051 }
 0x201   : > { %v10158_v8 = vpop.permute.xlu1 %3556  ;;  %v1074_v34 = vsub.f32 %v1026_v54, %v1052_v9 }
 0x202   : > { %12503 = vst [vmem:[#allocation30_spill] sm:$0xff] %v10158_v8 }
 0x203   : > { %v1082_v51 = vmul.f32 1.9364917, %v1074_v34 }
 0x204   : > { %v1056_v22 = vpop.permute.xlu0 %1055 }
 0x205   : > { %v1108_v9 = vmul.f32 0.70710677, %v1082_v51  ;;  %v1076_v54 = vsub.f32 %v1028_v63, %v1056_v22  ;;  %v1031_v63 = vmul.f32 %v9758_v42, %v9758_v42 }
 0x206   : > { %v10160_v26 = vpop.permute.xlu1 %3448 }
 0x207   : > { %12504 = vst [vmem:[#allocation31_spill] sm:$0xff] %v10160_v26 }
 0x208   : > { %v1060_v24 = vpop.permute.xlu0 %1059 }
 0x20b   : > { %v10162_v2 = vpop.permute.xlu1 %3566 }
 0x20c   : > { %12505 = vst [vmem:[#allocation32_spill] sm:$0xff] %v10162_v2  ;;  %v1064_v44 = vpop.permute.xlu0 %1063 }
 0x20f   : > { %v1050_v28 = vpop.permute.xlu1 %1049 }
 0x210   : > { %v1073_v6 = vsub.f32 %v1025_v0, %v1050_v28  ;;  %v884_v13 = vpop.permute.xlu0 %883  ;;  %v1084_v28 = vmul.f32 1.9364917, %v1076_v54 }
 0x211   : > { %v906_v52 = vmul.f32 %v884_v13, %v866_v48  ;;  %v1029_v13 = vmul.f32 %v9750_v38, %v9750_v38 }
 0x212   : > { %v1081_v35 = vmul.f32 1.9364917, %v1073_v6 }
 0x213   : > { %v1180_v37 = vmul.f32 0.70710677, %v906_v52  ;;  %v1054_v23 = vpop.permute.xlu1 %1053 }
 0x214   : > { %v1107_v2 = vmul.f32 0.70710677, %v1081_v35  ;;  %v1075_v26 = vsub.f32 %v1027_v10, %v1054_v23  ;;  %v1030_v10 = vmul.f32 %v9746_v36, %v9746_v36 }
 0x215   : > { %3785 = vperm.xlu1 %9192, %v1180_v37   ;;  %v1110_v37 = vmul.f32 0.70710677, %v1084_v28 }
 0x216   : > { %1123 = vrot.lane.b32.xlu0 %v1107_v2, %s12506_s18  ;;  %v1083_v0 = vmul.f32 1.9364917, %v1075_v26  ;;  %v1078_v2 = vsub.f32 %v1030_v10, %v1060_v24 }
 0x217   : > { %v1058_v3 = vpop.permute.xlu1 %1057 }
 0x218   : > { %v1109_v34 = vmul.f32 0.70710677, %v1083_v0  ;;  %v1077_v35 = vsub.f32 %v1029_v13, %v1058_v3  ;;  %v1086_v26 = vmul.f32 1.9364917, %v1078_v2  ;;  %v1032_v3 = vmul.f32 %v9754_v40, %v9754_v40 }
 0x21a   : > { %1125 = vrot.lane.b32.xlu0 %v1108_v9, %s12506_s18  ;;  %v1085_v51 = vmul.f32 1.9364917, %v1077_v35  ;;  %v1112_v0 = vmul.f32 0.70710677, %v1086_v26  ;;  %v1080_v13 = vsub.f32 %v1032_v3, %v1064_v44  ;;  %v867_v35 = vmul.f32 3.8729835, %v9742_v33  ;;  %v888_v26 = vpop.permute.xlu0 %887 }
 0x21b   : > { %v1062_v52 = vpop.permute.xlu1 %1061  ;;  %v865_v3 = vmul.f32 3.8729835, %v9732_v27  ;;  %v868_v33 = vmul.f32 3.8729835, %v9738_v29  ;;  %v869_v27 = vmul.f32 3.8729835, %v9750_v38 }
 0x21c   : > { %v1111_v6 = vmul.f32 0.70710677, %v1085_v51  ;;  %v1079_v9 = vsub.f32 %v1031_v63, %v1062_v52 }
 0x21e   : > { %1127 = vrot.lane.b32.xlu0 %v1109_v34, %s12506_s18  ;;  %v1087_v28 = vmul.f32 1.9364917, %v1079_v9 }
 0x21f   : > { %v882_v23 = vpop.permute.xlu1 %881 }
 0x220   : > { %v1113_v2 = vmul.f32 0.70710677, %v1087_v28 }
 0x222   : > { %1129 = vrot.lane.b32.xlu0 %v1110_v37, %s12506_s18  ;;  %v1088_v37 = vmul.f32 1.9364917, %v1080_v13 }
 0x223   : > { %v962_v22 = vpop.permute.xlu1 %961 }
 0x224   : > { %v1114_v46 = vmul.f32 0.70710677, %v1088_v37 }
 0x226   : > { %1131 = vrot.lane.b32.xlu0 %v1111_v6, %s12506_s18 }
 0x227   : > { %v964_v54 = vpop.permute.xlu1 %963 }
 0x228   : > { %v986_v24 = vmul.f32 %v964_v54, %v866_v48 }
 0x22a   : > { %v1196_v34 = vmul.f32 0.70710677, %v986_v24  ;;  %1133 = vrot.lane.b32.xlu0 %v1112_v0, %s12506_s18 }
 0x22b   : > { %v886_v10 = vpop.permute.xlu1 %885 }
 0x22c   : > { %v907_v51 = vmul.f32 %v886_v10, %v867_v35  ;;  %3841 = vperm.xlu1 %9192, %v1196_v34   ;;  %v905_v34 = vmul.f32 %v882_v23, %v865_v3 }
 0x22e   : > { %v1181_v52 = vmul.f32 0.70710677, %v907_v51  ;;  %1135 = vrot.lane.b32.xlu0 %v1113_v2, %s12506_s18 }
 0x22f   : > { %v966_v63 = vpop.permute.xlu1 %965  ;;  %v7809_v6 = vpop.f32.mrb[0].mxu0 }
 0x230   : > { %v987_v44 = vmul.f32 %v966_v63, %v867_v35  ;;  %3790 = vperm.xlu1 %9192, %v1181_v52   ;;  %v1635_v48 = vmul.f32 0.2236068, %v7809_v6  ;;  %v1595_v9 = vpop.f32.mrb[1].mxu0  ;;  %v892_v35 = vpop.permute.xlu0 %891  ;;  %v985_v63 = vmul.f32 %v962_v22, %v865_v3  ;;  %v870_v22 = vmul.f32 3.8729835, %v9746_v36 }
 0x231   : > { %v1634_v54 = vmul.f32 0.2236068, %v1595_v9 }
 0x232   : > { %v1197_v0 = vmul.f32 0.70710677, %v987_v44  ;;  %v1643_v13 = vmax.f32 %v1635_v48, 0.0  ;;  %1137 = vrot.lane.b32.xlu0 %v1114_v46, %s12506_s18  ;;  %v1179_v46 = vmul.f32 0.70710677, %v905_v34  ;;  %s7130_s18 = sshll.u32 %s9536_s21, 3 }
 0x233   : > { %v1642_v28 = vmax.f32 %v1634_v54, 0.0  ;;  %v968_v24 = vpop.permute.xlu1 %967  ;;  %s600_s19 = scalar_lea.vmem %s12346_s3, %s7130_s18  ;;  %s580_s21 = sand.u32 1, %s9374_s25  }
 0x234   : > { %v988_v10 = vmul.f32 %v968_v24, %v868_v33  ;;  %3846 = vperm.xlu1 %9192, %v1197_v0   ;;  %v1651_v2 = vmul.f32 1.4142135, %v1643_v13  ;;  %v896_v38 = vpop.permute.xlu0 %895  ;;  %v1195_v24 = vmul.f32 0.70710677, %v985_v63  ;;  %v10718_v20 = vld [vmem:[%s600_s19] sm:$0xff]  ;;  %s7124_s20 = sshll.u32 %s580_s21, 1  ;;  %s12300_s19 = scalar_lea.hbm %s12360_s17, %s7340_s23 }
 0x235   : > { %v1650_v37 = vmul.f32 1.4142135, %v1642_v28  ;;  %v908_v28 = vmul.f32 %v888_v26, %v868_v33  ;;  %v872_v26 = vmul.f32 3.8729835, %v9754_v40  ;;  %v914_v40 = vmul.f32 3.8729835, %v9906_v31 }
 0x236   : > { %v1198_v51 = vmul.f32 0.70710677, %v988_v10  ;;  %943 = vrot.lane.b32.xlu0 %v10012_v4, %s12476_s22  ;;  %v916_v31 = vmul.f32 3.8729835, %v9947_v61  ;;  %v918_v61 = vmul.f32 3.8729835, %v9955_v12 }
 0x237   : > { %v890_v29 = vpop.permute.xlu1 %889  ;;  %v7812_v52 = vpop.f32.mrb[2].mxu0  ;;  %7835 = vmatprep.mubr.msk.f32.mxu1 %vm1666_vm12, %v1650_v37  ;;  %s582_s29 = scalar_lea.vmem [#allocation2], %s7124_s20  ;;  %s7012_s30 = scalar_lea.sflag [#allocation3], %s580_s21 }
 0x238   : > { %v909_v6 = vmul.f32 %v890_v29, %v869_v27  ;;  %v1637_v23 = vmul.f32 0.2236068, %v7812_v52  ;;  %3851 = vperm.xlu1 %9192, %v1198_v51   ;;  %v1605_v44 = vpop.f32.mrb[3].mxu0  ;;  %7836 = vmatmul.mubr.msk.f32.vlgmr.msra.gmra.mrb[0].mxu1 %vm1666_vm12, %v1651_v2  ;;  %v1182_v2 = vmul.f32 0.70710677, %v908_v28  ;;  %v910_v29 = vmul.f32 %v892_v35, %v870_v22  ;;  %s7025_s18 = sshll.u32 %s582_s29, 4  ;;  %s12302_s18 = int_to_ptr.vmem [resolvable:$true] %s7025_s18 }
 0x239   : > { %v1636_v48 = vmul.f32 0.2236068, %v1605_v44  ;;  %v912_v35 = vmul.f32 %v896_v38, %v872_v26  ;;  %s9320_s4 = scalar_lea.vmem %s12302_s18, 32  ;;  %p9327_p0 = scmp.lt.s32.totalorder %s12302_s18, %s9325_s26 }
 0x23a   : > { %v1183_v9 = vmul.f32 0.70710677, %v909_v6  ;;  %v1645_v54 = vmax.f32 %v1637_v23, 0.0  ;;  %3780 = vperm.xlu0 %9191, %v1179_v46   ;;  %v932_v46 = vpop.permute.xlu0 %931  ;;  %p9321_p11 = scmp.ne.s32.totalorder %s12302_s18, %s9320_s4 }
 0x23b   : > { %v1644_v0 = vmax.f32 %v1636_v48, 0.0  ;;  %v970_v13 = vpop.permute.xlu1 %969  ;;  %v993_v48 = vmul.f32 3.0, %v9919_v15  ;;  %v954_v38 = vmul.f32 %v932_v46, %v914_v40 }
 0x23c   : > { %v989_v10 = vmul.f32 %v970_v13, %v869_v27  ;;  %3800 = vperm.xlu1 %9192, %v1183_v9   ;;  %v1653_v3 = vmul.f32 1.4142135, %v1645_v54  ;;  %v871_v27 = vmul.f32 3.8729835, %v9758_v42  ;;  %v1184_v9 = vmul.f32 0.70710677, %v910_v29  ;;  %p9322_p12 = pnand %p9321_p11, %p9524_p5 }
 0x23d   : > { %v1652_v37 = vmul.f32 1.4142135, %v1644_v0 }
 0x23e   : > { %v1199_v34 = vmul.f32 0.70710677, %v989_v10  ;;  %3836 = vperm.xlu0 %9191, %v1195_v24   ;;  %v994_v10 = vmul.f32 3.0, %v9926_v30  ;;  %p9323_p13 = pneg %p9322_p12 }
 0x23f   : > { %v972_v51 = vpop.permute.xlu1 %971  ;;  %7838 = vmatprep.mubr.msk.f32.mxu1 %vm1666_vm12, %v1652_v37  ;;  %v1186_v37 = vmul.f32 0.70710677, %v912_v35 }
 0x240   : > { %v990_v52 = vmul.f32 %v972_v51, %v870_v22  ;;  %3856 = vperm.xlu1 %9192, %v1199_v34   ;;  %7839 = vmatmul.mubr.msk.f32.gmra.mrb[2].mxu1 %vm1666_vm12, %v1653_v3  ;;  %v936_v22 = vpop.permute.xlu0 %935  ;;  %v1001_v51 = vmul.f32 %v993_v48, %v9919_v15  ;;  %v1188_v15 = vmul.f32 0.70710677, %v954_v38  ;;  %v996_v38 = vmul.f32 3.0, %v9965_v47 }
 0x241   : > { %v7815_v33 = vpop.f32.mrb[4].mxu0  ;;  %v956_v46 = vmul.f32 %v936_v22, %v916_v31  ;;  %v995_v22 = vmul.f32 3.0, %v9944_v21  ;;  %v12509_v31 = vmov 2  }
 0x242   : > { %v1200_v63 = vmul.f32 0.70710677, %v990_v52  ;;  %v1639_v36 = vmul.f32 0.2236068, %v7815_v33  ;;  %v1615_v6 = vpop.f32.mrb[5].mxu0  ;;  %3795 = vperm.xlu0 %9191, %v1182_v2  }
 0x243   : > { %v1638_v23 = vmul.f32 0.2236068, %v1615_v6  ;;  %v894_v44 = vpop.permute.xlu1 %893 }
 0x244   : > { %v1647_v54 = vmax.f32 %v1639_v36, 0.0  ;;  %v911_v0 = vmul.f32 %v894_v44, %v871_v27  ;;  %3861 = vperm.xlu1 %9192, %v1200_v63   ;;  %v940_v48 = vpop.permute.xlu0 %939 }
 0x245   : > { %v1646_v13 = vmax.f32 %v1638_v23, 0.0  ;;  %v1002_v23 = vmul.f32 %v994_v10, %v9926_v30 }
 0x246   : > { %v1185_v28 = vmul.f32 0.70710677, %v911_v0  ;;  %3805 = vperm.xlu0 %9191, %v1184_v9   ;;  %v1655_v3 = vmul.f32 1.4142135, %v1647_v54  ;;  %v12507_v54 = vmov 1  }
 0x247   : > { %v1654_v42 = vmul.f32 1.4142135, %v1646_v13  ;;  %v974_v24 = vpop.permute.xlu1 %973  ;;  %v913_v0 = vmul.f32 3.8729835, %v9913_v17  ;;  %v7132_v30 = vadd.f32 -1.0, %v1002_v23 }
 0x248   : > { %v991_v34 = vmul.f32 %v974_v24, %v871_v27  ;;  %3810 = vperm.xlu1 %9192, %v1185_v28   ;;  %v7131_v27 = vadd.f32 -1.0, %v1001_v51  ;;  %v958_v24 = vmul.f32 %v940_v48, %v918_v61  ;;  %v1003_v51 = vmul.f32 %v995_v22, %v9944_v21  ;;  %v1825_v22 = vld [vmem:[%s12349_s6 + $0x10] sm:$0xff] }
 0x249   : > { %7841 = vmatprep.mubr.msk.f32.mxu1 %vm1666_vm12, %v1654_v42  ;;  %v1190_v42 = vmul.f32 0.70710677, %v956_v46  ;;  %v10220_v12 = vmul.f32 1.118034, %v7132_v30  ;;  %v1837_v30 = vld [vmem:[%s12349_s6 + $0x70] sm:$0xff] }
 0x24a   : > { %v1201_v2 = vmul.f32 0.70710677, %v991_v34  ;;  %v7818_v29 = vpop.f32.mrb[6].mxu0  ;;  %7842 = vmatmul.mubr.msk.f32.gmra.mrb[4].mxu1 %vm1666_vm12, %v1655_v3  ;;  %3815 = vperm.xlu0 %9191, %v1186_v37   ;;  %v10213_v40 = vmul.f32 1.118034, %v7131_v27  ;;  %v12508_v3 = vmov 0.0  }
 0x24b   : > { %v1641_v52 = vmul.f32 0.2236068, %v7818_v29  ;;  %v1625_v33 = vpop.f32.mrb[7].mxu0  ;;  %v976_v63 = vpop.permute.xlu1 %975  ;;  %v1192_v34 = vmul.f32 0.70710677, %v958_v24  ;;  %v1164_v29 = vmul.f32 2.0, %v10220_v12 }
 0x24c   : > { %v1640_v36 = vmul.f32 0.2236068, %v1625_v33  ;;  %v992_v6 = vmul.f32 %v976_v63, %v872_v26  ;;  %3866 = vperm.xlu1 %9192, %v1201_v2   ;;  %v1163_v17 = vmul.f32 2.0, %v10213_v40  ;;  %v7133_v33 = vadd.f32 -1.0, %v1003_v51  ;;  %v1834_v24 = vld [vmem:[%s12349_s6 + $0x58] sm:$0xff] }
 0x24d   : > { %v1649_v44 = vmax.f32 %v1641_v52, 0.0  ;;  %v1004_v63 = vmul.f32 %v996_v38, %v9965_v47  ;;  %v1857_v38 = vld [vmem:[%s12349_s6 + $0x110] sm:$0xff] }
 0x24e   : > { %v1648_v9 = vmax.f32 %v1640_v36, 0.0  ;;  %v1202_v35 = vmul.f32 0.70710677, %v992_v6  ;;  %9194 = vset.pattern.permute.xlu0 %v12507_v54  ;;  %v1171_v2 = vmul.f32 0.40824828, %v1163_v17  ;;  %v1836_v17 = vld [vmem:[%s12349_s6 + $0x68] sm:$0xff] }
 0x24f   : > { %v930_v13 = vpop.permute.xlu1 %929  ;;  %3961 = vperm.xlu0 %9194, %v1188_v15   ;;  %v1657_v10 = vmul.f32 1.4142135, %v1649_v44  ;;  %v915_v36 = vmul.f32 3.8729835, %v9933_v25  ;;  %v1172_v6 = vmul.f32 0.40824828, %v1164_v29  ;;  %v8583_v51 = vpack.c.bf16 %v1836_v17, %v1825_v22 }
 0x250   : > { %v1656_v28 = vmul.f32 1.4142135, %v1648_v9  ;;  %v953_v26 = vmul.f32 %v930_v13, %v913_v0  ;;  %3871 = vperm.xlu1 %9192, %v1202_v35   ;;  %v10230_v21 = vmul.f32 1.118034, %v7133_v33  ;;  %v7134_v23 = vadd.f32 -1.0, %v1004_v63  ;;  %v1824_v13 = vld [vmem:[%s12349_s6 + $0x8] sm:$0xff] }
 0x251   : > { %v917_v9 = vmul.f32 3.8729835, %v9976_v1  ;;  %v1859_v29 = vld [vmem:[%s12349_s6 + $0x120] sm:$0xff]  ;;  %v1845_v63 = vld [vmem:[%s12349_s6 + $0xb0] sm:$0xff]  ;;  %v1000_v17 = vmul.f32 3.0, %v10012_v4 }
 0x252   : > { %v1187_v37 = vmul.f32 0.70710677, %v953_v26  ;;  %7844 = vmatprep.mubr.msk.f32.mxu1 %vm1666_vm12, %v1656_v28  ;;  %v1165_v46 = vmul.f32 2.0, %v10230_v21  ;;  %v10234_v44 = vmul.f32 1.118034, %v7134_v23  ;;  %v1835_v28 = vld [vmem:[%s12349_s6 + $0x60] sm:$0xff] }
 0x253   : > { %7845 = vmatmul.mubr.msk.f32.gmra.mrb[6].mxu1 %vm1666_vm12, %v1657_v10  ;;  %3971 = vperm.xlu0 %9194, %v1190_v42   ;;  %v934_v52 = vpop.permute.xlu1 %933  ;;  %v1826_v26 = vld [vmem:[%s12349_s6 + $0x18] sm:$0xff]  ;;  %v8563_v1 = vpack.c.bf16 %v1835_v28, %v1824_v13  ;;  %v1823_v42 = vld [vmem:[%s12349_s6] sm:$0xff] }
 0x254   : > { %9193 = vset.pattern.permute.xlu1 %v12507_v54  ;;  %2145 = vmatprep.mubr.f32.mxu1 %v12508_v3  ;;  %v955_v27 = vmul.f32 %v934_v52, %v915_v36  ;;  %v1173_v48 = vmul.f32 0.40824828, %v1165_v46  ;;  %v1166_v47 = vmul.f32 2.0, %v10234_v44  ;;  %v8581_v10 = vpack.c.bf16 %v1837_v30, %v1826_v26  ;;  %v1856_v36 = vld [vmem:[%s12349_s6 + $0x108] sm:$0xff]  ;;  %v1858_v23 = vld [vmem:[%s12349_s6 + $0x118] sm:$0xff] }
 0x255   : > { %3956 = vperm.xlu1 %9193, %v1187_v37   ;;  %v8565_v37 = vpack.c.bf16 %v1834_v24, %v1823_v42  ;;  %8564 = vmatprep.subr.bf16.mxu0 %v8563_v1  ;;  %v997_v46 = vmul.f32 3.0, %v9987_v14 }
 0x256   : > { %v1189_v15 = vmul.f32 0.70710677, %v955_v27  ;;  %v1174_v35 = vmul.f32 0.40824828, %v1166_v47  ;;  %8582 = vmatprep.subr.bf16.mxu1 %v8581_v10  ;;  %v8569_v27 = vpack.c.bf16 %v1856_v36, %v1845_v63  ;;  %v998_v47 = vmul.f32 3.0, %v9995_v56  ;;  %v1878_v63 = vld [vmem:[%s12349_s6 + $0x1b8] sm:$0xff] }
 0x257   : > { %3981 = vperm.xlu0 %9194, %v1192_v34   ;;  %v938_v25 = vpop.permute.xlu1 %937  ;;  %v1846_v34 = vld [vmem:[%s12349_s6 + $0xb8] sm:$0xff]  ;;  %8566 = vmatpush1.bf16.msra.mxu0 %v8565_v37 }
 0x258   : > { %v957_v0 = vmul.f32 %v938_v25, %v917_v9  ;;  %v8567_v52 = vpack.c.bf16 %v1857_v38, %v1846_v34  ;;  %8584 = vmatpush1.bf16.msra.mxu1 %v8583_v51  ;;  %v1089_v25 = vsub.f32 0.0, %v10213_v40  ;;  %v1091_v40 = vsub.f32 0.0, %v10230_v21  ;;  %v1868_v21 = vld [vmem:[%s12349_s6 + $0x168] sm:$0xff]  ;;  %v1879_v34 = vld [vmem:[%s12349_s6 + $0x1c0] sm:$0xff]  ;;  %v1870_v51 = vld [vmem:[%s12349_s6 + $0x178] sm:$0xff] }
 0x259   : > { %9195 = vset.pattern.permute.xlu1 %v12509_v31 }
 0x25a   : > { %4036 = vperm.xlu1 %9195, %v1171_v2   ;;  %v1191_v61 = vmul.f32 0.70710677, %v957_v0  ;;  %v1848_v2 = vld [vmem:[%s12349_s6 + $0xc8] sm:$0xff]  ;;  %8568 = vmatprep.subr.bf16.mxu0 %v8567_v52  ;;  %v10294_v0 = vmul.f32 0.40824828, %v1089_v25  ;;  %v1881_v52 = vld [vmem:[%s12349_s6 + $0x1d0] sm:$0xff] }
 0x25b   : > { %9201 = vset.pattern.permute.xlu0 %v12509_v31  ;;  %v8585_v33 = vpack.c.bf16 %v1859_v29, %v1848_v2  ;;  %8570 = vmatpush1.bf16.msra.mxu0 %v8569_v27  ;;  %v10312_v37 = vmul.f32 0.40824828, %v1091_v40  ;;  %v8571_v29 = vpack.c.bf16 %v1879_v34, %v1868_v21  ;;  %v1889_v40 = vld [vmem:[%s12349_s6 + $0x210] sm:$0xff]  ;;  %v1902_v34 = vld [vmem:[%s12349_s6 + $0x278] sm:$0xf] }
 0x25d   : > { %8586 = vmatprep.subr.bf16.mxu1 %v8585_v33  ;;  %v1867_v33 = vld [vmem:[%s12349_s6 + $0x160] sm:$0xff]  ;;  %8572 = vmatprep.subr.bf16.mxu0 %v8571_v29 }
 0x25e   : > { %4041 = vperm.xlu1 %9195, %v1172_v6   ;;  %v1847_v6 = vld [vmem:[%s12349_s6 + $0xc0] sm:$0xff]  ;;  %v8573_v27 = vpack.c.bf16 %v1878_v63, %v1867_v33 }
 0x260   : > { %8574 = vmatpush1.bf16.msra.mxu0 %v8573_v27 }
 0x262   : > { %9196 = vset.pattern.permute.xlu1 %v12507_v54 }
 0x263   : > { %3966 = vperm.xlu1 %9196, %v1189_v15   ;;  %v8587_v15 = vpack.c.bf16 %v1858_v23, %v1847_v6  ;;  %v8589_v6 = vpack.c.bf16 %v1881_v52, %v1870_v51  ;;  %v1869_v23 = vld [vmem:[%s12349_s6 + $0x170] sm:$0xff] }
 0x265   : > { %8588 = vmatpush1.bf16.msra.mxu1 %v8587_v15  ;;  %v1880_v15 = vld [vmem:[%s12349_s6 + $0x1c8] sm:$0xff] }
 0x266   : > { %v8591_v25 = vpack.c.bf16 %v1880_v15, %v1869_v23  ;;  %8590 = vmatprep.subr.bf16.mxu1 %v8589_v6 }
 0x267   : > { %9197 = vset.pattern.permute.xlu1 %v12509_v31 }
 0x268   : > { %4046 = vperm.xlu1 %9197, %v1173_v48   ;;  %v1005_v48 = vmul.f32 %v997_v46, %v9987_v14  ;;  %v999_v14 = vmul.f32 3.0, %v9989_v60  ;;  %v1890_v46 = vld [vmem:[%s12349_s6 + $0x218] sm:$0xff] }
 0x269   : > { %8592 = vmatpush1.bf16.msra.mxu1 %v8591_v25 }
 0x26a   : > { %v7135_v9 = vadd.f32 -1.0, %v1005_v48  ;;  %v1007_v10 = vmul.f32 %v999_v14, %v9989_v60  ;;  %v942_v48 = vpop.permute.xlu1 %941 }
 0x26c   : > { %4051 = vperm.xlu1 %9197, %v1174_v35   ;;  %v1006_v35 = vmul.f32 %v998_v47, %v9995_v56  ;;  %v1021_v26 = vmul.f32 1.118034, %v7135_v9  ;;  %v7137_v36 = vadd.f32 -1.0, %v1007_v10  ;;  %v1901_v9 = vld [vmem:[%s12349_s6 + $0x270] sm:$0xf] }
 0x26d   : > { %v8575_v14 = vpack.c.bf16 %v1901_v9, %v1890_v46 }
 0x26e   : > { %v7136_v1 = vadd.f32 -1.0, %v1006_v35  ;;  %v1093_v47 = vsub.f32 0.0, %v1021_v26  ;;  %v1892_v35 = vld [vmem:[%s12349_s6 + $0x228] sm:$0xff] }
 0x26f   : > { %8577 = vmatprep.subr.msk.bf16.mxu0 %vm10082_vm11, %v8575_v14 }
 0x270   : > { %9198 = vset.pattern.permute.xlu1 %v12507_v54  ;;  %v10309_v24 = vmul.f32 1.118034, %v7136_v1 }
 0x271   : > { %3976 = vperm.xlu1 %9198, %v1191_v61   ;;  %v1090_v61 = vsub.f32 0.0, %v10220_v12  ;;  %v1167_v12 = vmul.f32 2.0, %v1021_v26 }
 0x272   : > { %v1168_v2 = vmul.f32 2.0, %v10309_v24 }
 0x273   : > { %v10302_v30 = vmul.f32 0.40824828, %v1090_v61  ;;  %v1175_v38 = vmul.f32 0.40824828, %v1167_v12  ;;  %v1903_v61 = vld [vmem:[%s12349_s6 + $0x280] sm:$0xf] }
 0x274   : > { %v8593_v26 = vpack.c.bf16 %v1903_v61, %v1892_v35  ;;  %v1891_v12 = vld [vmem:[%s12349_s6 + $0x220] sm:$0xff]  ;;  %v1176_v10 = vmul.f32 0.40824828, %v1168_v2  ;;  %v1023_v2 = vmul.f32 1.118034, %v7137_v36  ;;  %v1094_v36 = vsub.f32 0.0, %v10309_v24 }
 0x275   : > { %9199 = vset.pattern.permute.xlu1 %v12509_v31 }
 0x276   : > { %8595 = vmatprep.subr.msk.bf16.mxu1 %vm10082_vm11, %v8593_v26  ;;  %v1095_v63 = vsub.f32 0.0, %v1023_v2 }
 0x278   : > { %v1104_v15 = vmul.f32 0.40824828, %v1095_v63 }
 0x288   : > { %v10297_v13 = vpop.permute.xlu0 %1123 }
 0x289   : > { %v1147_v28 = vadd.f32 %v10297_v13, %v10294_v0  ;;  %v1155_v61 = vsub.f32 %v10294_v0, %v10297_v13  ;;  %v1830_v0 = vld [vmem:[%s12349_s6 + $0x38] sm:$0xff] }
 0x28b   : > { %3732 = vperm.xlu1 %9199, %v1147_v28   ;;  %v919_v28 = vmul.f32 3.8729835, %v9980_v49  ;;  %v1008_v49 = vmul.f32 %v1000_v17, %v10012_v4  ;;  %v1092_v4 = vsub.f32 0.0, %v10234_v44 }
 0x28c   : > { %v10305_v42 = vpop.permute.xlu0 %1125 }
 0x28d   : > { %v1148_v56 = vadd.f32 %v10305_v42, %v10302_v30  ;;  %v959_v51 = vmul.f32 %v942_v48, %v919_v28  ;;  %v7138_v52 = vadd.f32 -1.0, %v1008_v49  ;;  %v1101_v27 = vmul.f32 0.40824828, %v1092_v4 }
 0x28e   : > { %v1103_v48 = vmul.f32 0.40824828, %v1094_v36  ;;  %v1156_v26 = vsub.f32 %v10302_v30, %v10305_v42  ;;  %v1841_v30 = vld [vmem:[%s12349_s6 + $0x90] sm:$0xff]  ;;  %v920_v49 = vmul.f32 3.8729835, %v10004_v7 }
 0x28f   : > { %3737 = vperm.xlu1 %9199, %v1148_v56   ;;  %v1900_v56 = vld [vmem:[%s12349_s6 + $0x268] sm:$0xf]  ;;  %v1193_v33 = vmul.f32 0.70710677, %v959_v51  ;;  %v1024_v23 = vmul.f32 1.118034, %v7138_v52  ;;  %v8617_v42 = vpack.c.bf16 %v1841_v30, %v1830_v0 }
 0x290   : > { %v10314_v22 = vpop.permute.xlu0 %1127  ;;  %v8578_v21 = vpack.c.bf16 %v1900_v56, %v1889_v40  ;;  %v1828_v40 = vld [vmem:[%s12349_s6 + $0x28] sm:$0xff]  ;;  %v1839_v56 = vld [vmem:[%s12349_s6 + $0x80] sm:$0xff]  ;;  %v1861_v36 = vld [vmem:[%s12349_s6 + $0x130] sm:$0xff] }
 0x291   : > { %v1149_v60 = vadd.f32 %v10314_v22, %v10312_v37  ;;  %v1096_v25 = vsub.f32 0.0, %v1024_v23  ;;  %v1885_v0 = vld [vmem:[%s12349_s6 + $0x1f0] sm:$0xff]  ;;  %v1871_v30 = vld [vmem:[%s12349_s6 + $0x180] sm:$0xff] }
 0x292   : > { %8580 = vmatpush1.bf16.msk.msra.mxu0 %vm10082_vm11, %v8578_v21 }
 0x293   : > { %4056 = vperm.xlu1 %9199, %v1175_v38   ;;  %3742 = vperm.xlu0 %9201, %v1149_v60   ;;  %v8596_v60 = vpack.c.bf16 %v1902_v34, %v1891_v12  ;;  %v1102_v38 = vmul.f32 0.40824828, %v1093_v47  ;;  %v1105_v28 = vmul.f32 0.40824828, %v1096_v25  ;;  %v1157_v12 = vsub.f32 %v10312_v37, %v10314_v22  ;;  %v1849_v25 = vld [vmem:[%s12349_s6 + $0xd0] sm:$0xff] }
 0x294   : > { %v1130_v1 = vpop.permute.xlu0 %1129  ;;  %v1170_v22 = vmul.f32 2.0, %v1024_v23  ;;  %v1852_v23 = vld [vmem:[%s12349_s6 + $0xe8] sm:$0xff] }
 0x295   : > { %8598 = vmatpush1.bf16.msk.msra.mxu1 %vm10082_vm11, %v8596_v60  ;;  %v1150_v44 = vadd.f32 %v1130_v1, %v1101_v27  ;;  %v1158_v24 = vsub.f32 %v1101_v27, %v1130_v1  ;;  %v8599_v1 = vpack.c.bf16 %v1839_v56, %v1828_v40  ;;  %v1883_v40 = vld [vmem:[%s12349_s6 + $0x1e0] sm:$0xff]  ;;  %v1874_v56 = vld [vmem:[%s12349_s6 + $0x198] sm:$0xff] }
 0x296   : > { %8618 = vmatprep.subr.bf16.mxu1 %v8617_v42  ;;  %v1178_v7 = vmul.f32 0.40824828, %v1170_v22  ;;  %v1882_v42 = vld [vmem:[%s12349_s6 + $0x1d8] sm:$0xff]  ;;  %v1905_v22 = vld [vmem:[%s12349_s6 + $0x290] sm:$0xf] }
 0x297   : > { %4061 = vperm.xlu1 %9199, %v1176_v10   ;;  %8600 = vmatprep.subr.bf16.mxu0 %v8599_v1 }
 0x298   : > { %v1132_v29 = vpop.permute.xlu0 %1131 }
 0x299   : > { %v1151_v17 = vadd.f32 %v1132_v29, %v1102_v38  ;;  %v1159_v51 = vsub.f32 %v1102_v38, %v1132_v29  ;;  %v1827_v29 = vld [vmem:[%s12349_s6 + $0x20] sm:$0xff] }
 0x29b   : > { %9200 = vset.pattern.permute.xlu1 %v12507_v54  ;;  %3752 = vperm.xlu0 %9201, %v1151_v17   ;;  %v1169_v17 = vmul.f32 2.0, %v1023_v2  ;;  %v1829_v2 = vld [vmem:[%s12349_s6 + $0x30] sm:$0xff] }
 0x29c   : > { %3986 = vperm.xlu1 %9200, %v1193_v33   ;;  %v1134_v6 = vpop.permute.xlu0 %1133 }
 0x29d   : > { %v1152_v9 = vadd.f32 %v1134_v6, %v1103_v48  ;;  %v1160_v13 = vsub.f32 %v1103_v48, %v1134_v6  ;;  %v1177_v37 = vmul.f32 0.40824828, %v1169_v17  ;;  %v1850_v6 = vld [vmem:[%s12349_s6 + $0xd8] sm:$0xff] }
 0x29e   : > { %v1894_v17 = vld [vmem:[%s12349_s6 + $0x238] sm:$0xff] }
 0x2a0   : > { %9202 = vset.pattern.permute.xlu1 %v12509_v31  ;;  %v1136_v46 = vpop.permute.xlu0 %1135 }
 0x2a1   : > { %v1153_v47 = vadd.f32 %v1136_v46, %v1104_v15  ;;  %3747 = vperm.xlu1 %9202, %v1150_v44   ;;  %v1161_v4 = vsub.f32 %v1104_v15, %v1136_v46  ;;  %v1863_v44 = vld [vmem:[%s12349_s6 + $0x140] sm:$0xff] }
 0x2a3   : > { %3762 = vperm.xlu0 %9201, %v1153_v47  }
 0x2a4   : > { %v1138_v35 = vpop.permute.xlu0 %1137 }
 0x2a5   : > { %3757 = vperm.xlu1 %9202, %v1152_v9   ;;  %v1154_v14 = vadd.f32 %v1138_v35, %v1105_v28  ;;  %v1162_v21 = vsub.f32 %v1105_v28, %v1138_v35  ;;  %v1860_v9 = vld [vmem:[%s12349_s6 + $0x128] sm:$0xff]  ;;  %v8603_v35 = vpack.c.bf16 %v1861_v36, %v1850_v6  ;;  %v1851_v28 = vld [vmem:[%s12349_s6 + $0xe0] sm:$0xff]  ;;  %v1906_v36 = vld [vmem:[%s12349_s6 + $0x298] sm:$0xf] }
 0x2a6   : > { %v8605_v1 = vpack.c.bf16 %v1860_v9, %v1849_v25 }
 0x2a7   : > { %3900 = vperm.xlu0 %9201, %v1155_v61   ;;  %v8621_v61 = vpack.c.bf16 %v1863_v44, %v1852_v23  ;;  %v1832_v23 = vld [vmem:[%s12349_s6 + $0x48] sm:$0xff]  ;;  %v1843_v44 = vld [vmem:[%s12349_s6 + $0xa0] sm:$0xff] }
 0x2a8   : > { %v944_v10 = vpop.permute.xlu0 %943 }
 0x2a9   : > { %3767 = vperm.xlu1 %9202, %v1154_v14   ;;  %v960_v34 = vmul.f32 %v944_v10, %v920_v49  ;;  %v1862_v14 = vld [vmem:[%s12349_s6 + $0x138] sm:$0xff] }
 0x2ab   : > { %3915 = vperm.xlu0 %9201, %v1158_v24   ;;  %v1194_v60 = vmul.f32 0.70710677, %v960_v34  ;;  %v1872_v24 = vld [vmem:[%s12349_s6 + $0x188] sm:$0xff] }
 0x2ac   : > { %v8607_v34 = vpack.c.bf16 %v1883_v40, %v1872_v24 }
 0x2ad   : > { %3905 = vperm.xlu1 %9202, %v1156_v26  }
 0x2af   : > { %3925 = vperm.xlu0 %9201, %v1160_v13  }
 0x2b1   : > { %3910 = vperm.xlu1 %9202, %v1157_v12  }
 0x2b3   : > { %3935 = vperm.xlu0 %9201, %v1162_v21   ;;  %v8623_v21 = vpack.c.bf16 %v1862_v14, %v1851_v28  ;;  %v8635_v28 = vpack.c.bf16 %v1843_v44, %v1832_v23 }
 0x2b5   : > { %3920 = vperm.xlu1 %9202, %v1159_v51   ;;  %v8625_v51 = vpack.c.bf16 %v1885_v0, %v1874_v56 }
 0x2b7   : > { %9203 = vset.pattern.permute.xlu0 %v12507_v54  ;;  %v1838_v54 = vld [vmem:[%s12349_s6 + $0x78] sm:$0xff] }
 0x2b8   : > { %3991 = vperm.xlu0 %9203, %v1194_v60   ;;  %v8601_v48 = vpack.c.bf16 %v1838_v54, %v1827_v29  ;;  %v1873_v60 = vld [vmem:[%s12349_s6 + $0x190] sm:$0xff] }
 0x2b9   : > { %3930 = vperm.xlu1 %9202, %v1161_v4   ;;  %v1884_v4 = vld [vmem:[%s12349_s6 + $0x1e8] sm:$0xff]  ;;  %v1893_v54 = vld [vmem:[%s12349_s6 + $0x230] sm:$0xff] }
 0x2ba   : > { %v8627_v29 = vpack.c.bf16 %v1884_v4, %v1873_v60  ;;  %v1831_v60 = vld [vmem:[%s12349_s6 + $0x40] sm:$0xff]  ;;  %v1842_v4 = vld [vmem:[%s12349_s6 + $0x98] sm:$0xff] }
 0x2bc   : > { %9204 = vset.pattern.permute.xlu0 %v12509_v31  ;;  %v1840_v31 = vld [vmem:[%s12349_s6 + $0x88] sm:$0xff] }
 0x2bd   : > { %4066 = vperm.xlu1 %9202, %v1177_v37   ;;  %v8619_v47 = vpack.c.bf16 %v1840_v31, %v1829_v2  ;;  %v1904_v2 = vld [vmem:[%s12349_s6 + $0x288] sm:$0xf]  ;;  %v8611_v31 = vpack.c.bf16 %v1905_v22, %v1894_v17  ;;  %v1854_v17 = vld [vmem:[%s12349_s6 + $0xf8] sm:$0xff]  ;;  %v1855_v22 = vld [vmem:[%s12349_s6 + $0x100] sm:$0xff] }
 0x2be   : > { %v8614_v9 = vpack.c.bf16 %v1904_v2, %v1893_v54  ;;  %v1864_v54 = vld [vmem:[%s12349_s6 + $0x148] sm:$0xff] }
 0x2bf   : > { %v1876_v2 = vld [vmem:[%s12349_s6 + $0x1a8] sm:$0xff] }
 0x2c1   : > { %4071 = vperm.xlu1 %9202, %v1178_v7   ;;  %v1896_v7 = vld [vmem:[%s12349_s6 + $0x248] sm:$0xff] }
 0x30b   : > { %v7837_v52 = vpop.f32.mrb[0].mxu1 }
 0x30c   : > { %v1760_v33 = vpop.f32.mrb[1].mxu1  ;;  %v1800_v63 = vmul.f32 0.2236068, %v7837_v52  ;;  %v1907_v52 = vld [vmem:[%s12349_s6 + $0x2a0] sm:$0xf] }
 0x30d   : > { %v1799_v38 = vmul.f32 0.2236068, %v1760_v33  ;;  %v8629_v6 = vpack.c.bf16 %v1907_v52, %v1896_v7  ;;  %v1866_v7 = vld [vmem:[%s12349_s6 + $0x158] sm:$0xff]  ;;  %v8637_v52 = vpack.c.bf16 %v1842_v4, %v1831_v60  ;;  %v2744_v60 = vld [vmem:[%s12355_s12 + $0x48] sm:$0xff] }
 0x30e   : > { %v1808_v15 = vmax.f32 %v1800_v63, 0.0 }
 0x30f   : > { %v1807_v27 = vmax.f32 %v1799_v38, 0.0  ;;  %v8609_v38 = vpack.c.bf16 %v1882_v42, %v1871_v30 }
 0x310   : > { %v10465_v12 = vmul.f32 1.4142135, %v1808_v15  ;;  %v1833_v15 = vld [vmem:[%s12349_s6 + $0x50] sm:$0xff] }
 0x311   : > { %v10427_v46 = vmul.f32 1.4142135, %v1807_v27  ;;  %v1895_v27 = vld [vmem:[%s12349_s6 + $0x240] sm:$0xff] }
 0x313   : > { %v7840_v26 = vpop.f32.mrb[2].mxu1  ;;  %7159 = vmatmul.mubr.msk.f32.vlgmr.msra.gmra.mrb[8].mxu0 %vm1666_vm12, %v10427_v46  ;;  %7169 = vmatmul.mubr.msk.f32.vlgmr.msra.gmra.mrb[8].mxu1 %vm1666_vm12, %v10427_v46 }
 0x314   : > { %v1770_v13 = vpop.f32.mrb[3].mxu1  ;;  %2038 = vmatprep.mubr.f32.mxu0 %v12508_v3  ;;  %2151 = vmatprep.mubr.f32.mxu1 %v12508_v3  ;;  %v1802_v10 = vmul.f32 0.2236068, %v7840_v26 }
 0x315   : > { %v1801_v49 = vmul.f32 0.2236068, %v1770_v13  ;;  %8602 = vmatpush1.bf16.msra.mxu0 %v8601_v48  ;;  %8620 = vmatpush1.bf16.msra.mxu1 %v8619_v47  ;;  %v1844_v48 = vld [vmem:[%s12349_s6 + $0xa8] sm:$0xff] }
 0x316   : > { %8604 = vmatprep.subr.bf16.mxu0 %v8603_v35  ;;  %8622 = vmatprep.subr.bf16.mxu1 %v8621_v61  ;;  %v1810_v33 = vmax.f32 %v1802_v10, 0.0  ;;  %v8632_v35 = vpack.c.bf16 %v1906_v36, %v1895_v27  ;;  %v8653_v14 = vpack.c.bf16 %v1844_v48, %v1833_v15  ;;  %v1888_v27 = vld [vmem:[%s12349_s6 + $0x208] sm:$0xff]  ;;  %v1875_v15 = vld [vmem:[%s12349_s6 + $0x1a0] sm:$0xff]  ;;  %v1886_v48 = vld [vmem:[%s12349_s6 + $0x1f8] sm:$0xff] }
 0x317   : > { %v1809_v37 = vmax.f32 %v1801_v49, 0.0  ;;  %7160 = vmatmul.mubr.msk.f32.gmra.mrb[10].mxu0 %vm1666_vm12, %v10465_v12  ;;  %7170 = vmatmul.mubr.msk.f32.gmra.mrb[10].mxu1 %vm1666_vm12, %v10465_v12 }
 0x318   : > { %2044 = vmatprep.mubr.f32.mxu0 %v12508_v3  ;;  %2157 = vmatprep.mubr.f32.mxu1 %v12508_v3  ;;  %v10523_v47 = vmul.f32 1.4142135, %v1810_v33 }
 0x319   : > { %v10491_v63 = vmul.f32 1.4142135, %v1809_v37  ;;  %8606 = vmatpush1.bf16.msra.mxu0 %v8605_v1  ;;  %8624 = vmatpush1.bf16.msra.mxu1 %v8623_v21  ;;  %v1865_v37 = vld [vmem:[%s12349_s6 + $0x150] sm:$0xff] }
 0x31a   : > { %8608 = vmatprep.subr.bf16.mxu0 %v8607_v34  ;;  %8626 = vmatprep.subr.bf16.mxu1 %v8625_v51  ;;  %v8639_v33 = vpack.c.bf16 %v1865_v37, %v1854_v17  ;;  %v2745_v17 = vld [vmem:[%s12355_s12 + $0x50] sm:$0xff]  ;;  %v2746_v37 = vld [vmem:[%s12355_s12 + $0x58] sm:$0xff] }
 0x31b   : > { %7161 = vmatmul.mubr.msk.f32.gmra.mrb[12].mxu0 %vm1666_vm12, %v10491_v63  ;;  %7171 = vmatmul.mubr.msk.f32.gmra.mrb[12].mxu1 %vm1666_vm12, %v10491_v63 }
 0x31c   : > { %2050 = vmatprep.mubr.f32.mxu0 %v12508_v3  ;;  %2163 = vmatprep.mubr.f32.mxu1 %v12508_v3 }
 0x31d   : > { %v7843_v25 = vpop.f32.mrb[4].mxu1  ;;  %8610 = vmatpush1.bf16.msra.mxu0 %v8609_v38  ;;  %8628 = vmatpush1.bf16.msra.mxu1 %v8627_v29  ;;  %v8657_v38 = vpack.c.bf16 %v1866_v7, %v1855_v22  ;;  %v1853_v29 = vld [vmem:[%s12349_s6 + $0xf0] sm:$0xff]  ;;  %v8691_v22 = vpack.c.bf16 %v2746_v37, %v2745_v17  ;;  %v2747_v7 = vld [vmem:[%s12355_s12 + $0x60] sm:$0xff] }
 0x31e   : > { %v1780_v61 = vpop.f32.mrb[5].mxu1  ;;  %8613 = vmatprep.subr.msk.bf16.mxu0 %vm10082_vm11, %v8611_v31  ;;  %8631 = vmatprep.subr.msk.bf16.mxu1 %vm10082_vm11, %v8629_v6  ;;  %v1804_v24 = vmul.f32 0.2236068, %v7843_v25  ;;  %v1887_v31 = vld [vmem:[%s12349_s6 + $0x200] sm:$0xff]  ;;  %v1877_v6 = vld [vmem:[%s12349_s6 + $0x1b0] sm:$0xff]  ;;  %v8641_v36 = vpack.c.bf16 %v1864_v54, %v1853_v29  ;;  %v1898_v25 = vld [vmem:[%s12349_s6 + $0x258] sm:$0xff] }
 0x31f   : > { %v1803_v26 = vmul.f32 0.2236068, %v1780_v61  ;;  %7162 = vmatmul.mubr.msk.f32.gmra.mrb[14].mxu0 %vm1666_vm12, %v10523_v47  ;;  %7172 = vmatmul.mubr.msk.f32.gmra.mrb[14].mxu1 %vm1666_vm12, %v10523_v47  ;;  %v8643_v23 = vpack.c.bf16 %v1887_v31, %v1876_v2  ;;  %v8661_v44 = vpack.c.bf16 %v1888_v27, %v1877_v6  ;;  %v1910_v61 = vld [vmem:[%s12349_s6 + $0x2b8] sm:$0xf] }
 0x320   : > { %2056 = vmatprep.mubr.f32.mxu0 %v12508_v3  ;;  %2169 = vmatprep.mubr.f32.mxu1 %v12508_v3  ;;  %v1812_v56 = vmax.f32 %v1804_v24, 0.0  ;;  %v2750_v29 = vld [vmem:[%s12355_s12 + $0x78] sm:$0xff] }
 0x321   : > { %v1811_v40 = vmax.f32 %v1803_v26, 0.0  ;;  %8616 = vmatpush1.bf16.msk.msra.mxu0 %vm10082_vm11, %v8614_v9  ;;  %8634 = vmatpush1.bf16.msk.msra.mxu1 %vm10082_vm11, %v8632_v35  ;;  %v1909_v9 = vld [vmem:[%s12349_s6 + $0x2b0] sm:$0xf]  ;;  %v1899_v35 = vld [vmem:[%s12349_s6 + $0x260] sm:$0xff] }
 0x322   : > { %8636 = vmatprep.subr.bf16.mxu0 %v8635_v28  ;;  %8654 = vmatprep.subr.bf16.mxu1 %v8653_v14  ;;  %v10547_v1 = vmul.f32 1.4142135, %v1812_v56  ;;  %v8645_v28 = vpack.c.bf16 %v1886_v48, %v1875_v15  ;;  %v8665_v24 = vpack.c.bf16 %v1910_v61, %v1899_v35  ;;  %v1897_v26 = vld [vmem:[%s12349_s6 + $0x250] sm:$0xff] }
 0x323   : > { %v10539_v0 = vmul.f32 1.4142135, %v1811_v40  ;;  %v1908_v40 = vld [vmem:[%s12349_s6 + $0x2a8] sm:$0xf] }
 0x324   : > { %v8650_v56 = vpack.c.bf16 %v1908_v40, %v1897_v26 }
 0x325   : > { %7163 = vmatmul.mubr.msk.f32.gmra.mrb[16].mxu0 %vm1666_vm12, %v10539_v0  ;;  %7173 = vmatmul.mubr.msk.f32.gmra.mrb[16].mxu1 %vm1666_vm12, %v10539_v0 }
 0x326   : > { %v7846_v13 = vpop.f32.mrb[6].mxu1  ;;  %2062 = vmatprep.mubr.f32.mxu0 %v12508_v3  ;;  %2175 = vmatprep.mubr.f32.mxu1 %v12508_v3 }
 0x327   : > { %v1790_v30 = vpop.f32.mrb[7].mxu1  ;;  %v1806_v42 = vmul.f32 0.2236068, %v7846_v13  ;;  %v2734_v13 = vld [vmem:[%s12354_s11] sm:$0x1f] }
 0x328   : > { %v1805_v10 = vmul.f32 0.2236068, %v1790_v30  ;;  %v2739_v30 = vld [vmem:[%s12355_s12 + $0x20] sm:$0xff] }
 0x329   : > { %7164 = vmatmul.mubr.msk.f32.gmra.mrb[18].mxu0 %vm1666_vm12, %v10547_v1  ;;  %7174 = vmatmul.mubr.msk.f32.gmra.mrb[18].mxu1 %vm1666_vm12, %v10547_v1  ;;  %v1814_v21 = vmax.f32 %v1806_v42, 0.0  ;;  %v2740_v42 = vld [vmem:[%s12355_s12 + $0x28] sm:$0xff] }
 0x32a   : > { %v1813_v49 = vmax.f32 %v1805_v10, 0.0  ;;  %2068 = vmatprep.mubr.f32.mxu0 %v12508_v3  ;;  %2181 = vmatprep.mubr.f32.mxu1 %v12508_v3  ;;  %v8679_v10 = vpack.c.bf16 %v2740_v42, %v2739_v30 }
 0x32b   : > { %v10563_v51 = vmul.f32 1.4142135, %v1814_v21  ;;  %v2742_v21 = vld [vmem:[%s12355_s12 + $0x38] sm:$0xff] }
 0x32c   : > { %v10555_v34 = vmul.f32 1.4142135, %v1813_v49  ;;  %v2741_v49 = vld [vmem:[%s12355_s12 + $0x30] sm:$0xff] }
 0x32e   : > { %7165 = vmatmul.mubr.msk.f32.gmra.mrb[20].mxu0 %vm1666_vm12, %v10555_v34  ;;  %7175 = vmatmul.mubr.msk.f32.gmra.mrb[20].mxu1 %vm1666_vm12, %v10555_v34 }
 0x32f   : > { %2074 = vmatprep.mubr.f32.mxu0 %v12508_v3  ;;  %2187 = vmatprep.mubr.f32.mxu1 %v12508_v3 }
 0x332   : > { %7166 = vmatmul.mubr.msk.f32.gmra.mrb[22].mxu0 %vm1666_vm12, %v10563_v51  ;;  %7176 = vmatmul.mubr.msk.f32.gmra.mrb[22].mxu1 %vm1666_vm12, %v10563_v51 }
 0x333   : > { %2258 = vmatprep.mubr.f32.mxu0 %v12508_v3  ;;  %2371 = vmatprep.mubr.f32.mxu1 %v12508_v3 }
 0x336   : > { %7179 = vmatmul.mubr.msk.f32.vlgmr.msra.gmra.mrb[24].mxu0 %vm1666_vm12, %v10427_v46  ;;  %7189 = vmatmul.mubr.msk.f32.vlgmr.msra.gmra.mrb[24].mxu1 %vm1666_vm12, %v10427_v46 }
 0x337   : > { %2264 = vmatprep.mubr.f32.mxu0 %v12508_v3  ;;  %2377 = vmatprep.mubr.f32.mxu1 %v12508_v3 }
 0x338   : > { %8638 = vmatpush1.bf16.msra.mxu0 %v8637_v52  ;;  %8656 = vmatpush3.bf16.msra.mxu1 %v8653_v14  ;;  %v8647_v14 = vpack.c.bf16 %v1909_v9, %v1898_v25  ;;  %v2748_v52 = vld [vmem:[%s12355_s12 + $0x68] sm:$0xff] }
 0x339   : > { %8640 = vmatprep.subr.bf16.mxu0 %v8639_v33  ;;  %8658 = vmatprep.subr.bf16.mxu1 %v8657_v38  ;;  %v8695_v33 = vpack.c.bf16 %v2748_v52, %v2747_v7 }
 0x33a   : > { %7180 = vmatmul.mubr.msk.f32.gmra.mrb[26].mxu0 %vm1666_vm12, %v10465_v12  ;;  %7190 = vmatmul.mubr.msk.f32.gmra.mrb[26].mxu1 %vm1666_vm12, %v10465_v12 }
 0x33b   : > { %2270 = vmatprep.mubr.f32.mxu0 %v12508_v3  ;;  %2383 = vmatprep.mubr.f32.mxu1 %v12508_v3 }
 0x33c   : > { %8642 = vmatpush1.bf16.msra.mxu0 %v8641_v36  ;;  %8660 = vmatpush3.bf16.msra.mxu1 %v8657_v38  ;;  %v2749_v38 = vld [vmem:[%s12355_s12 + $0x70] sm:$0xff] }
 0x33d   : > { %8644 = vmatprep.subr.bf16.mxu0 %v8643_v23  ;;  %8662 = vmatprep.subr.bf16.mxu1 %v8661_v44  ;;  %v8699_v54 = vpack.c.bf16 %v2750_v29, %v2749_v38 }
 0x33e   : > { %7181 = vmatmul.mubr.msk.f32.gmra.mrb[28].mxu0 %vm1666_vm12, %v10491_v63  ;;  %7191 = vmatmul.mubr.msk.f32.gmra.mrb[28].mxu1 %vm1666_vm12, %v10491_v63 }
 0x33f   : > { %2276 = vmatprep.mubr.f32.mxu0 %v12508_v3  ;;  %2389 = vmatprep.mubr.f32.mxu1 %v12508_v3 }
 0x340   : > { %8646 = vmatpush1.bf16.msra.mxu0 %v8645_v28  ;;  %8664 = vmatpush3.bf16.msra.mxu1 %v8661_v44 }
 0x341   : > { %8649 = vmatprep.subr.msk.bf16.mxu0 %vm10082_vm11, %v8647_v14  ;;  %8667 = vmatprep.subr.msk.bf16.mxu1 %vm10082_vm11, %v8665_v24 }
 0x342   : > { %7182 = vmatmul.mubr.msk.f32.gmra.mrb[30].mxu0 %vm1666_vm12, %v10523_v47  ;;  %7192 = vmatmul.mubr.msk.f32.gmra.mrb[30].mxu1 %vm1666_vm12, %v10523_v47 }
 0x343   : > { %2282 = vmatprep.mubr.f32.mxu0 %v12508_v3  ;;  %2395 = vmatprep.mubr.f32.mxu1 %v12508_v3 }
 0x344   : > { %8652 = vmatpush1.bf16.msk.msra.mxu0 %vm10082_vm11, %v8650_v56  ;;  %8670 = vmatpush3.bf16.msk.msra.mxu1 %vm10082_vm11, %v8665_v24 }
 0x345   : > { %7875 = vmatprep.subr.msk.mxu1 %vm2810_vm13, %v2734_v13 }
 0x346   : > { %7183 = vmatmul.mubr.msk.f32.gmra.mrb[32].mxu0 %vm1666_vm12, %v10539_v0  ;;  %7193 = vmatmul.mubr.msk.f32.gmra.mrb[32].mxu1 %vm1666_vm12, %v10539_v0 }
 0x347   : > { %2288 = vmatprep.mubr.f32.mxu0 %v12508_v3  ;;  %2401 = vmatprep.mubr.f32.mxu1 %v12508_v3 }
 0x34a   : > { %7184 = vmatmul.mubr.msk.f32.gmra.mrb[34].mxu0 %vm1666_vm12, %v10547_v1  ;;  %7194 = vmatmul.mubr.msk.f32.gmra.mrb[34].mxu1 %vm1666_vm12, %v10547_v1 }
 0x34b   : > { %2294 = vmatprep.mubr.f32.mxu0 %v12508_v3  ;;  %2407 = vmatprep.mubr.f32.mxu1 %v12508_v3 }
 0x34e   : > { %7185 = vmatmul.mubr.msk.f32.gmra.mrb[36].mxu0 %vm1666_vm12, %v10555_v34  ;;  %7195 = vmatmul.mubr.msk.f32.gmra.mrb[36].mxu1 %vm1666_vm12, %v10555_v34 }
 0x34f   : > { %2300 = vmatprep.mubr.f32.mxu0 %v12508_v3  ;;  %2413 = vmatprep.mubr.f32.mxu1 %v12508_v3 }
 0x352   : > { %7186 = vmatmul.mubr.msk.f32.gmra.mrb[38].mxu0 %vm1666_vm12, %v10563_v51  ;;  %7196 = vmatmul.mubr.msk.f32.gmra.mrb[38].mxu1 %vm1666_vm12, %v10563_v51 }
 0x353   : > { %7863 = vmatprep.mubr.msk.f32.mxu1 %vm1666_vm12, %v10427_v46  ;;  %2484 = vmatprep.mubr.f32.mxu0 %v12508_v3 }
 0x356   : > { %7199 = vmatmul.mubr.msk.f32.vlgmr.msra.gmra.mrb[40].mxu0 %vm1666_vm12, %v10427_v46  ;;  %7864 = vmatmul.mubr.msk.f32.vlgmr.msra.gmra.mrb[40].mxu1 %vm1666_vm12, %v10465_v12  ;;  %v2735_v46 = vld [vmem:[%s12355_s12] sm:$0xff] }
 0x357   : > { %7866 = vmatprep.mubr.msk.f32.mxu1 %vm1666_vm12, %v10491_v63  ;;  %2490 = vmatprep.mubr.f32.mxu0 %v12508_v3 }
 0x358   : > { %7876 = vmatpush3.msk.msra.mxu1 %vm2810_vm13, %v2734_v13 }
 0x35a   : > { %7200 = vmatmul.mubr.msk.f32.gmra.mrb[42].mxu0 %vm1666_vm12, %v10465_v12  ;;  %7867 = vmatmul.mubr.msk.f32.gmra.mrb[42].mxu1 %vm1666_vm12, %v10523_v47  ;;  %v2736_v12 = vld [vmem:[%s12355_s12 + $0x8] sm:$0xff] }
 0x35b   : > { %7869 = vmatprep.mubr.msk.f32.mxu1 %vm1666_vm12, %v10539_v0  ;;  %2496 = vmatprep.mubr.f32.mxu0 %v12508_v3 }
 0x35e   : > { %7201 = vmatmul.mubr.msk.f32.gmra.mrb[44].mxu0 %vm1666_vm12, %v10491_v63  ;;  %7870 = vmatmul.mubr.msk.f32.gmra.mrb[44].mxu1 %vm1666_vm12, %v10547_v1  ;;  %v8671_v63 = vpack.c.bf16 %v2736_v12, %v2735_v46 }
 0x35f   : > { %7872 = vmatprep.mubr.msk.f32.mxu1 %vm1666_vm12, %v10555_v34  ;;  %2502 = vmatprep.mubr.f32.mxu0 %v12508_v3 }
 0x360   : > { %8672 = vmatprep.subr.bf16.mxu0 %v8671_v63  ;;  %8704 = vmatprep.subr.bf16.mxu1 %v8671_v63 }
 0x361   : > { %8674 = vmatpush3.bf16.msra.mxu0 %v8671_v63 }
 0x362   : > { %7202 = vmatmul.mubr.msk.f32.gmra.mrb[46].mxu0 %vm1666_vm12, %v10523_v47  ;;  %7873 = vmatmul.mubr.msk.f32.gmra.mrb[46].mxu1 %vm1666_vm12, %v10563_v51  ;;  %v2737_v47 = vld [vmem:[%s12355_s12 + $0x10] sm:$0xff] }
 0x363   : > { %2508 = vmatprep.mubr.f32.mxu0 %v12508_v3  ;;  %7877 = vmatprep.mubr.msk.f32.mxu1 %vm2806_vm14, %v10718_v20 }
 0x366   : > { %7203 = vmatmul.mubr.msk.f32.gmra.mrb[48].mxu0 %vm1666_vm12, %v10539_v0  ;;  %7878 = vmatmul.mubr.msk.f32.vlgmr.msra.gmra.mrb[48].mxu1 %vm2806_vm14, %v10718_v20  ;;  %v2738_v0 = vld [vmem:[%s12355_s12 + $0x18] sm:$0xff] }
 0x367   : > { %2514 = vmatprep.mubr.f32.mxu0 %v12508_v3  ;;  %7880 = vmatprep.mubr.msk.f32.mxu1 %vm2806_vm14, %v10718_v20 }
 0x368   : > { %8706 = vmatpush3.bf16.msra.mxu1 %v8671_v63 }
 0x36a   : > { %7204 = vmatmul.mubr.msk.f32.gmra.mrb[50].mxu0 %vm1666_vm12, %v10547_v1  ;;  %7881 = vmatmul.mubr.msk.f32.gmra.mrb[50].mxu1 %vm2806_vm14, %v10718_v20  ;;  %v8675_v1 = vpack.c.bf16 %v2738_v0, %v2737_v47 }
 0x36b   : > { %2520 = vmatprep.mubr.f32.mxu0 %v12508_v3  ;;  %7883 = vmatprep.mubr.msk.f32.mxu1 %vm2806_vm14, %v10718_v20 }
 0x36c   : > { %8676 = vmatprep.subr.bf16.mxu0 %v8675_v1  ;;  %8708 = vmatprep.subr.bf16.mxu1 %v8675_v1 }
 0x36d   : > { %8678 = vmatpush3.bf16.msra.mxu0 %v8675_v1  ;;  %8710 = vmatpush3.bf16.msra.mxu1 %v8675_v1 }
 0x36e   : > { %7205 = vmatmul.mubr.msk.f32.gmra.mrb[52].mxu0 %vm1666_vm12, %v10555_v34  ;;  %7884 = vmatmul.mubr.msk.f32.gmra.mrb[52].mxu1 %vm2806_vm14, %v10718_v20  ;;  %v8683_v34 = vpack.c.bf16 %v2742_v21, %v2741_v49 }
 0x36f   : > { %2526 = vmatprep.mubr.f32.mxu0 %v12508_v3  ;;  %7886 = vmatprep.mubr.msk.f32.mxu1 %vm2806_vm14, %v10718_v20 }
 0x370   : > { %8680 = vmatprep.subr.bf16.mxu0 %v8679_v10  ;;  %8712 = vmatprep.subr.bf16.mxu1 %v8679_v10 }
 0x371   : > { %8682 = vmatpush3.bf16.msra.mxu0 %v8679_v10  ;;  %8714 = vmatpush3.bf16.msra.mxu1 %v8679_v10 }
 0x372   : > { %7206 = vmatmul.mubr.msk.f32.gmra.mrb[54].mxu0 %vm1666_vm12, %v10563_v51  ;;  %7887 = vmatmul.mubr.msk.f32.gmra.mrb[54].mxu1 %vm2806_vm14, %v10718_v20  ;;  %v2743_v51 = vld [vmem:[%s12355_s12 + $0x40] sm:$0xff] }
 0x373   : > { %8684 = vmatprep.subr.bf16.mxu0 %v8683_v34  ;;  %8716 = vmatprep.subr.bf16.mxu1 %v8683_v34  ;;  %v8687_v4 = vpack.c.bf16 %v2744_v60, %v2743_v51 }
 0x375   : > { %8686 = vmatpush3.bf16.msra.mxu0 %v8683_v34  ;;  %8718 = vmatpush3.bf16.msra.mxu1 %v8683_v34 }
 0x376   : > { %8688 = vmatprep.subr.bf16.mxu0 %v8687_v4  ;;  %8720 = vmatprep.subr.bf16.mxu1 %v8687_v4 }
 0x379   : > { %8690 = vmatpush3.bf16.msra.mxu0 %v8687_v4  ;;  %8722 = vmatpush3.bf16.msra.mxu1 %v8687_v4 }
 0x37a   : > { %8692 = vmatprep.subr.bf16.mxu0 %v8691_v22  ;;  %8724 = vmatprep.subr.bf16.mxu1 %v8691_v22 }
 0x37d   : > { %8694 = vmatpush3.bf16.msra.mxu0 %v8691_v22  ;;  %8726 = vmatpush3.bf16.msra.mxu1 %v8691_v22 }
 0x37e   : > { %8696 = vmatprep.subr.bf16.mxu0 %v8695_v33  ;;  %8728 = vmatprep.subr.bf16.mxu1 %v8695_v33 }
 0x381   : > { %8698 = vmatpush3.bf16.msra.mxu0 %v8695_v33  ;;  %8730 = vmatpush3.bf16.msra.mxu1 %v8695_v33 }
 0x382   : > { %8700 = vmatprep.subr.bf16.mxu0 %v8699_v54  ;;  %8732 = vmatprep.subr.bf16.mxu1 %v8699_v54 }
 0x385   : > { %8702 = vmatpush3.bf16.msra.mxu0 %v8699_v54  ;;  %8734 = vmatpush3.bf16.msra.mxu1 %v8699_v54 }
 0x386   : > { %7977 = vmatprep.subr.mxu0 %v12508_v3 }
 0x3e6   : > { %v10801_v2 = vpop.f32.mrb[8].mxu0  ;;  %v10803_v31 = vpop.f32.mrb[8].mxu1 }
 0x3e7   : > { %12510 = vst [vmem:[#allocation33_spill] sm:$0xff] %v10803_v31  ;;  %v10805_v6 = vpop.f32.mrb[9].mxu0  ;;  %v10807_v27 = vpop.f32.mrb[9].mxu1 }
 0x3e8   : > { %12511 = vst [vmem:[#allocation34_spill] sm:$0xff] %v10807_v27 }
 0x3ea   : > { %v10809_v36 = vpop.f32.mrb[10].mxu0  ;;  %v10811_v23 = vpop.f32.mrb[10].mxu1 }
 0x3eb   : > { %12512 = vst [vmem:[#allocation35_spill] sm:$0xff] %v10811_v23  ;;  %v10813_v44 = vpop.f32.mrb[11].mxu0  ;;  %v10815_v15 = vpop.f32.mrb[11].mxu1 }
 0x3ec   : > { %12513 = vst [vmem:[#allocation36_spill] sm:$0xff] %v10815_v15 }
 0x3ee   : > { %v10817_v48 = vpop.f32.mrb[12].mxu0  ;;  %v10819_v25 = vpop.f32.mrb[12].mxu1 }
 0x3ef   : > { %12514 = vst [vmem:[#allocation37_spill] sm:$0xff] %v10819_v25  ;;  %v10821_v9 = vpop.f32.mrb[13].mxu0  ;;  %v10823_v35 = vpop.f32.mrb[13].mxu1 }
 0x3f0   : > { %12515 = vst [vmem:[#allocation38_spill] sm:$0xff] %v10823_v35 }
 0x3f2   : > { %v10825_v61 = vpop.f32.mrb[14].mxu0  ;;  %v10827_v28 = vpop.f32.mrb[14].mxu1 }
 0x3f3   : > { %12516 = vst [vmem:[#allocation39_spill] sm:$0xff] %v10827_v28  ;;  %v10829_v14 = vpop.f32.mrb[15].mxu0  ;;  %v10831_v24 = vpop.f32.mrb[15].mxu1 }
 0x3f4   : > { %12517 = vst [vmem:[#allocation40_spill] sm:$0xff] %v10831_v24 }
 0x3f8   : > { %v10833_v26 = vpop.f32.mrb[16].mxu0  ;;  %v10835_v40 = vpop.f32.mrb[16].mxu1 }
 0x3f9   : > { %12518 = vst [vmem:[#allocation41_spill] sm:$0xff] %v10835_v40  ;;  %v10837_v56 = vpop.f32.mrb[17].mxu0  ;;  %v10839_v13 = vpop.f32.mrb[17].mxu1 }
 0x3fa   : > { %12519 = vst [vmem:[#allocation42_spill] sm:$0xff] %v10839_v13 }
 0x3fc   : > { %v10841_v46 = vpop.f32.mrb[18].mxu0  ;;  %v10843_v12 = vpop.f32.mrb[18].mxu1 }
 0x3fd   : > { %12520 = vst [vmem:[#allocation43_spill] sm:$0xff] %v10843_v12  ;;  %v10845_v63 = vpop.f32.mrb[19].mxu0  ;;  %v10847_v47 = vpop.f32.mrb[19].mxu1 }
 0x3fe   : > { %12521 = vst [vmem:[#allocation44_spill] sm:$0xff] %v10847_v47 }
 0x401   : > { %v10849_v0 = vpop.f32.mrb[20].mxu0  ;;  %v10851_v1 = vpop.f32.mrb[20].mxu1 }
 0x402   : > { %12522 = vst [vmem:[#allocation45_spill] sm:$0xff] %v10851_v1  ;;  %v10853_v30 = vpop.f32.mrb[21].mxu0  ;;  %v10855_v42 = vpop.f32.mrb[21].mxu1 }
 0x403   : > { %12523 = vst [vmem:[#allocation46_spill] sm:$0xff] %v10855_v42 }
 0x405   : > { %v10857_v10 = vpop.f32.mrb[22].mxu0  ;;  %v10859_v49 = vpop.f32.mrb[22].mxu1 }
 0x406   : > { %12524 = vst [vmem:[#allocation47_spill] sm:$0xff] %v10859_v49  ;;  %v10861_v21 = vpop.f32.mrb[23].mxu0  ;;  %v10863_v34 = vpop.f32.mrb[23].mxu1 }
 0x407   : > { %12525 = vst [vmem:[#allocation48_spill] sm:$0xff] %v10863_v34 }
 0x409   : > { %v10865_v51 = vpop.f32.mrb[24].mxu0  ;;  %v10867_v60 = vpop.f32.mrb[24].mxu1 }
 0x40a   : > { %12526 = vst [vmem:[#allocation49_spill] sm:$0xff] %v10865_v51  ;;  %12527 = vst [vmem:[#allocation50_spill] sm:$0xff] %v10867_v60  ;;  %v10869_v4 = vpop.f32.mrb[25].mxu0  ;;  %v10871_v17 = vpop.f32.mrb[25].mxu1 }
 0x40b   : > { %12528 = vst [vmem:[#allocation51_spill] sm:$0xff] %v10869_v4  ;;  %12529 = vst [vmem:[#allocation52_spill] sm:$0xff] %v10871_v17 }
 0x40d   : > { %v10873_v37 = vpop.f32.mrb[26].mxu0  ;;  %v10875_v22 = vpop.f32.mrb[26].mxu1 }
 0x40e   : > { %12530 = vst [vmem:[#allocation53_spill] sm:$0xff] %v10873_v37  ;;  %12531 = vst [vmem:[#allocation54_spill] sm:$0xff] %v10875_v22  ;;  %v10877_v7 = vpop.f32.mrb[27].mxu0  ;;  %v10879_v52 = vpop.f32.mrb[27].mxu1 }
 0x40f   : > { %12532 = vst [vmem:[#allocation55_spill] sm:$0xff] %v10877_v7  ;;  %12533 = vst [vmem:[#allocation56_spill] sm:$0xff] %v10879_v52 }
 0x411   : > { %v10881_v33 = vpop.f32.mrb[28].mxu0  ;;  %v10883_v38 = vpop.f32.mrb[28].mxu1 }
 0x412   : > { %12534 = vst [vmem:[#allocation57_spill] sm:$0xff] %v10881_v33  ;;  %12535 = vst [vmem:[#allocation58_spill] sm:$0xff] %v10883_v38  ;;  %v10885_v29 = vpop.f32.mrb[29].mxu0  ;;  %v10887_v54 = vpop.f32.mrb[29].mxu1 }
 0x413   : > { %12536 = vst [vmem:[#allocation59_spill] sm:$0xff] %v10885_v29  ;;  %12537 = vst [vmem:[#allocation60_spill] sm:$0xff] %v10887_v54 }
 0x415   : > { %v10889_v42 = vpop.f32.mrb[30].mxu0  ;;  %v10891_v34 = vpop.f32.mrb[30].mxu1 }
 0x416   : > { %12538 = vst [vmem:[#allocation61_spill] sm:$0xff] %v10889_v42  ;;  %12539 = vst [vmem:[#allocation62_spill] sm:$0xff] %v10891_v34  ;;  %v10893_v17 = vpop.f32.mrb[31].mxu0  ;;  %v10895_v13 = vpop.f32.mrb[31].mxu1 }
 0x417   : > { %12540 = vst [vmem:[#allocation63_spill] sm:$0xff] %v10893_v17  ;;  %12541 = vst [vmem:[#allocation64_spill] sm:$0xff] %v10895_v13 }
 0x419   : > { %v10897_v47 = vpop.f32.mrb[32].mxu0  ;;  %v10899_v35 = vpop.f32.mrb[32].mxu1 }
 0x41a   : > { %12542 = vst [vmem:[#allocation65_spill] sm:$0xff] %v10897_v47  ;;  %12543 = vst [vmem:[#allocation66_spill] sm:$0xff] %v10899_v35  ;;  %v10901_v52 = vpop.f32.mrb[33].mxu0  ;;  %v10903_v24 = vpop.f32.mrb[33].mxu1 }
 0x41b   : > { %12544 = vst [vmem:[#allocation67_spill] sm:$0xff] %v10901_v52  ;;  %12545 = vst [vmem:[#allocation68_spill] sm:$0xff] %v10903_v24 }
 0x41d   : > { %v10905_v38 = vpop.f32.mrb[34].mxu0  ;;  %v10907_v60 = vpop.f32.mrb[34].mxu1 }
 0x41e   : > { %12546 = vst [vmem:[#allocation69_spill] sm:$0xff] %v10905_v38  ;;  %12547 = vst [vmem:[#allocation70_spill] sm:$0xff] %v10907_v60  ;;  %v10909_v54 = vpop.f32.mrb[35].mxu0  ;;  %v10911_v22 = vpop.f32.mrb[35].mxu1 }
 0x41f   : > { %12548 = vst [vmem:[#allocation71_spill] sm:$0xff] %v10909_v54  ;;  %12549 = vst [vmem:[#allocation72_spill] sm:$0xff] %v10911_v22 }
 0x421   : > { %v10913_v34 = vpop.f32.mrb[36].mxu0  ;;  %v10915_v27 = vpop.f32.mrb[36].mxu1 }
 0x422   : > { %12550 = vst [vmem:[#allocation73_spill] sm:$0xff] %v10913_v34  ;;  %12551 = vst [vmem:[#allocation74_spill] sm:$0xff] %v10915_v27  ;;  %v10917_v13 = vpop.f32.mrb[37].mxu0  ;;  %v10919_v15 = vpop.f32.mrb[37].mxu1 }
 0x423   : > { %12552 = vst [vmem:[#allocation75_spill] sm:$0xff] %v10917_v13  ;;  %12553 = vst [vmem:[#allocation76_spill] sm:$0xff] %v10919_v15 }
 0x425   : > { %v10921_v35 = vpop.f32.mrb[38].mxu0  ;;  %v10923_v52 = vpop.f32.mrb[38].mxu1 }
 0x426   : > { %12554 = vst [vmem:[#allocation77_spill] sm:$0xff] %v10921_v35  ;;  %12555 = vst [vmem:[#allocation78_spill] sm:$0xff] %v10923_v52  ;;  %v10925_v24 = vpop.f32.mrb[39].mxu0  ;;  %v10927_v29 = vpop.f32.mrb[39].mxu1 }
 0x427   : > { %12556 = vst [vmem:[#allocation79_spill] sm:$0xff] %v10925_v24  ;;  %12557 = vst [vmem:[#allocation80_spill] sm:$0xff] %v10927_v29 }
 0x429   : > { %v10929_v60 = vpop.f32.mrb[40].mxu0  ;;  %v10931_v54 = vpop.f32.mrb[40].mxu1 }
 0x42a   : > { %12558 = vst [vmem:[#allocation81_spill] sm:$0xff] %v10929_v60  ;;  %12559 = vst [vmem:[#allocation82_spill] sm:$0xff] %v10931_v54  ;;  %v10933_v22 = vpop.f32.mrb[41].mxu0  ;;  %v10935_v17 = vpop.f32.mrb[41].mxu1 }
 0x42b   : > { %12560 = vst [vmem:[#allocation83_spill] sm:$0xff] %v10933_v22  ;;  %12561 = vst [vmem:[#allocation84_spill] sm:$0xff] %v10935_v17 }
 0x42d   : > { %v10937_v27 = vpop.f32.mrb[42].mxu0  ;;  %v10939_v13 = vpop.f32.mrb[42].mxu1 }
 0x42e   : > { %12562 = vst [vmem:[#allocation85_spill] sm:$0xff] %v10937_v27  ;;  %12563 = vst [vmem:[#allocation86_spill] sm:$0xff] %v10939_v13  ;;  %v10941_v15 = vpop.f32.mrb[43].mxu0  ;;  %v10943_v4 = vpop.f32.mrb[43].mxu1  ;;  %v2649_v13 = vmul.f32 0.2236068, %v10809_v36 }
 0x42f   : > { %12564 = vst [vmem:[#allocation87_spill] sm:$0xff] %v10941_v15  ;;  %12565 = vst [vmem:[#allocation88_spill] sm:$0xff] %v10943_v4  ;;  %v2650_v4 = vmul.f32 0.2236068, %v10813_v44  ;;  %v2638_v15 = vmul.f32 0.2236068, %v10801_v2 }
 0x430   : > { %v2672_v36 = vmul.f32 0.2236068, %v10829_v14  ;;  %v2660_v44 = vmul.f32 0.2236068, %v10817_v48  ;;  %v2661_v2 = vmul.f32 0.2236068, %v10821_v9 }
 0x431   : > { %v10945_v52 = vpop.f32.mrb[44].mxu0  ;;  %v10947_v24 = vpop.f32.mrb[44].mxu1  ;;  %v2693_v14 = vmul.f32 0.2236068, %v10841_v46  ;;  %v2694_v48 = vmul.f32 0.2236068, %v10845_v63 }
 0x432   : > { %12566 = vst [vmem:[#allocation89_spill] sm:$0xff] %v10945_v52  ;;  %12567 = vst [vmem:[#allocation90_spill] sm:$0xff] %v10947_v24  ;;  %v10949_v29 = vpop.f32.mrb[45].mxu0  ;;  %v10951_v60 = vpop.f32.mrb[45].mxu1  ;;  %v2639_v24 = vmul.f32 0.2236068, %v10805_v6 }
 0x433   : > { %12568 = vst [vmem:[#allocation91_spill] sm:$0xff] %v10949_v29  ;;  %12569 = vst [vmem:[#allocation92_spill] sm:$0xff] %v10951_v60  ;;  %v2682_v9 = vmul.f32 0.2236068, %v10833_v26  ;;  %v2715_v63 = vmul.f32 0.2236068, %v10857_v10 }
 0x434   : > { %v2716_v26 = vmul.f32 0.2236068, %v10861_v21  ;;  %v12582_v21 = vlaneseq }
 0x435   : > { %v10953_v54 = vpop.f32.mrb[46].mxu0  ;;  %v10955_v22 = vpop.f32.mrb[46].mxu1 }
 0x436   : > { %12570 = vst [vmem:[#allocation93_spill] sm:$0xff] %v10953_v54  ;;  %12571 = vst [vmem:[#allocation94_spill] sm:$0xff] %v10955_v22  ;;  %v10957_v17 = vpop.f32.mrb[47].mxu0  ;;  %v10959_v27 = vpop.f32.mrb[47].mxu1 }
 0x437   : > { %12572 = vst [vmem:[#allocation95_spill] sm:$0xff] %v10957_v17  ;;  %12573 = vst [vmem:[#allocation96_spill] sm:$0xff] %v10959_v27  ;;  %v2671_v27 = vmul.f32 0.2236068, %v10825_v61 }
 0x439   : > { %v10965_v52 = vpop.f32.mrb[48].mxu0  ;;  %v7879_v29 = vpop.f32.mrb[48].mxu1 }
 0x43a   : > { %12574 = vst [vmem:[#allocation97_spill] sm:$0xff] %v10965_v52  ;;  %v2920_v60 = vmul.f32 %v7879_v29, %v2649_v13  ;;  %v3033_v7 = vmul.f32 %v7879_v29, %v2650_v4  ;;  %v10967_v54 = vpop.f32.mrb[49].mxu0  ;;  %v2880_v22 = vpop.f32.mrb[49].mxu1 }
 0x43b   : > { %12575 = vst [vmem:[#allocation98_spill] sm:$0xff] %v10967_v54  ;;  %v2919_v34 = vmul.f32 %v2880_v22, %v2638_v15  ;;  %v3032_v17 = vmul.f32 %v2880_v22, %v2639_v24  ;;  %v2683_v24 = vmul.f32 0.2236068, %v10837_v56  ;;  %v2704_v56 = vmul.f32 0.2236068, %v10849_v0 }
 0x43c   : > { %v3145_v0 = vld [vmem:[%s12350_s7] sm:$0x1f] }
 0x43d   : > { %v10973_v1 = vpop.f32.mrb[50].mxu0  ;;  %v7882_v6 = vpop.f32.mrb[50].mxu1  ;;  %7921 = vmatprep.mubr.f32.mxu0 %v2919_v34  ;;  %7965 = vmatprep.mubr.f32.mxu1 %v3032_v17 }
 0x43e   : > { %12576 = vst [vmem:[#allocation99_spill] sm:$0xff] %v10973_v1  ;;  %v2922_v13 = vmul.f32 %v7882_v6, %v2671_v27  ;;  %v3035_v4 = vmul.f32 %v7882_v6, %v2672_v36  ;;  %v10975_v29 = vpop.f32.mrb[51].mxu0  ;;  %v2890_v54 = vpop.f32.mrb[51].mxu1  ;;  %7922 = vmatmul.mubr.f32.vlgmr.msra.gmra.mrb[56].mxu0 %v2920_v60  ;;  %7966 = vmatmul.mubr.f32.vlgmr.msra.gmra.mrb[56].mxu1 %v3033_v7 }
 0x43f   : > { %12577 = vst [vmem:[#allocation100_spill] sm:$0xff] %v10975_v29  ;;  %v2921_v15 = vmul.f32 %v2890_v54, %v2660_v44  ;;  %v3034_v61 = vmul.f32 %v2890_v54, %v2661_v2  ;;  %v2705_v54 = vmul.f32 0.2236068, %v10853_v30  ;;  %7978 = vmatpush3.msk.msra.mxu0 %vm2810_vm13, %v3145_v0  ;;  %v12386_v30 = vmov 0.0|0.0   ;;  %v12586_v29 = vld [vmem:[#allocation16_spill] sm:$0xff] }
 0x440   : > { %8735 = vmatprep.subr.bf16.mxu0 %v12386_v30  ;;  %8747 = vmatprep.subr.bf16.mxu1 %v12386_v30 }
 0x441   : > { %v10981_v22 = vpop.f32.mrb[52].mxu0  ;;  %v7885_v34 = vpop.f32.mrb[52].mxu1  ;;  %7924 = vmatprep.mubr.f32.mxu0 %v2921_v15  ;;  %7968 = vmatprep.mubr.f32.mxu1 %v3034_v61 }
 0x442   : > { %12578 = vst [vmem:[#allocation101_spill] sm:$0xff] %v10981_v22  ;;  %v2924_v27 = vmul.f32 %v7885_v34, %v2693_v14  ;;  %v3037_v17 = vmul.f32 %v7885_v34, %v2694_v48  ;;  %v10983_v36 = vpop.f32.mrb[53].mxu0  ;;  %v2900_v60 = vpop.f32.mrb[53].mxu1  ;;  %7925 = vmatmul.mubr.f32.gmra.mrb[58].mxu0 %v2922_v13  ;;  %7969 = vmatmul.mubr.f32.gmra.mrb[58].mxu1 %v3035_v4  ;;  %v2727_v14 = vshrl.u32 %v12582_v21, 7  ;;  %v12587_v22 = vld [vmem:[#allocation31_spill] sm:$0xff] }
 0x443   : > { %12579 = vst [vmem:[#allocation102_spill] sm:$0xff] %v10983_v36  ;;  %v2923_v7 = vmul.f32 %v2900_v60, %v2682_v9  ;;  %v3036_v46 = vmul.f32 %v2900_v60, %v2683_v24 }
 0x444   : > { %v2728_v60 = vmul.u32 8, %v2727_v14 }
 0x445   : > { %v10989_v44 = vpop.f32.mrb[54].mxu0  ;;  %v7888_v2 = vpop.f32.mrb[54].mxu1  ;;  %7927 = vmatprep.mubr.f32.mxu0 %v2923_v7  ;;  %7971 = vmatprep.mubr.f32.mxu1 %v3036_v46 }
 0x446   : > { %12580 = vst [vmem:[#allocation103_spill] sm:$0xff] %v10989_v44  ;;  %v2926_v6 = vmul.f32 %v7888_v2, %v2715_v63  ;;  %v3039_v15 = vmul.f32 %v7888_v2, %v2716_v26  ;;  %v10991_v61 = vpop.f32.mrb[55].mxu0  ;;  %v2910_v13 = vpop.f32.mrb[55].mxu1  ;;  %7928 = vmatmul.mubr.f32.gmra.mrb[60].mxu0 %v2924_v27  ;;  %7972 = vmatmul.mubr.f32.gmra.mrb[60].mxu1 %v3037_v17  ;;  %v2730_v14 = vadd.s32 8, %v2728_v60 }
 0x447   : > { %12581 = vst [vmem:[#allocation104_spill] sm:$0xff] %v10991_v61  ;;  %v2925_v4 = vmul.f32 %v2910_v13, %v2704_v56  ;;  %v3038_v10 = vmul.f32 %v2910_v13, %v2705_v54  ;;  %vm11041_vm0 = vcmp.ge.s32.totalorder %v9765_v45, %v2728_v60 }
 0x448   : > { %vm2731_vm1 = vcmp.lt.s32.totalorder %v9765_v45, %v2730_v14 }
 0x449   : > { %7930 = vmatprep.mubr.f32.mxu0 %v2925_v4  ;;  %7974 = vmatprep.mubr.f32.mxu1 %v3038_v10  ;;  %vm2732_vm2 = vmand %vm11041_vm0, %vm2731_vm1 }
 0x44a   : > { %7931 = vmatmul.mubr.f32.gmra.mrb[62].mxu0 %v2926_v6  ;;  %7975 = vmatmul.mubr.f32.gmra.mrb[62].mxu1 %v3039_v15  ;;  %v11067_v45 = vsel %vm2732_vm2, 1.0, %v12508_v3 }
 0x44b   : > { %7979 = vmatprep.mubr.msk.f32.mxu0 %vm9393_vm15, %v12508_v3  ;;  %8017 = vmatprep.mubr.msk.f32.mxu1 %vm9393_vm15, %v12508_v3  ;;  %12592 = vst [vmem:[#allocation105_spill] sm:$0xff] %v11067_v45 }
 0x44e   : > { %7980 = vmatmul.mubr.msk.f32.vlgmr.msra.gmra.mrb[64].mxu0 %vm2806_vm14, %v10718_v20 }
 0x44f   : > { %7998 = vmatprep.mubr.msk.f32.mxu0 %vm9393_vm15, %v12508_v3 }
 0x511   : > { %v7923_v48 = vpop.f32.mrb[56].mxu0  ;;  %v7967_v9 = vpop.f32.mrb[56].mxu1 }
 0x512   : > { %v3334_v24 = vmul.f32 %v7967_v9, %v10110_v41  ;;  %v11010_v34 = vmul.f32 %v7967_v9, %v10134_v19  ;;  %v11013_v27 = vmul.f32 %v7967_v9, %v10140_v11  ;;  %v2993_v20 = vpop.f32.mrb[57].mxu0  ;;  %v3106_v17 = vpop.f32.mrb[57].mxu1 }
 0x513   : > { %v8736_v7 = vpack.c.bf16 %v7923_v48, %v2993_v20  ;;  %v3333_v46 = vmul.f32 %v10106_v39, %v3106_v17  ;;  %v11017_v63 = vmul.f32 %v10132_v59, %v3106_v17  ;;  %v11020_v26 = vmul.f32 %v10136_v58, %v3106_v17 }
 0x515   : > { %v8748_v56 = vpack.c.bf16 %v3334_v24, %v3333_v46  ;;  %v7926_v6 = vpop.f32.mrb[58].mxu0  ;;  %v7970_v15 = vpop.f32.mrb[58].mxu1  ;;  %8737 = vmatpush3.bf16.msra.mxu0 %v8736_v7 }
 0x516   : > { %v3336_v13 = vmul.f32 %v7970_v15, %v10116_v57  ;;  %v11028_v4 = vmul.f32 %v7970_v15, %v10144_v5  ;;  %v11031_v10 = vmul.f32 %v7970_v15, %v10148_v32  ;;  %v3003_v0 = vpop.f32.mrb[59].mxu0  ;;  %v3116_v21 = vpop.f32.mrb[59].mxu1  ;;  %8738 = vmatprep.subr.bf16.mxu0 %v12386_v30 }
 0x517   : > { %v8739_v48 = vpack.c.bf16 %v7926_v6, %v3003_v0  ;;  %v3335_v9 = vmul.f32 %v10112_v55, %v3116_v21  ;;  %v3453_v24 = vmul.f32 %v10138_v53, %v3116_v21  ;;  %v3571_v20 = vmul.f32 %v10142_v62, %v3116_v21  ;;  %8749 = vmatpush3.bf16.msra.mxu1 %v8748_v56 }
 0x518   : > { %8750 = vmatprep.subr.bf16.mxu1 %v12386_v30 }
 0x519   : > { %v8751_v17 = vpack.c.bf16 %v3336_v13, %v3335_v9  ;;  %v8763_v7 = vpack.c.bf16 %v11028_v4, %v3453_v24  ;;  %v8775_v46 = vpack.c.bf16 %v11031_v10, %v3571_v20  ;;  %v7929_v15 = vpop.f32.mrb[60].mxu0  ;;  %v7973_v2 = vpop.f32.mrb[60].mxu1  ;;  %8740 = vmatpush3.bf16.msra.mxu0 %v8739_v48  ;;  %v12585_v48 = vld [vmem:[#allocation29_spill] sm:$0xff] }
 0x51a   : > { %v3338_v0 = vmul.f32 %v7973_v2, %v10124_v50  ;;  %v3456_v21 = vmul.f32 %v7973_v2, %v10146_v16  ;;  %v3574_v56 = vmul.f32 %v7973_v2, %v10158_v8  ;;  %v3013_v54 = vpop.f32.mrb[61].mxu0  ;;  %v3126_v13 = vpop.f32.mrb[61].mxu1  ;;  %8741 = vmatprep.subr.bf16.mxu0 %v12386_v30 }
 0x51b   : > { %v8742_v4 = vpack.c.bf16 %v7929_v15, %v3013_v54  ;;  %v3337_v10 = vmul.f32 %v10120_v43, %v3126_v13  ;;  %v3455_v60 = vmul.f32 %v10152_v18, %v3126_v13  ;;  %v3573_v9 = vmul.f32 %v12585_v48, %v3126_v13  ;;  %8752 = vmatpush3.bf16.msra.mxu1 %v8751_v17  ;;  %v12588_v54 = vld [vmem:[#allocation32_spill] sm:$0xff] }
 0x51c   : > { %8753 = vmatprep.subr.bf16.mxu1 %v12386_v30 }
 0x51d   : > { %v8754_v24 = vpack.c.bf16 %v3338_v0, %v3337_v10  ;;  %v8766_v20 = vpack.c.bf16 %v3456_v21, %v3455_v60  ;;  %v8778_v61 = vpack.c.bf16 %v3574_v56, %v3573_v9  ;;  %v7932_v2 = vpop.f32.mrb[62].mxu0  ;;  %v7976_v36 = vpop.f32.mrb[62].mxu1  ;;  %8743 = vmatpush3.bf16.msra.mxu0 %v8742_v4  ;;  %v12589_v0 = vld [vmem:[#allocation15_spill] sm:$0xff]  ;;  %v12590_v56 = vld [vmem:[#allocation26_spill] sm:$0xff]  ;;  %v12591_v4 = vld [vmem:[#allocation28_spill] sm:$0xff] }
 0x51e   : > { %v3340_v44 = vmul.f32 %v7976_v36, %v12586_v29  ;;  %v3458_v1 = vmul.f32 %v7976_v36, %v12587_v22  ;;  %v3576_v15 = vmul.f32 %v7976_v36, %v12588_v54  ;;  %v3023_v52 = vpop.f32.mrb[63].mxu0  ;;  %v3136_v35 = vpop.f32.mrb[63].mxu1  ;;  %8744 = vmatprep.subr.bf16.mxu0 %v12386_v30 }
 0x51f   : > { %v8745_v17 = vpack.c.bf16 %v7932_v2, %v3023_v52  ;;  %v3339_v21 = vmul.f32 %v12589_v0, %v3136_v35  ;;  %v3457_v13 = vmul.f32 %v12590_v56, %v3136_v35  ;;  %v3575_v10 = vmul.f32 %v12591_v4, %v3136_v35  ;;  %8755 = vmatpush3.bf16.msra.mxu1 %v8754_v24  ;;  %v11095_v52 = vpop.permute.xlu1 %3785 }
 0x520   : > { %8756 = vmatprep.subr.bf16.mxu1 %v12386_v30  ;;  %v12593_v35 = vpack.c.bf16 %v11010_v34, %v11017_v63  ;;  %12595 = vst [vmem:[#allocation106_spill] sm:$0xff] %v11095_v52  ;;  %v2752_v63 = vld [vmem:[%s12356_s13 + $0x8] sm:$0x3] }
 0x521   : > { %v8757_v36 = vpack.c.bf16 %v3340_v44, %v3339_v21  ;;  %v8769_v60 = vpack.c.bf16 %v3458_v1, %v3457_v13  ;;  %v8781_v9 = vpack.c.bf16 %v3576_v15, %v3575_v10  ;;  %8746 = vmatpush3.bf16.msra.mxu0 %v8745_v17  ;;  %v12594_v1 = vpack.c.bf16 %v11013_v27, %v11020_v26  ;;  %v2789_v26 = vld [vmem:[%s12359_s16 + $0x80] sm:$0xff] }
 0x522   : > { %8759 = vmatprep.subr.bf16.mxu0 %v12386_v30 }
 0x523   : > { %8758 = vmatpush3.bf16.msra.mxu1 %v8757_v36  ;;  %v11097_v44 = vpop.permute.xlu1 %3841 }
 0x524   : > { %7999 = vmatmul.mubr.msk.f32.vlgmr.msra.gmra.mrb[64].mxu0 %vm3219_vm3, %v11067_v45  ;;  %8771 = vmatprep.subr.bf16.mxu1 %v12386_v30  ;;  %12596 = vst [vmem:[#allocation107_spill] sm:$0xff] %v11097_v44 }
 0x525   : > { %8761 = vmatpush3.bf16.msra.mxu0 %v12593_v35  ;;  %8036 = vmatprep.mubr.msk.f32.mxu0 %vm9393_vm15, %v12508_v3 }
 0x526   : > { %8018 = vmatmul.mubr.msk.f32.vlgmr.msra.gmra.mrb[64].mxu1 %vm3219_vm3, %v11067_v45  ;;  %8762 = vmatprep.subr.bf16.mxu0 %v12386_v30 }
 0x527   : > { %8773 = vmatpush3.bf16.msra.mxu1 %v12594_v1  ;;  %8055 = vmatprep.mubr.msk.f32.mxu1 %vm9393_vm15, %v12508_v3  ;;  %v11099_v34 = vpop.permute.xlu1 %3790 }
 0x528   : > { %8774 = vmatprep.subr.bf16.mxu1 %v12386_v30  ;;  %12597 = vst [vmem:[#allocation108_spill] sm:$0xff] %v11099_v34 }
 0x529   : > { %8764 = vmatpush3.bf16.msra.mxu0 %v8763_v7 }
 0x52a   : > { %8765 = vmatprep.subr.bf16.mxu0 %v12386_v30 }
 0x52b   : > { %8776 = vmatpush3.bf16.msra.mxu1 %v8775_v46  ;;  %v11101_v27 = vpop.permute.xlu1 %3846 }
 0x52c   : > { %8777 = vmatprep.subr.bf16.mxu1 %v12386_v30  ;;  %12598 = vst [vmem:[#allocation109_spill] sm:$0xff] %v11101_v27 }
 0x52d   : > { %8767 = vmatpush3.bf16.msra.mxu0 %v8766_v20 }
 0x52e   : > { %8768 = vmatprep.subr.bf16.mxu0 %v12386_v30 }
 0x52f   : > { %8779 = vmatpush3.bf16.msra.mxu1 %v8778_v61  ;;  %v2751_v61 = vld [vmem:[%s12356_s13] sm:$0xff]  ;;  %v11114_v14 = vpop.permute.xlu1 %3851 }
 0x530   : > { %8780 = vmatprep.subr.bf16.mxu1 %v12386_v30  ;;  %12601 = vst [vmem:[#allocation110_spill] sm:$0xff] %v11114_v14  ;;  %v11116_v7 = vpack.c.bf16 %v2752_v63, %v2751_v61 }
 0x531   : > { %8770 = vmatpush3.bf16.msra.mxu0 %v8769_v60 }
 0x532   : > { %8785 = vmatprep.subr.msk.bf16.mxu0 %vm11110_vm5, %v11116_v7 }
 0x533   : > { %8782 = vmatpush3.bf16.msra.mxu1 %v8781_v9  ;;  %v11136_v46 = vpop.permute.xlu1 %3800 }
 0x534   : > { %8037 = vmatmul.mubr.msk.f32.vlgmr.msra.gmra.mrb[66].mxu0 %vm3219_vm3, %v11067_v45  ;;  %8791 = vmatprep.subr.msk.bf16.mxu1 %vm11110_vm5, %v11116_v7 }
 0x535   : > { %8788 = vmatpush3.bf16.msk.msra.mxu0 %vm11110_vm5, %v11116_v7 }
 0x536   : > { %8056 = vmatmul.mubr.msk.f32.vlgmr.msra.gmra.mrb[66].mxu1 %vm3219_vm3, %v11067_v45  ;;  %8797 = vmatprep.subr.msk.bf16.mxu0 %vm11110_vm5, %v11116_v7 }
 0x537   : > { %8794 = vmatpush3.bf16.msk.msra.mxu1 %vm11110_vm5, %v11116_v7  ;;  %v11138_v6 = vpop.permute.xlu1 %3856 }
 0x538   : > { %8803 = vmatprep.subr.msk.bf16.mxu1 %vm11110_vm5, %v11116_v7  ;;  %12602 = vst [vmem:[#allocation111_spill] sm:$0xff] %v11138_v6 }
 0x53b   : > { %v11140_v24 = vpop.permute.xlu1 %3861 }
 0x53c   : > { %12603 = vst [vmem:[#allocation112_spill] sm:$0xff] %v11140_v24 }
 0x53f   : > { %v11142_v20 = vpop.permute.xlu1 %3810 }
 0x543   : > { %v11144_v2 = vpop.permute.xlu1 %3866 }
 0x544   : > { %12604 = vst [vmem:[#allocation113_spill] sm:$0xff] %v11144_v2 }
 0x547   : > { %v11146_v15 = vpop.permute.xlu1 %3871 }
 0x548   : > { %12605 = vst [vmem:[#allocation114_spill] sm:$0xff] %v11146_v15  ;;  %v2756_v15 = vld [vmem:[%s12357_s14 + $0x18] sm:$0xff] }
 0x54b   : > { %v11148_v17 = vpop.permute.xlu1 %3956 }
 0x54f   : > { %v11150_v21 = vpop.permute.xlu1 %4036 }
 0x550   : > { %12606 = vst [vmem:[#allocation115_spill] sm:$0xff] %v11150_v21 }
 0x553   : > { %v11153_v35 = vpop.permute.xlu1 %4041 }
 0x554   : > { %12607 = vst [vmem:[#allocation116_spill] sm:$0xff] %v11153_v35 }
 0x557   : > { %v11155_v45 = vpop.permute.xlu1 %3966 }
 0x55b   : > { %v11157_v40 = vpop.permute.xlu1 %4046 }
 0x55c   : > { %12608 = vst [vmem:[#allocation117_spill] sm:$0xff] %v11157_v40 }
 0x5f7   : > { %v3289_v13 = vpop.f32.mrb[64].mxu0 }
 0x5f8   : > { %v3648_v10 = vsel %vm3647_vm6, %v3289_v13, 0.0  ;;  %v8000_v36 = vpop.f32.mrb[65].mxu0 }
 0x5f9   : > { %v3649_v60 = vrot.slane %v3648_v10, 4  ;;  %v3407_v9 = vpop.f32.mrb[64].mxu1 }
 0x5fa   : > { %v8019_v1 = vpop.f32.mrb[65].mxu1  ;;  %v3670_v33 = vmul.f32 %v3407_v9, %v3407_v9 }
 0x5fb   : > { %v3650_v61 = vadd.f32 %v3649_v60, %v3648_v10  ;;  %v11160_v60 = vpop.permute.xlu1 %4051 }
 0x5fc   : > { %12609 = vst [vmem:[#allocation118_spill] sm:$0xff] %v11160_v60 }
 0x5fd   : > { %v3651_v63 = vrot.slane %v3650_v61, 2 }
 0x5ff   : > { %v3652_v30 = vadd.f32 %v3651_v63, %v3650_v61 }
 0x601   : > { %v3653_v3 = vrot.slane %v3652_v30, 1 }
 0x603   : > { %v3654_v49 = vadd.f32 %v3653_v3, %v3652_v30  ;;  %v11162_v3 = vpop.permute.xlu0 %3780 }
 0x605   : > { %v3656_v47 = vmul.f32 0.125, %v3654_v49 }
 0x607   : > { %v3657_v38 = vsub.f32 %v3289_v13, %v3656_v47  ;;  %v3525_v12 = vpop.f32.mrb[66].mxu0 }
 0x608   : > { %v3671_v25 = vmul.f32 %v3525_v12, %v3525_v12  ;;  %v8038_v36 = vpop.f32.mrb[67].mxu0 }
 0x609   : > { %v3658_v42 = vmul.f32 %v3657_v38, %v3657_v38  ;;  %v3643_v28 = vpop.f32.mrb[66].mxu1  ;;  %v11165_v36 = vpop.permute.xlu1 %3976 }
 0x60a   : > { %v3672_v51 = vadd.f32 %v3671_v25, %v3670_v33  ;;  %v3673_v31 = vmul.f32 %v3643_v28, %v3643_v28  ;;  %v8057_v1 = vpop.f32.mrb[67].mxu1  ;;  %v11167_v25 = vpop.permute.xlu0 %3836 }
 0x60b   : > { %v3659_v10 = vsel %vm3647_vm6, %v3658_v42, 0.0  ;;  %12610 = vst [vmem:[#allocation119_spill] sm:$0xff] %v11167_v25 }
 0x60c   : > { %v3660_v61 = vrot.slane %v3659_v10, 4  ;;  %v3674_v63 = vadd.f32 %v3673_v31, %v3672_v51 }
 0x60d   : > { %v11169_v40 = vpop.permute.xlu1 %3732 }
 0x60e   : > { %v3661_v49 = vadd.f32 %v3660_v61, %v3659_v10  ;;  %v3675_v47 = vsel %vm3647_vm6, %v3674_v63, 0.0  ;;  %v11171_v35 = vpop.permute.xlu0 %3795 }
 0x60f   : > { %v3676_v30 = vrot.slane %v3675_v47, 4  ;;  %12611 = vst [vmem:[#allocation120_spill] sm:$0xff] %v11171_v35 }
 0x610   : > { %v3662_v13 = vrot.slane %v3661_v49, 2 }
 0x611   : > { %v3677_v37 = vadd.f32 %v3676_v30, %v3675_v47  ;;  %v11173_v21 = vpop.permute.xlu1 %3737 }
 0x612   : > { %v3663_v23 = vadd.f32 %v3662_v13, %v3661_v49  ;;  %v11175_v49 = vpop.permute.xlu0 %3805 }
 0x613   : > { %v3678_v33 = vrot.slane %v3677_v37, 2 }
 0x614   : > { %v3664_v1 = vrot.slane %v3663_v23, 1 }
 0x615   : > { %v3679_v42 = vadd.f32 %v3678_v33, %v3677_v37  ;;  %v11177_v13 = vpop.permute.xlu1 %4056 }
 0x616   : > { %v3665_v60 = vadd.f32 %v3664_v1, %v3663_v23  ;;  %12612 = vst [vmem:[#allocation121_spill] sm:$0xff] %v11177_v13  ;;  %v11179_v37 = vpop.permute.xlu0 %3815  ;;  %v2755_v13 = vld [vmem:[%s12357_s14 + $0x10] sm:$0xff] }
 0x617   : > { %v3680_v31 = vrot.slane %v3679_v42, 1  ;;  %v11279_v14 = vpack.c.bf16 %v2756_v15, %v2755_v13 }
 0x618   : > { %v3666_v51 = vmul.f32 0.125, %v3665_v60 }
 0x619   : > { %v3681_v10 = vadd.f32 %v3680_v31, %v3679_v42  ;;  %v11183_v60 = vpop.permute.xlu1 %4061 }
 0x61a   : > { %v3667_v61 = vadd.f32 1e-05, %v3666_v51  ;;  %12614 = vst [vmem:[#allocation123_spill] sm:$0xff] %v11183_v60  ;;  %v11189_v42 = vpop.permute.xlu0 %3961  ;;  %v2754_v60 = vld [vmem:[%s12357_s14 + $0x8] sm:$0xff] }
 0x61b   : > { %v3682_v63 = vmul.f32 0.125, %v3681_v10 }
 0x61c   : > { %9301 = vrsqrt.f32 %v3667_v61 }
 0x61d   : > { %v3684_v47 = vmul.f32 0.33333334, %v3682_v63  ;;  %v11205_v10 = vpop.permute.xlu1 %3986 }
 0x61e   : > { %v11211_v61 = vpop.permute.xlu0 %3971 }
 0x61f   : > { %v3685_v30 = vadd.f32 1e-05, %v3684_v47 }
 0x621   : > { %9303 = vrsqrt.f32 %v3685_v30 }
 0x626   : > { %v9302_v23 = vpop.eup %9301 }
 0x627   : > { %v11181_v33 = vmul.f32 %v9302_v23, %v3657_v38 }
 0x629   : > { %12613 = vst [vmem:[#allocation122_spill] sm:$0xff] %v11181_v33  ;;  %8062 = vmatprep.mubr.msk.f32.mxu0 %vm3647_vm6, %v11181_v33 }
 0x62a   : > { %8063 = vmatmul.mubr.msk.f32.vlgmr.msra.gmra.mrb[68].mxu0 %vm3647_vm6, %v11181_v33 }
 0x62b   : > { %v9304_v1 = vpop.eup %9303  ;;  %8065 = vmatprep.mubr.msk.f32.mxu0 %vm3647_vm6, %v11181_v33  ;;  %8800 = vmatpush3.bf16.msk.msra.mxu0 %vm11110_vm5, %v11116_v7 }
 0x62c   : > { %v11196_v38 = vmul.f32 %v9304_v1, %v3407_v9  ;;  %v11198_v31 = vmul.f32 %v9304_v1, %v3525_v12  ;;  %v11200_v51 = vmul.f32 %v9304_v1, %v3643_v28  ;;  %8809 = vmatprep.subr.msk.bf16.mxu0 %vm11110_vm5, %v11116_v7  ;;  %v11217_v28 = vpop.permute.xlu1 %3747  ;;  %v11221_v12 = vpop.permute.xlu0 %3981 }
 0x62d   : > { %12618 = vst [vmem:[#allocation127_spill] sm:$0xff] %v11217_v28 }
 0x62e   : > { %12615 = vst [vmem:[#allocation124_spill] sm:$0xff] %v11196_v38  ;;  %12616 = vst [vmem:[#allocation125_spill] sm:$0xff] %v11198_v31  ;;  %8066 = vmatmul.mubr.msk.f32.gmra.mrb[70].mxu0 %vm3647_vm6, %v11181_v33  ;;  %v3690_v24 = vmul.f32 %v11196_v38, %v10106_v39  ;;  %v3693_v27 = vmul.f32 %v11196_v38, %v10116_v57  ;;  %v3694_v39 = vmul.f32 %v11196_v38, %v10120_v43 }
 0x62f   : > { %12617 = vst [vmem:[#allocation126_spill] sm:$0xff] %v11200_v51  ;;  %8068 = vmatprep.mubr.msk.f32.mxu0 %vm3647_vm6, %v11181_v33  ;;  %v11294_v15 = vmul.f32 %v11196_v38, %v10124_v50  ;;  %v11298_v13 = vmul.f32 %v11196_v38, %v12589_v0  ;;  %v11306_v43 = vmul.f32 %v11196_v38, %v12586_v29 }
 0x630   : > { %v11225_v9 = vpop.permute.xlu1 %3757  ;;  %v11229_v63 = vpop.permute.xlu0 %3742  ;;  %v3700_v50 = vmul.f32 %v11198_v31, %v10138_v53  ;;  %v3701_v0 = vmul.f32 %v11198_v31, %v10144_v5  ;;  %v3703_v29 = vmul.f32 %v11198_v31, %v10146_v16  ;;  %v3714_v53 = vmul.f32 %v11200_v51, %v10136_v58 }
 0x631   : > { %12619 = vst [vmem:[#allocation128_spill] sm:$0xff] %v11225_v9  ;;  %12620 = vst [vmem:[#allocation129_spill] sm:$0xff] %v11229_v63  ;;  %v3692_v9 = vmul.f32 %v11196_v38, %v10112_v55  ;;  %v3698_v55 = vmul.f32 %v11198_v31, %v10132_v59  ;;  %v11324_v59 = vmul.f32 %v11198_v31, %v12587_v22 }
 0x632   : > { %8069 = vmatmul.mubr.msk.f32.gmra.mrb[72].mxu0 %vm3647_vm6, %v11181_v33  ;;  %v3891_v5 = vmul.f32 %v11095_v52, %v11196_v38  ;;  %v3715_v16 = vmul.f32 %v11200_v51, %v10140_v11  ;;  %v3716_v25 = vmul.f32 %v11200_v51, %v10142_v62  ;;  %v3717_v58 = vmul.f32 %v11200_v51, %v10148_v32 }
 0x633   : > { %8071 = vmatprep.mubr.msk.f32.mxu0 %vm3647_vm6, %v11181_v33 }
 0x634   : > { %v11241_v47 = vpop.permute.xlu0 %3752  ;;  %v11245_v30 = vpop.permute.xlu1 %3767 }
 0x635   : > { %12621 = vst [vmem:[#allocation130_spill] sm:$0xff] %v11241_v47  ;;  %12622 = vst [vmem:[#allocation131_spill] sm:$0xff] %v11245_v30  ;;  %v3691_v30 = vmul.f32 %v11196_v38, %v10110_v41  ;;  %v3699_v41 = vmul.f32 %v11198_v31, %v10134_v19  ;;  %v3704_v19 = vmul.f32 %v11198_v31, %v12590_v56 }
 0x636   : > { %8072 = vmatmul.mubr.msk.f32.gmra.mrb[74].mxu0 %vm3647_vm6, %v11181_v33  ;;  %v2753_v33 = vld [vmem:[%s12357_s14] sm:$0xff]  ;;  %v3892_v56 = vmul.f32 %v11099_v34, %v11196_v38 }
 0x637   : > { %8094 = vmatprep.mubr.msk.f32.mxu0 %vm3647_vm6, %v11196_v38  ;;  %v11277_v6 = vpack.c.bf16 %v2754_v60, %v2753_v33  ;;  %v3890_v33 = vmul.f32 %v11162_v3, %v11196_v38  ;;  %v3707_v44 = vadd.f32 %v3699_v41, %v3691_v30  ;;  %v3719_v41 = vmul.f32 %v11200_v51, %v10158_v8 }
 0x638   : > { %v11249_v23 = vpop.permute.xlu0 %3762  ;;  %v3906_v1 = vpop.permute.xlu1 %3905  ;;  %v3893_v30 = vmul.f32 %v11171_v35, %v11196_v38 }
 0x639   : > { %12623 = vst [vmem:[#allocation132_spill] sm:$0xff] %v11249_v23  ;;  %v3723_v32 = vadd.f32 %v3715_v16, %v3707_v44 }
 0x63a   : > { %8095 = vmatmul.mubr.msk.f32.vlgmr.msra.gmra.mrb[76].mxu0 %vm3647_vm6, %v11196_v38 }
 0x63b   : > { %8097 = vmatprep.mubr.msk.f32.mxu0 %vm3647_vm6, %v11196_v38  ;;  %8812 = vmatpush3.bf16.msk.msra.mxu0 %vm11110_vm5, %v11116_v7 }
 0x63c   : > { %8821 = vmatprep.subr.msk.bf16.mxu0 %vm11110_vm5, %v11116_v7  ;;  %v3901_v2 = vpop.permute.xlu0 %3900  ;;  %v3911_v23 = vpop.permute.xlu1 %3910 }
 0x63d   : > { %v3938_v60 = vmul.f32 %v3901_v2, %v11198_v31  ;;  %v3702_v2 = vmul.f32 %v11198_v31, %v10152_v18  ;;  %v3939_v18 = vmul.f32 %v3906_v1, %v11198_v31  ;;  %v3940_v22 = vmul.f32 %v3911_v23, %v11198_v31 }
 0x63e   : > { %8098 = vmatmul.mubr.msk.f32.gmra.mrb[78].mxu0 %vm3647_vm6, %v11196_v38  ;;  %v3718_v1 = vmul.f32 %v11200_v51, %v12585_v48  ;;  %v3994_v23 = vmul.f32 %v11148_v17, %v11200_v51  ;;  %v3894_v48 = vmul.f32 %v11136_v46, %v11196_v38 }
 0x63f   : > { %8100 = vmatprep.mubr.msk.f32.mxu0 %vm3647_vm6, %v11196_v38  ;;  %v3946_v47 = vadd.f32 %v3938_v60, %v3890_v33  ;;  %v3708_v33 = vadd.f32 %v3700_v50, %v3692_v9  ;;  %v3706_v60 = vadd.f32 %v3698_v55, %v3690_v24  ;;  %v3947_v8 = vadd.f32 %v3939_v18, %v3891_v5 }
 0x640   : > { %v3916_v57 = vpop.permute.xlu0 %3915  ;;  %v3921_v28 = vpop.permute.xlu1 %3920  ;;  %v3948_v63 = vadd.f32 %v3940_v22, %v3892_v56  ;;  %v3895_v50 = vmul.f32 %v11175_v49, %v11196_v38  ;;  %v3896_v55 = vmul.f32 %v11142_v20, %v11196_v38  ;;  %v3995_v24 = vmul.f32 %v11189_v42, %v11200_v51 }
 0x641   : > { %v3941_v62 = vmul.f32 %v3916_v57, %v11198_v31  ;;  %v3942_v34 = vmul.f32 %v3921_v28, %v11198_v31  ;;  %v4002_v35 = vadd.f32 %v3994_v23, %v3946_v47  ;;  %v3722_v52 = vadd.f32 %v3714_v53, %v3706_v60 }
 0x642   : > { %8101 = vmatmul.mubr.msk.f32.gmra.mrb[80].mxu0 %vm3647_vm6, %v11196_v38  ;;  %v3709_v9 = vadd.f32 %v3701_v0, %v3693_v27  ;;  %v3996_v57 = vmul.f32 %v11155_v45, %v11200_v51  ;;  %v3724_v5 = vadd.f32 %v3716_v25, %v3708_v33  ;;  %v3710_v53 = vadd.f32 %v3702_v2, %v3694_v39  ;;  %v2759_v33 = vld [vmem:[%s12357_s14 + $0x30] sm:$0xff] }
 0x643   : > { %8103 = vmatprep.mubr.msk.f32.mxu0 %vm3647_vm6, %v11196_v38  ;;  %8078 = vmatprep.mubr.msk.f32.mxu1 %vm3647_vm6, %v3722_v52  ;;  %v3897_v18 = vmul.f32 %v11179_v37, %v11196_v38  ;;  %v3949_v56 = vadd.f32 %v3941_v62, %v3893_v30  ;;  %v4003_v0 = vadd.f32 %v3995_v24, %v3947_v8 }
 0x644   : > { %v3926_v11 = vpop.permute.xlu0 %3925  ;;  %v3931_v16 = vpop.permute.xlu1 %3930  ;;  %8079 = vmatmul.mubr.msk.f32.vlgmr.msra.gmra.mrb[68].mxu1 %vm3647_vm6, %v3723_v32  ;;  %v3950_v27 = vadd.f32 %v3942_v34, %v3894_v48  ;;  %v4004_v28 = vadd.f32 %v3996_v57, %v3948_v63  ;;  %v3997_v39 = vmul.f32 %v11211_v61, %v11200_v51  ;;  %v3711_v52 = vadd.f32 %v3703_v29, %v11294_v15  ;;  %v2757_v29 = vld [vmem:[%s12357_s14 + $0x20] sm:$0xff] }
 0x645   : > { %v3943_v22 = vmul.f32 %v3926_v11, %v11198_v31  ;;  %v3944_v44 = vmul.f32 %v3931_v16, %v11198_v31  ;;  %8081 = vmatprep.mubr.msk.f32.mxu1 %vm3647_vm6, %v3724_v5  ;;  %8806 = vmatpush3.bf16.msk.msra.mxu1 %vm11110_vm5, %v11116_v7  ;;  %v3725_v11 = vadd.f32 %v3717_v58, %v3709_v9  ;;  %v2758_v58 = vld [vmem:[%s12357_s14 + $0x28] sm:$0xff]  ;;  %v2761_v5 = vld [vmem:[%s12357_s14 + $0x40] sm:$0xff] }
 0x646   : > { %8104 = vmatmul.mubr.msk.f32.gmra.mrb[82].mxu0 %vm3647_vm6, %v11196_v38  ;;  %8815 = vmatprep.subr.msk.bf16.mxu1 %vm11110_vm5, %v11116_v7  ;;  %v3998_v32 = vmul.f32 %v11165_v36, %v11200_v51  ;;  %v3712_v8 = vadd.f32 %v3704_v19, %v11298_v13  ;;  %v3726_v48 = vadd.f32 %v3718_v1, %v3710_v53  ;;  %v2762_v53 = vld [vmem:[%s12357_s14 + $0x48] sm:$0xff] }
 0x647   : > { %8126 = vmatprep.mubr.msk.f32.mxu0 %vm3647_vm6, %v11200_v51  ;;  %v4005_v25 = vadd.f32 %v3997_v39, %v3949_v56  ;;  %v3720_v19 = vmul.f32 %v11200_v51, %v12591_v4  ;;  %v3952_v63 = vadd.f32 %v3944_v44, %v3896_v55  ;;  %v3999_v15 = vmul.f32 %v11221_v12, %v11200_v51  ;;  %v2764_v56 = vld [vmem:[%s12357_s14 + $0x58] sm:$0xff]  ;;  %v2766_v39 = vld [vmem:[%s12357_s14 + $0x68] sm:$0xff] }
 0x648   : > { %v3936_v62 = vpop.permute.xlu0 %3935  ;;  %8082 = vmatmul.mubr.msk.f32.gmra.mrb[70].mxu1 %vm3647_vm6, %v3725_v11  ;;  %v4006_v47 = vadd.f32 %v3998_v32, %v3950_v27  ;;  %v3727_v13 = vadd.f32 %v3719_v41, %v3711_v52  ;;  %v3713_v2 = vadd.f32 %v11324_v59, %v11306_v43  ;;  %v11408_v1 = vpack.c.bf16 %v2758_v58, %v2757_v29  ;;  %v2760_v41 = vld [vmem:[%s12357_s14 + $0x38] sm:$0xff] }
 0x649   : > { %v3945_v34 = vmul.f32 %v3936_v62, %v11198_v31  ;;  %8084 = vmatprep.mubr.msk.f32.mxu1 %vm3647_vm6, %v3726_v48  ;;  %v4000_v30 = vmul.f32 %v11205_v10, %v11200_v51  ;;  %v3728_v23 = vadd.f32 %v3720_v19, %v3712_v8  ;;  %v3721_v43 = vmul.f32 %v11200_v51, %v12588_v54  ;;  %v12625_v62 = vld [vmem:[#allocation129_spill] sm:$0xff]  ;;  %v12626_v8 = vld [vmem:[#allocation108_spill] sm:$0xff] }
 0x64a   : > { %8127 = vmatmul.mubr.msk.f32.vlgmr.msra.gmra.mrb[84].mxu0 %vm3647_vm6, %v11200_v51  ;;  %v11430_v57 = vpack.c.bf16 %v2760_v41, %v2759_v33  ;;  %v3770_v44 = vmul.f32 %v11169_v40, %v11196_v38  ;;  %v3818_v27 = vmul.f32 %v11162_v3, %v11198_v31  ;;  %v3771_v40 = vmul.f32 %v11173_v21, %v11196_v38  ;;  %v12624_v3 = vld [vmem:[#allocation106_spill] sm:$0xff]  ;;  %v12627_v21 = vld [vmem:[#allocation119_spill] sm:$0xff]  ;;  %v12632_v41 = vld [vmem:[#allocation109_spill] sm:$0xff] }
 0x64b   : > { %8129 = vmatprep.mubr.msk.f32.mxu0 %vm3647_vm6, %v11200_v51  ;;  %8824 = vmatpush3.bf16.msk.msra.mxu0 %vm11110_vm5, %v11116_v7  ;;  %v3953_v59 = vadd.f32 %v3945_v34, %v3897_v18  ;;  %v4008_v55 = vadd.f32 %v4000_v30, %v3952_v63  ;;  %v3729_v9 = vadd.f32 %v3721_v43, %v3713_v2  ;;  %v12628_v34 = vld [vmem:[#allocation127_spill] sm:$0xff] }
 0x64c   : > { %8832 = vmatprep.subr.bf16.mxu0 %v11277_v6  ;;  %8085 = vmatmul.mubr.msk.f32.gmra.mrb[72].mxu1 %vm3647_vm6, %v3727_v13  ;;  %v11445_v18 = vpack.c.bf16 %v2762_v53, %v2761_v5  ;;  %v3819_v52 = vmul.f32 %v12624_v3, %v11198_v31  ;;  %v3772_v32 = vmul.f32 %v12625_v62, %v11196_v38 }
 0x64d   : > { %8087 = vmatprep.mubr.msk.f32.mxu1 %vm3647_vm6, %v3728_v23  ;;  %v3820_v48 = vmul.f32 %v12626_v8, %v11198_v31  ;;  %v3826_v29 = vadd.f32 %v3818_v27, %v3770_v44  ;;  %v3874_v58 = vmul.f32 %v12627_v21, %v11200_v51  ;;  %v3822_v13 = vmul.f32 %v11136_v46, %v11198_v31  ;;  %v12631_v23 = vld [vmem:[#allocation107_spill] sm:$0xff] }
 0x64e   : > { %8130 = vmatmul.mubr.msk.f32.gmra.mrb[86].mxu0 %vm3647_vm6, %v11200_v51  ;;  %v3827_v63 = vadd.f32 %v3819_v52, %v3771_v40  ;;  %v3875_v33 = vmul.f32 %v12631_v23, %v11200_v51  ;;  %v3876_v43 = vmul.f32 %v12632_v41, %v11200_v51  ;;  %v3823_v46 = vmul.f32 %v11175_v49, %v11198_v31  ;;  %v12636_v27 = vld [vmem:[#allocation111_spill] sm:$0xff] }
 0x64f   : > { %8132 = vmatprep.mubr.msk.f32.mxu0 %vm3647_vm6, %v11200_v51  ;;  %v3828_v2 = vadd.f32 %v3820_v48, %v3772_v32  ;;  %v3882_v30 = vadd.f32 %v3874_v58, %v3826_v29  ;;  %v3824_v53 = vmul.f32 %v11142_v20, %v11198_v31  ;;  %v12637_v49 = vld [vmem:[#allocation131_spill] sm:$0xff]  ;;  %v3825_v20 = vmul.f32 %v11179_v37, %v11198_v31  ;;  %v12639_v29 = vld [vmem:[#allocation113_spill] sm:$0xff] }
 0x650   : > { %8088 = vmatmul.mubr.msk.f32.gmra.mrb[74].mxu1 %vm3647_vm6, %v3729_v9  ;;  %v12634_v9 = vld [vmem:[#allocation132_spill] sm:$0xff]  ;;  %v4010_v52 = vmul.f32 %v12627_v21, %v11196_v38  ;;  %v4018_v62 = vmul.f32 %v11148_v17, %v11198_v31  ;;  %v3880_v37 = vmul.f32 %v12639_v29, %v11200_v51  ;;  %v4011_v58 = vmul.f32 %v12631_v23, %v11196_v38 }
 0x651   : > { %8110 = vmatprep.mubr.msk.f32.mxu1 %vm3647_vm6, %v11198_v31  ;;  %v3776_v5 = vmul.f32 %v12634_v9, %v11196_v38  ;;  %v4019_v21 = vmul.f32 %v11189_v42, %v11198_v31  ;;  %v12640_v42 = vld [vmem:[#allocation114_spill] sm:$0xff] }
 0x652   : > { %8133 = vmatmul.mubr.msk.f32.gmra.mrb[88].mxu0 %vm3647_vm6, %v11200_v51 }
 0x653   : > { %8135 = vmatprep.mubr.msk.f32.mxu0 %vm3647_vm6, %v11200_v51  ;;  %v3832_v32 = vadd.f32 %v3824_v53, %v3776_v5 }
 0x654   : > { %8111 = vmatmul.mubr.msk.f32.vlgmr.msra.gmra.mrb[76].mxu1 %vm3647_vm6, %v11198_v31 }
 0x655   : > { %8113 = vmatprep.mubr.msk.f32.mxu1 %vm3647_vm6, %v11198_v31  ;;  %8818 = vmatpush3.bf16.msk.msra.mxu1 %vm11110_vm5, %v11116_v7 }
 0x656   : > { %8136 = vmatmul.mubr.msk.f32.gmra.mrb[90].mxu0 %vm3647_vm6, %v11200_v51  ;;  %8827 = vmatprep.subr.msk.bf16.mxu1 %vm11110_vm5, %v11116_v7 }
 0x657   : > { %8158 = vmatprep.mubr.msk.f32.mxu0 %vm3647_vm6, %v4002_v35  ;;  %v3951_v35 = vadd.f32 %v3943_v22, %v3895_v50  ;;  %v11424_v50 = vpop.permute.xlu0 %3991  ;;  %v2763_v22 = vld [vmem:[%s12357_s14 + $0x50] sm:$0xff] }
 0x658   : > { %v4001_v24 = vmul.f32 %v11424_v50, %v11200_v51  ;;  %8114 = vmatmul.mubr.msk.f32.gmra.mrb[78].mxu1 %vm3647_vm6, %v11198_v31 }
 0x659   : > { %v4007_v60 = vadd.f32 %v3999_v15, %v3951_v35  ;;  %8116 = vmatprep.mubr.msk.f32.mxu1 %vm3647_vm6, %v11198_v31  ;;  %v3773_v35 = vmul.f32 %v12628_v34, %v11196_v38 }
 0x65a   : > { %8159 = vmatmul.mubr.msk.f32.vlgmr.msra.gmra.mrb[92].mxu0 %vm3647_vm6, %v4003_v0  ;;  %v4009_v16 = vadd.f32 %v4001_v24, %v3953_v59  ;;  %v11465_v0 = vpack.c.bf16 %v2764_v56, %v2763_v22  ;;  %v12633_v59 = vld [vmem:[#allocation128_spill] sm:$0xff]  ;;  %v3883_v24 = vadd.f32 %v3875_v33, %v3827_v63  ;;  %v3884_v22 = vadd.f32 %v3876_v43, %v3828_v2  ;;  %v12635_v56 = vld [vmem:[#allocation110_spill] sm:$0xff] }
 0x65b   : > { %8161 = vmatprep.mubr.msk.f32.mxu0 %vm3647_vm6, %v4004_v28  ;;  %8834 = vmatpush3.bf16.msra.mxu0 %v11277_v6  ;;  %v2765_v28 = vld [vmem:[%s12357_s14 + $0x60] sm:$0xff]  ;;  %v3877_v44 = vmul.f32 %v12635_v56, %v11200_v51  ;;  %v3888_v63 = vadd.f32 %v3880_v37, %v3832_v32  ;;  %v4013_v23 = vmul.f32 %v12635_v56, %v11196_v38 }
 0x65c   : > { %8836 = vmatprep.subr.bf16.mxu0 %v11279_v14  ;;  %v11487_v11 = vpack.c.bf16 %v2766_v39, %v2765_v28  ;;  %8117 = vmatmul.mubr.msk.f32.gmra.mrb[80].mxu1 %vm3647_vm6, %v11198_v31  ;;  %v3878_v28 = vmul.f32 %v12636_v27, %v11200_v51  ;;  %v3777_v39 = vmul.f32 %v12637_v49, %v11196_v38  ;;  %v12644_v49 = vld [vmem:[#allocation118_spill] sm:$0xff] }
 0x65d   : > { %8119 = vmatprep.mubr.msk.f32.mxu1 %vm3647_vm6, %v11198_v31  ;;  %v4021_v33 = vmul.f32 %v11211_v61, %v11198_v31  ;;  %v12643_v61 = vld [vmem:[#allocation117_spill] sm:$0xff]  ;;  %v4016_v56 = vmul.f32 %v12639_v29, %v11196_v38 }
 0x65e   : > { %8162 = vmatmul.mubr.msk.f32.gmra.mrb[94].mxu0 %vm3647_vm6, %v4005_v25  ;;  %v12629_v25 = vld [vmem:[#allocation120_spill] sm:$0xff]  ;;  %v3833_v34 = vadd.f32 %v3825_v20, %v3777_v39  ;;  %v4076_v5 = vmul.f32 %v12643_v61, %v11200_v51  ;;  %v4077_v39 = vmul.f32 %v12644_v49, %v11200_v51  ;;  %v4067_v20 = vpop.permute.xlu1 %4066  ;;  %v12654_v61 = vld [vmem:[#allocation57_spill] sm:$0xff] }
 0x65f   : > { %8164 = vmatprep.mubr.msk.f32.mxu0 %vm3647_vm6, %v4006_v47  ;;  %8838 = vmatpush3.bf16.msra.mxu0 %v11279_v14  ;;  %v3821_v19 = vmul.f32 %v12629_v25, %v11198_v31  ;;  %v12630_v47 = vld [vmem:[#allocation130_spill] sm:$0xff]  ;;  %v4020_v25 = vmul.f32 %v11155_v45, %v11198_v31  ;;  %v4080_v29 = vmul.f32 %v4067_v20, %v11200_v51  ;;  %v12656_v49 = vld [vmem:[#allocation69_spill] sm:$0xff] }
 0x660   : > { %8840 = vmatprep.subr.bf16.mxu0 %v11408_v1  ;;  %v3774_v15 = vmul.f32 %v12630_v47, %v11196_v38  ;;  %8120 = vmatmul.mubr.msk.f32.gmra.mrb[82].mxu1 %vm3647_vm6, %v11198_v31  ;;  %v2767_v47 = vld [vmem:[%s12357_s14 + $0x70] sm:$0xff]  ;;  %v12657_v20 = vld [vmem:[#allocation41_spill] sm:$0xff] }
 0x661   : > { %8142 = vmatprep.mubr.msk.f32.mxu1 %vm3647_vm6, %v3882_v30  ;;  %v12641_v30 = vld [vmem:[#allocation115_spill] sm:$0xff] }
 0x662   : > { %8165 = vmatmul.mubr.msk.f32.gmra.mrb[96].mxu0 %vm3647_vm6, %v4007_v60  ;;  %v3775_v60 = vmul.f32 %v12633_v59, %v11196_v38  ;;  %v4074_v45 = vmul.f32 %v12641_v30, %v11200_v51  ;;  %v4014_v59 = vmul.f32 %v12636_v27, %v11196_v38 }
 0x663   : > { %8167 = vmatprep.mubr.msk.f32.mxu0 %vm3647_vm6, %v4008_v55  ;;  %8842 = vmatpush3.bf16.msra.mxu0 %v11408_v1  ;;  %v3829_v55 = vadd.f32 %v3821_v19, %v3773_v35  ;;  %v4012_v35 = vmul.f32 %v12632_v41, %v11196_v38  ;;  %v4026_v19 = vadd.f32 %v4018_v62, %v4010_v52 }
 0x664   : > { %8844 = vmatprep.subr.bf16.mxu0 %v11430_v57  ;;  %8143 = vmatmul.mubr.msk.f32.vlgmr.msra.gmra.mrb[84].mxu1 %vm3647_vm6, %v3883_v24  ;;  %v3831_v40 = vadd.f32 %v3823_v46, %v3775_v60  ;;  %v4027_v41 = vadd.f32 %v4019_v21, %v4011_v58  ;;  %v4022_v60 = vmul.f32 %v11165_v36, %v11198_v31  ;;  %v12642_v24 = vld [vmem:[#allocation116_spill] sm:$0xff] }
 0x665   : > { %8145 = vmatprep.mubr.msk.f32.mxu1 %vm3647_vm6, %v3884_v22  ;;  %8830 = vmatpush3.bf16.msk.msra.mxu1 %vm11110_vm5, %v11116_v7  ;;  %v3885_v3 = vadd.f32 %v3877_v44, %v3829_v55  ;;  %v12638_v7 = vld [vmem:[#allocation112_spill] sm:$0xff]  ;;  %v4028_v46 = vadd.f32 %v4020_v25, %v4012_v35  ;;  %v4082_v55 = vadd.f32 %v4074_v45, %v4026_v19  ;;  %v12647_v35 = vld [vmem:[#allocation35_spill] sm:$0xff]  ;;  %v12648_v19 = vld [vmem:[#allocation53_spill] sm:$0xff] }
 0x666   : > { %8168 = vmatmul.mubr.msk.f32.gmra.mrb[98].mxu0 %vm3647_vm6, %v4009_v16  ;;  %v3830_v16 = vadd.f32 %v3822_v13, %v3774_v15  ;;  %8864 = vmatprep.subr.bf16.mxu1 %v11277_v6  ;;  %v3879_v48 = vmul.f32 %v12638_v7, %v11200_v51  ;;  %v2768_v15 = vld [vmem:[%s12357_s14 + $0x78] sm:$0xff]  ;;  %v3881_v13 = vmul.f32 %v12640_v42, %v11200_v51  ;;  %v2651_v25 = vmul.f32 0.2236068, %v12647_v35 }
 0x667   : > { %8846 = vmatpush3.bf16.msra.mxu0 %v11430_v57  ;;  %v11566_v2 = vpack.c.bf16 %v2768_v15, %v2767_v47  ;;  %v4075_v9 = vmul.f32 %v12642_v24, %v11200_v51  ;;  %v4015_v53 = vmul.f32 %v12638_v7, %v11196_v38  ;;  %v4023_v36 = vmul.f32 %v11221_v12, %v11198_v31  ;;  %v12646_v7 = vld [vmem:[#allocation123_spill] sm:$0xff]  ;;  %v12649_v47 = vld [vmem:[#allocation33_spill] sm:$0xff] }
 0x668   : > { %8848 = vmatprep.subr.bf16.mxu0 %v11445_v18  ;;  %v3886_v8 = vadd.f32 %v3878_v28, %v3830_v16  ;;  %8146 = vmatmul.mubr.msk.f32.gmra.mrb[86].mxu1 %vm3647_vm6, %v3885_v3  ;;  %v3887_v17 = vadd.f32 %v3879_v48, %v3831_v40  ;;  %v3889_v43 = vadd.f32 %v3881_v13, %v3833_v34  ;;  %v12645_v40 = vld [vmem:[#allocation121_spill] sm:$0xff]  ;;  %v2640_v15 = vmul.f32 0.2236068, %v12649_v47 }
 0x669   : > { %v4029_v16 = vadd.f32 %v4021_v33, %v4013_v23  ;;  %v4083_v22 = vadd.f32 %v4075_v9, %v4027_v41  ;;  %v4024_v44 = vmul.f32 %v11205_v10, %v11198_v31  ;;  %v4030_v27 = vadd.f32 %v4022_v60, %v4014_v59  ;;  %v12651_v59 = vld [vmem:[#allocation39_spill] sm:$0xff]  ;;  %v12653_v24 = vld [vmem:[#allocation37_spill] sm:$0xff] }
 0x66a   : > { %8148 = vmatprep.mubr.msk.f32.mxu1 %vm3647_vm6, %v3886_v8  ;;  %v4084_v28 = vadd.f32 %v4076_v5, %v4028_v46  ;;  %v4078_v3 = vmul.f32 %v12645_v40, %v11200_v51  ;;  %v4017_v12 = vmul.f32 %v12640_v42, %v11196_v38  ;;  %v4025_v10 = vmul.f32 %v11424_v50, %v11198_v31  ;;  %v4072_v50 = vpop.permute.xlu1 %4071  ;;  %v12650_v42 = vld [vmem:[#allocation49_spill] sm:$0xff] }
 0x66b   : > { %8850 = vmatpush3.bf16.msra.mxu0 %v11445_v18  ;;  %v4031_v52 = vadd.f32 %v4023_v36, %v4015_v53  ;;  %v4085_v62 = vadd.f32 %v4077_v39, %v4029_v16  ;;  %v4032_v32 = vadd.f32 %v4024_v44, %v4016_v56  ;;  %v4079_v48 = vmul.f32 %v12646_v7, %v11200_v51  ;;  %v12652_v46 = vld [vmem:[#allocation61_spill] sm:$0xff] }
 0x66c   : > { %8852 = vmatprep.subr.bf16.mxu0 %v11465_v0  ;;  %8149 = vmatmul.mubr.msk.f32.gmra.mrb[88].mxu1 %vm3647_vm6, %v3887_v17  ;;  %v4086_v8 = vadd.f32 %v4078_v3, %v4030_v27  ;;  %v4033_v37 = vadd.f32 %v4025_v10, %v4017_v12  ;;  %v4081_v34 = vmul.f32 %v4072_v50, %v11200_v51  ;;  %v2642_v13 = vmul.f32 0.2236068, %v12650_v42  ;;  %v12655_v27 = vld [vmem:[#allocation43_spill] sm:$0xff]  ;;  %v12658_v3 = vld [vmem:[#allocation65_spill] sm:$0xff] }
 0x66d   : > { %8151 = vmatprep.mubr.msk.f32.mxu1 %vm3647_vm6, %v3888_v63  ;;  %v4087_v58 = vadd.f32 %v4079_v48, %v4031_v52  ;;  %v4088_v21 = vadd.f32 %v4080_v29, %v4032_v32  ;;  %v2653_v63 = vmul.f32 0.2236068, %v12648_v19  ;;  %v2673_v60 = vmul.f32 0.2236068, %v12651_v59  ;;  %v12659_v48 = vld [vmem:[#allocation47_spill] sm:$0xff]  ;;  %v12661_v50 = vld [vmem:[#allocation45_spill] sm:$0xff] }
 0x66e   : > { %v4089_v17 = vadd.f32 %v4081_v34, %v4033_v37  ;;  %v2662_v9 = vmul.f32 0.2236068, %v12653_v24  ;;  %v2664_v5 = vmul.f32 0.2236068, %v12654_v61  ;;  %v2697_v39 = vmul.f32 0.2236068, %v12656_v49 }
 0x66f   : > { %8854 = vmatpush3.bf16.msra.mxu0 %v11465_v0  ;;  %v2684_v40 = vmul.f32 0.2236068, %v12657_v20  ;;  %v2686_v12 = vmul.f32 0.2236068, %v12658_v3  ;;  %v2717_v29 = vmul.f32 0.2236068, %v12659_v48 }
 0x670   : > { %8856 = vmatprep.subr.bf16.mxu0 %v11487_v11  ;;  %8152 = vmatmul.mubr.msk.f32.gmra.mrb[90].mxu1 %vm3647_vm6, %v3889_v43  ;;  %v12660_v37 = vld [vmem:[#allocation77_spill] sm:$0xff]  ;;  %v12663_v42 = vld [vmem:[#allocation55_spill] sm:$0xff] }
 0x671   : > { %8174 = vmatprep.mubr.msk.f32.mxu1 %vm3647_vm6, %v4082_v55  ;;  %v2675_v55 = vmul.f32 0.2236068, %v12652_v46  ;;  %v12662_v34 = vld [vmem:[#allocation73_spill] sm:$0xff]  ;;  %v12665_v46 = vld [vmem:[#allocation63_spill] sm:$0xff] }
 0x672   : > { %v12666_v24 = vld [vmem:[#allocation59_spill] sm:$0xff] }
 0x673   : > { %8858 = vmatpush3.bf16.msra.mxu0 %v11487_v11  ;;  %v12669_v3 = vld [vmem:[#allocation79_spill] sm:$0xff] }
 0x674   : > { %8860 = vmatprep.subr.bf16.mxu0 %v11566_v2  ;;  %8175 = vmatmul.mubr.msk.f32.vlgmr.msra.gmra.mrb[92].mxu1 %vm3647_vm6, %v4083_v22 }
 0x675   : > { %8177 = vmatprep.mubr.msk.f32.mxu1 %vm3647_vm6, %v4084_v28  ;;  %8866 = vmatpush3.bf16.msra.mxu1 %v11277_v6  ;;  %v2695_v28 = vmul.f32 0.2236068, %v12655_v27  ;;  %v12668_v27 = vld [vmem:[#allocation67_spill] sm:$0xff] }
 0x676   : > { %8868 = vmatprep.subr.bf16.mxu1 %v11279_v14 }
 0x677   : > { %8862 = vmatpush3.bf16.msra.mxu0 %v11566_v2 }
 0x678   : > { %8896 = vmatprep.subr.bf16.mxu0 %v11277_v6  ;;  %8178 = vmatmul.mubr.msk.f32.gmra.mrb[94].mxu1 %vm3647_vm6, %v4085_v62 }
 0x679   : > { %8180 = vmatprep.mubr.msk.f32.mxu1 %vm3647_vm6, %v4086_v8  ;;  %8870 = vmatpush3.bf16.msra.mxu1 %v11279_v14 }
 0x67a   : > { %8872 = vmatprep.subr.bf16.mxu1 %v11408_v1 }
 0x67c   : > { %8181 = vmatmul.mubr.msk.f32.gmra.mrb[96].mxu1 %vm3647_vm6, %v4087_v58  ;;  %v2719_v58 = vmul.f32 0.2236068, %v12660_v37 }
 0x67d   : > { %8183 = vmatprep.mubr.msk.f32.mxu1 %vm3647_vm6, %v4088_v21  ;;  %8874 = vmatpush3.bf16.msra.mxu1 %v11408_v1  ;;  %v2706_v21 = vmul.f32 0.2236068, %v12661_v50 }
 0x67e   : > { %8876 = vmatprep.subr.bf16.mxu1 %v11430_v57 }
 0x680   : > { %8184 = vmatmul.mubr.msk.f32.gmra.mrb[98].mxu1 %vm3647_vm6, %v4089_v17  ;;  %v2708_v17 = vmul.f32 0.2236068, %v12662_v34  ;;  %v12671_v34 = vmov 0.0|0.0  }
 0x681   : > { %8878 = vmatpush3.bf16.msra.mxu1 %v11430_v57 }
 0x682   : > { %8880 = vmatprep.subr.bf16.mxu1 %v11445_v18 }
 0x685   : > { %8882 = vmatpush3.bf16.msra.mxu1 %v11445_v18 }
 0x686   : > { %8884 = vmatprep.subr.bf16.mxu1 %v11465_v0 }
 0x689   : > { %8886 = vmatpush3.bf16.msra.mxu1 %v11465_v0 }
 0x68a   : > { %8888 = vmatprep.subr.bf16.mxu1 %v11487_v11 }
 0x68d   : > { %8890 = vmatpush3.bf16.msra.mxu1 %v11487_v11 }
 0x68e   : > { %8892 = vmatprep.subr.bf16.mxu1 %v11566_v2 }
 0x691   : > { %8894 = vmatpush3.bf16.msra.mxu1 %v11566_v2 }
 0x692   : > { %8928 = vmatprep.subr.bf16.mxu1 %v11277_v6 }
 0x6fd   : > { %v8064_v30 = vpop.f32.mrb[68].mxu0 }
 0x6fe   : > { %v11635_v45 = vmul.f32 %v8064_v30, %v2651_v25  ;;  %v5172_v23 = vmul.f32 %v8064_v30, %v2653_v63  ;;  %v4163_v33 = vpop.f32.mrb[69].mxu0  ;;  %v12664_v30 = vld [vmem:[#allocation51_spill] sm:$0xff] }
 0x6ff   : > { %v11637_v41 = vmul.f32 %v4163_v33, %v2640_v15  ;;  %v5171_v43 = vmul.f32 %v4163_v33, %v2642_v13  ;;  %v11669_v13 = vmul.f32 0.2236068, %v12663_v42 }
 0x701   : > { %v8067_v53 = vpop.f32.mrb[70].mxu0  ;;  %8262 = vmatprep.mubr.f32.mxu1 %v5171_v43 }
 0x702   : > { %v11643_v36 = vmul.f32 %v8067_v53, %v2673_v60  ;;  %v5174_v16 = vmul.f32 %v8067_v53, %v2675_v55  ;;  %v4173_v22 = vpop.f32.mrb[71].mxu0  ;;  %8263 = vmatmul.mubr.f32.vlgmr.msra.gmra.mrb[100].mxu1 %v5172_v23  ;;  %v11673_v23 = vmul.f32 0.2236068, %v12664_v30  ;;  %v11683_v55 = vmul.f32 0.2236068, %v12665_v46  ;;  %v12672_v46 = vld [vmem:[#allocation36_spill] sm:$0xff] }
 0x703   : > { %v11645_v56 = vmul.f32 %v4173_v22, %v2662_v9  ;;  %v5173_v44 = vmul.f32 %v4173_v22, %v2664_v5  ;;  %8930 = vmatpush3.bf16.msra.mxu1 %v11277_v6  ;;  %v11687_v9 = vmul.f32 0.2236068, %v12666_v24  ;;  %v12667_v22 = vld [vmem:[#allocation71_spill] sm:$0xff]  ;;  %v2652_v24 = vmul.f32 0.2236068, %v12672_v46 }
 0x704   : > { %8932 = vmatprep.subr.bf16.mxu1 %v11279_v14 }
 0x705   : > { %v8070_v10 = vpop.f32.mrb[72].mxu0  ;;  %8265 = vmatprep.mubr.f32.mxu1 %v5173_v44  ;;  %v11697_v44 = vmul.f32 0.2236068, %v12667_v22  ;;  %v12673_v22 = vld [vmem:[#allocation34_spill] sm:$0xff] }
 0x706   : > { %v11653_v52 = vmul.f32 %v8070_v10, %v2695_v28  ;;  %v5176_v62 = vmul.f32 %v8070_v10, %v2697_v39  ;;  %v4183_v32 = vpop.f32.mrb[73].mxu0  ;;  %8266 = vmatmul.mubr.f32.gmra.mrb[102].mxu1 %v5174_v16  ;;  %v11701_v28 = vmul.f32 0.2236068, %v12668_v27  ;;  %v12670_v10 = vld [vmem:[#allocation75_spill] sm:$0xff]  ;;  %v2641_v27 = vmul.f32 0.2236068, %v12673_v22 }
 0x707   : > { %v11655_v8 = vmul.f32 %v4183_v32, %v2684_v40  ;;  %v5175_v7 = vmul.f32 %v4183_v32, %v2686_v12  ;;  %8934 = vmatpush3.bf16.msra.mxu1 %v11279_v14  ;;  %v11711_v12 = vmul.f32 0.2236068, %v12669_v3  ;;  %v12675_v3 = vld [vmem:[#allocation54_spill] sm:$0xff] }
 0x708   : > { %8936 = vmatprep.subr.bf16.mxu1 %v11408_v1 }
 0x709   : > { %v8073_v35 = vpop.f32.mrb[74].mxu0  ;;  %8268 = vmatprep.mubr.f32.mxu1 %v5175_v7 }
 0x70a   : > { %v11663_v25 = vmul.f32 %v8073_v35, %v2717_v29  ;;  %v5178_v19 = vmul.f32 %v8073_v35, %v2719_v58  ;;  %v4193_v63 = vpop.f32.mrb[75].mxu0  ;;  %8269 = vmatmul.mubr.f32.gmra.mrb[104].mxu1 %v5176_v62  ;;  %v11715_v62 = vmul.f32 0.2236068, %v12670_v10  ;;  %v11754_v10 = vmul.f32 0.2236068, %v12675_v3 }
 0x70b   : > { %v11665_v47 = vmul.f32 %v4193_v63, %v2706_v21  ;;  %v5177_v15 = vmul.f32 %v4193_v63, %v2708_v17  ;;  %8938 = vmatpush3.bf16.msra.mxu1 %v11408_v1 }
 0x70c   : > { %8940 = vmatprep.subr.bf16.mxu1 %v11430_v57 }
 0x70d   : > { %v8096_v33 = vpop.f32.mrb[76].mxu0  ;;  %8271 = vmatprep.mubr.f32.mxu1 %v5177_v15 }
 0x70e   : > { %v11676_v43 = vmul.f32 %v8096_v33, %v11669_v13  ;;  %v4400_v59 = vpop.f32.mrb[77].mxu0  ;;  %8272 = vmatmul.mubr.f32.gmra.mrb[106].mxu1 %v5178_v19 }
 0x70f   : > { %v11679_v60 = vmul.f32 %v4400_v59, %v11673_v23  ;;  %8942 = vmatpush3.bf16.msra.mxu1 %v11430_v57 }
 0x710   : > { %8944 = vmatprep.subr.bf16.mxu1 %v11445_v18 }
 0x711   : > { %v8099_v61 = vpop.f32.mrb[78].mxu0 }
 0x712   : > { %v11690_v5 = vmul.f32 %v8099_v61, %v11683_v55  ;;  %v4410_v53 = vpop.f32.mrb[79].mxu0 }
 0x713   : > { %v11693_v16 = vmul.f32 %v4410_v53, %v11687_v9  ;;  %8946 = vmatpush3.bf16.msra.mxu1 %v11445_v18 }
 0x714   : > { %8948 = vmatprep.subr.bf16.mxu1 %v11465_v0 }
 0x715   : > { %v8102_v49 = vpop.f32.mrb[80].mxu0 }
 0x716   : > { %v11704_v39 = vmul.f32 %v8102_v49, %v11697_v44  ;;  %v4420_v20 = vpop.f32.mrb[81].mxu0 }
 0x717   : > { %v11707_v40 = vmul.f32 %v4420_v20, %v11701_v28  ;;  %8950 = vmatpush3.bf16.msra.mxu1 %v11465_v0  ;;  %v8080_v49 = vpop.f32.mrb[68].mxu1 }
 0x718   : > { %8952 = vmatprep.subr.bf16.mxu1 %v11487_v11 }
 0x719   : > { %v8105_v32 = vpop.f32.mrb[82].mxu0 }
 0x71a   : > { %v11718_v7 = vmul.f32 %v8105_v32, %v11711_v12  ;;  %v4430_v48 = vpop.f32.mrb[83].mxu0  ;;  %v5051_v32 = vmul.f32 %v8080_v49, %v2652_v24  ;;  %v12679_v49 = vld [vmem:[#allocation62_spill] sm:$0xff] }
 0x71b   : > { %v11721_v29 = vmul.f32 %v4430_v48, %v11715_v62  ;;  %8954 = vmatpush3.bf16.msra.mxu1 %v11487_v11  ;;  %v4292_v48 = vpop.f32.mrb[69].mxu1 }
 0x71c   : > { %8956 = vmatprep.subr.bf16.mxu1 %v11566_v2  ;;  %v8083_v54 = vpop.f32.mrb[70].mxu1 }
 0x71d   : > { %v8128_v37 = vpop.f32.mrb[84].mxu0 }
 0x71e   : > { %v11726_v58 = vmul.f32 %v8128_v37, %v11669_v13  ;;  %v4616_v50 = vpop.f32.mrb[85].mxu0  ;;  %v12676_v37 = vld [vmem:[#allocation50_spill] sm:$0xff] }
 0x71f   : > { %v11729_v21 = vmul.f32 %v4616_v50, %v11673_v23  ;;  %8958 = vmatpush3.bf16.msra.mxu1 %v11566_v2  ;;  %v11757_v50 = vmul.f32 0.2236068, %v12676_v37  ;;  %v11770_v37 = vmul.f32 0.2236068, %v12679_v49 }
 0x720   : > { %8991 = vmatprep.subr.bf16.mxu1 %v12671_v34 }
 0x721   : > { %v8131_v17 = vpop.f32.mrb[86].mxu0 }
 0x722   : > { %v11734_v35 = vmul.f32 %v8131_v17, %v11683_v55  ;;  %v4626_v19 = vpop.f32.mrb[87].mxu0  ;;  %v5050_v17 = vmul.f32 %v4292_v48, %v2641_v27  ;;  %v4302_v48 = vpop.f32.mrb[71].mxu1 }
 0x723   : > { %v11737_v63 = vmul.f32 %v4626_v19, %v11687_v9 }
 0x724   : > { %v5058_v3 = vadd.f32 %v5050_v17, %v11637_v41 }
 0x725   : > { %v8134_v15 = vpop.f32.mrb[88].mxu0 }
 0x726   : > { %v11740_v42 = vmul.f32 %v8134_v15, %v11697_v44  ;;  %v4636_v30 = vpop.f32.mrb[89].mxu0  ;;  %v12677_v15 = vld [vmem:[#allocation40_spill] sm:$0xff]  ;;  %8218 = vmatprep.mubr.f32.mxu0 %v5058_v3 }
 0x727   : > { %v11743_v33 = vmul.f32 %v4636_v30, %v11701_v28  ;;  %v2674_v30 = vmul.f32 0.2236068, %v12677_v15  ;;  %v12680_v15 = vld [vmem:[#allocation58_spill] sm:$0xff] }
 0x728   : > { %v11773_v51 = vmul.f32 0.2236068, %v12680_v15 }
 0x729   : > { %v8137_v59 = vpop.f32.mrb[90].mxu0  ;;  %v5053_v27 = vmul.f32 %v8083_v54, %v2674_v30  ;;  %v8086_v54 = vpop.f32.mrb[72].mxu1 }
 0x72a   : > { %v11747_v61 = vmul.f32 %v8137_v59, %v11711_v12  ;;  %v4646_v53 = vpop.f32.mrb[91].mxu0  ;;  %v5059_v59 = vadd.f32 %v5051_v32, %v11635_v45  ;;  %v4312_v15 = vpop.f32.mrb[73].mxu1 }
 0x72b   : > { %v11751_v20 = vmul.f32 %v4646_v53, %v11715_v62  ;;  %v12678_v53 = vld [vmem:[#allocation38_spill] sm:$0xff] }
 0x72c   : > { %v2663_v4 = vmul.f32 0.2236068, %v12678_v53  ;;  %v5061_v53 = vadd.f32 %v5053_v27, %v11643_v36  ;;  %8219 = vmatmul.mubr.f32.vlgmr.msra.gmra.mrb[100].mxu0 %v5059_v59  ;;  %v12684_v36 = vld [vmem:[#allocation66_spill] sm:$0xff] }
 0x72d   : > { %12674 = vst [vmem:[#allocation106_spill] sm:$0xff] %v11751_v20  ;;  %v8160_v19 = vpop.f32.mrb[92].mxu0  ;;  %8898 = vmatpush3.bf16.msra.mxu0 %v11277_v6  ;;  %v11787_v59 = vmul.f32 0.2236068, %v12684_v36 }
 0x72e   : > { %v11762_v46 = vmul.f32 %v8160_v19, %v11754_v10  ;;  %v4874_v22 = vpop.f32.mrb[93].mxu0  ;;  %v5052_v45 = vmul.f32 %v4302_v48, %v2663_v4  ;;  %v12681_v19 = vld [vmem:[#allocation44_spill] sm:$0xff]  ;;  %v12683_v4 = vld [vmem:[#allocation70_spill] sm:$0xff]  ;;  %8900 = vmatprep.subr.bf16.mxu0 %v11279_v14 }
 0x72f   : > { %v11767_v24 = vmul.f32 %v4874_v22, %v11757_v50  ;;  %v2696_v38 = vmul.f32 0.2236068, %v12681_v19  ;;  %v12682_v22 = vld [vmem:[#allocation42_spill] sm:$0xff]  ;;  %v11783_v3 = vmul.f32 0.2236068, %v12683_v4  ;;  %v12685_v19 = vld [vmem:[#allocation48_spill] sm:$0xff] }
 0x730   : > { %v2685_v31 = vmul.f32 0.2236068, %v12682_v22  ;;  %v5060_v49 = vadd.f32 %v5052_v45, %v11645_v56  ;;  %v2718_v56 = vmul.f32 0.2236068, %v12685_v19  ;;  %v12686_v4 = vld [vmem:[#allocation46_spill] sm:$0xff] }
 0x731   : > { %v8163_v32 = vpop.f32.mrb[94].mxu0  ;;  %v5055_v48 = vmul.f32 %v8086_v54, %v2696_v38  ;;  %v2707_v20 = vmul.f32 0.2236068, %v12686_v4  ;;  %8902 = vmatpush3.bf16.msra.mxu0 %v11279_v14  ;;  %v8089_v54 = vpop.f32.mrb[74].mxu1 }
 0x732   : > { %v5432_v41 = vmul.f32 %v8163_v32, %v11770_v37  ;;  %v4884_v17 = vpop.f32.mrb[95].mxu0  ;;  %v5054_v27 = vmul.f32 %v4312_v15, %v2685_v31  ;;  %8221 = vmatprep.mubr.f32.mxu0 %v5060_v49  ;;  %v12687_v31 = vld [vmem:[#allocation78_spill] sm:$0xff]  ;;  %v5057_v15 = vmul.f32 %v8089_v54, %v2718_v56  ;;  %v4322_v19 = vpop.f32.mrb[75].mxu1  ;;  %8904 = vmatprep.subr.bf16.mxu0 %v11408_v1 }
 0x733   : > { %v5431_v30 = vmul.f32 %v4884_v17, %v11773_v51  ;;  %v5063_v45 = vadd.f32 %v5055_v48, %v11653_v52  ;;  %8222 = vmatmul.mubr.f32.gmra.mrb[102].mxu0 %v5061_v53  ;;  %v11797_v49 = vmul.f32 0.2236068, %v12687_v31  ;;  %v12688_v52 = vld [vmem:[#allocation74_spill] sm:$0xff]  ;;  %v5056_v48 = vmul.f32 %v4322_v19, %v2707_v20  ;;  %v8112_v56 = vpop.f32.mrb[76].mxu1  ;;  %v5696_v20 = vld [vmem:[%s12351_s8 + $0x8] sm:$0x3] }
 0x734   : > { %v5062_v38 = vadd.f32 %v5054_v27, %v11655_v8  ;;  %v11801_v53 = vmul.f32 0.2236068, %v12688_v52  ;;  %v5065_v8 = vadd.f32 %v5057_v15, %v11663_v25  ;;  %v5422_v31 = vmul.f32 %v8112_v56, %v11669_v13  ;;  %v4508_v52 = vpop.f32.mrb[77].mxu1  ;;  %v5695_v25 = vld [vmem:[%s12351_s8] sm:$0xff] }
 0x735   : > { %v8166_v32 = vpop.f32.mrb[96].mxu0  ;;  %8906 = vmatpush3.bf16.msra.mxu0 %v11408_v1  ;;  %v8115_v13 = vpop.f32.mrb[78].mxu1  ;;  %v8992_v15 = vpack.c.bf16 %v5696_v20, %v5695_v25  ;;  %v12689_v20 = vmov 0.0  }
 0x736   : > { %v5434_v17 = vmul.f32 %v8166_v32, %v11783_v3  ;;  %v4894_v22 = vpop.f32.mrb[97].mxu0  ;;  %8224 = vmatprep.mubr.f32.mxu0 %v5062_v38  ;;  %8908 = vmatprep.subr.bf16.mxu0 %v11430_v57  ;;  %v5424_v19 = vmul.f32 %v8115_v13, %v11683_v55 }
 0x737   : > { %v5433_v36 = vmul.f32 %v4894_v22, %v11787_v59  ;;  %8225 = vmatmul.mubr.f32.gmra.mrb[104].mxu0 %v5063_v45  ;;  %v5064_v22 = vadd.f32 %v5056_v48, %v11665_v47  ;;  %v5421_v47 = vmul.f32 %v4508_v52, %v11673_v23  ;;  %v5438_v45 = vadd.f32 %v11762_v46, %v5422_v31  ;;  %v4518_v48 = vpop.f32.mrb[79].mxu1 }
 0x738   : > { %v8118_v23 = vpop.f32.mrb[80].mxu1 }
 0x739   : > { %v8169_v32 = vpop.f32.mrb[98].mxu0  ;;  %8227 = vmatprep.mubr.f32.mxu0 %v5064_v22  ;;  %8910 = vmatpush3.bf16.msra.mxu0 %v11430_v57  ;;  %v5437_v38 = vadd.f32 %v11767_v24, %v5421_v47  ;;  %v5426_v24 = vmul.f32 %v8118_v23, %v11697_v44 }
 0x73a   : > { %v5436_v27 = vmul.f32 %v8169_v32, %v11797_v49  ;;  %v4904_v4 = vpop.f32.mrb[99].mxu0  ;;  %8912 = vmatprep.subr.bf16.mxu0 %v11445_v18  ;;  %v5423_v32 = vmul.f32 %v4518_v48, %v11687_v9 }
 0x73b   : > { %v5435_v54 = vmul.f32 %v4904_v4, %v11801_v53  ;;  %8228 = vmatmul.mubr.f32.gmra.mrb[106].mxu0 %v5065_v8  ;;  %8350 = vmatprep.mubr.f32.mxu1 %v5437_v38  ;;  %v5440_v4 = vadd.f32 %v5432_v41, %v5424_v19  ;;  %v4528_v8 = vpop.f32.mrb[81].mxu1  ;;  %v5442_v9 = vadd.f32 %v5434_v17, %v5426_v24 }
 0x73c   : > { %8351 = vmatmul.mubr.f32.vlgmr.msra.gmra.mrb[108].mxu1 %v5438_v45  ;;  %v5439_v46 = vadd.f32 %v5431_v30, %v5423_v32  ;;  %v5425_v55 = vmul.f32 %v4528_v8, %v11701_v28  ;;  %v8121_v41 = vpop.f32.mrb[82].mxu1 }
 0x73d   : > { %8914 = vmatpush3.bf16.msra.mxu0 %v11445_v18  ;;  %8994 = vmatpush3.bf16.msk.msra.mxu1 %vm11110_vm5, %v8992_v15  ;;  %v5428_v30 = vmul.f32 %v8121_v41, %v11711_v12  ;;  %v4538_v56 = vpop.f32.mrb[83].mxu1 }
 0x73e   : > { %8916 = vmatprep.subr.bf16.mxu0 %v11465_v0  ;;  %8995 = vmatprep.subr.bf16.mxu1 %v12671_v34  ;;  %v5441_v22 = vadd.f32 %v5433_v36, %v5425_v55  ;;  %v5427_v44 = vmul.f32 %v4538_v56, %v11715_v62  ;;  %v8144_v28 = vpop.f32.mrb[84].mxu1  ;;  %v12691_v56 = vld [vmem:[#allocation106_spill] sm:$0xff] }
 0x73f   : > { %8353 = vmatprep.mubr.f32.mxu1 %v5439_v46  ;;  %v5444_v31 = vadd.f32 %v5436_v27, %v5428_v30  ;;  %v5293_v17 = vmul.f32 %v8144_v28, %v11754_v10  ;;  %v4745_v25 = vpop.f32.mrb[85].mxu1 }
 0x740   : > { %8354 = vmatmul.mubr.f32.gmra.mrb[110].mxu1 %v5440_v4  ;;  %v5443_v52 = vadd.f32 %v5435_v54, %v5427_v44  ;;  %v5292_v36 = vmul.f32 %v4745_v25, %v11757_v50  ;;  %v8147_v27 = vpop.f32.mrb[86].mxu1 }
 0x741   : > { %8918 = vmatpush3.bf16.msra.mxu0 %v11465_v0  ;;  %8356 = vmatprep.mubr.f32.mxu1 %v5441_v22  ;;  %v5301_v12 = vadd.f32 %v5293_v17, %v11676_v43  ;;  %v5295_v54 = vmul.f32 %v8147_v27, %v11770_v37  ;;  %v4755_v47 = vpop.f32.mrb[87].mxu1  ;;  %v12690_v43 = vld [vmem:[#allocation122_spill] sm:$0xff] }
 0x742   : > { %8920 = vmatprep.subr.bf16.mxu0 %v11487_v11  ;;  %v5300_v62 = vadd.f32 %v5292_v36, %v11679_v60  ;;  %v5294_v45 = vmul.f32 %v4755_v47, %v11773_v51  ;;  %v8150_v38 = vpop.f32.mrb[88].mxu1 }
 0x743   : > { %v5303_v13 = vadd.f32 %v5295_v54, %v11690_v5  ;;  %v5297_v15 = vmul.f32 %v8150_v38, %v11783_v3  ;;  %v4765_v19 = vpop.f32.mrb[89].mxu1  ;;  %v12693_v38 = vld [vmem:[#allocation18_spill] sm:$0xff] }
 0x744   : > { %8357 = vmatmul.mubr.f32.gmra.mrb[112].mxu1 %v5442_v9  ;;  %8306 = vmatprep.mubr.f32.mxu0 %v5300_v62  ;;  %v5302_v60 = vadd.f32 %v5294_v45, %v11693_v16  ;;  %v5296_v48 = vmul.f32 %v4765_v19, %v11787_v59 }
 0x745   : > { %8922 = vmatpush3.bf16.msra.mxu0 %v11487_v11  ;;  %8359 = vmatprep.mubr.f32.mxu1 %v5443_v52  ;;  %v5305_v5 = vadd.f32 %v5297_v15, %v11704_v39 }
 0x746   : > { %8924 = vmatprep.subr.bf16.mxu0 %v11566_v2  ;;  %v5304_v32 = vadd.f32 %v5296_v48, %v11707_v40  ;;  %v12694_v48 = vld [vmem:[#allocation17_spill] sm:$0xff] }
 0x748   : > { %8360 = vmatmul.mubr.f32.gmra.mrb[114].mxu1 %v5444_v31 }
 0x749   : > { %8926 = vmatpush3.bf16.msra.mxu0 %v11566_v2  ;;  %8410 = vmatprep.mubr.msk.f32.mxu1 %vm9393_vm15, %v12689_v20 }
 0x74a   : > { %8960 = vmatprep.subr.bf16.mxu0 %v11277_v6 }
 0x74c   : > { %8307 = vmatmul.mubr.f32.vlgmr.msra.gmra.mrb[108].mxu0 %v5301_v12  ;;  %8411 = vmatmul.mubr.msk.f32.vlgmr.msra.gmra.mrb[116].mxu1 %vm3647_vm6, %v12690_v43 }
 0x74d   : > { %8962 = vmatpush3.bf16.msra.mxu0 %v11277_v6  ;;  %8429 = vmatprep.mubr.msk.f32.mxu1 %vm9393_vm15, %v12689_v20  ;;  %v8153_v6 = vpop.f32.mrb[90].mxu1 }
 0x74e   : > { %8964 = vmatprep.subr.bf16.mxu0 %v11279_v14  ;;  %8309 = vmatprep.mubr.f32.mxu0 %v5302_v60  ;;  %v5299_v16 = vmul.f32 %v8153_v6, %v11797_v49  ;;  %v4775_v4 = vpop.f32.mrb[91].mxu1 }
 0x74f   : > { %v5298_v23 = vmul.f32 %v4775_v4, %v11801_v53  ;;  %v8176_v39 = vpop.f32.mrb[92].mxu1  ;;  %v12695_v4 = vld [vmem:[#allocation105_spill] sm:$0xff] }
 0x750   : > { %8310 = vmatmul.mubr.f32.gmra.mrb[110].mxu0 %v5303_v13  ;;  %v5307_v46 = vadd.f32 %v5299_v16, %v11718_v7  ;;  %v5567_v40 = vmul.f32 %v8176_v39, %v11754_v10 }
 0x751   : > { %8966 = vmatpush3.bf16.msra.mxu0 %v11279_v14  ;;  %8312 = vmatprep.mubr.f32.mxu0 %v5304_v32  ;;  %v5306_v24 = vadd.f32 %v5298_v23, %v11721_v29  ;;  %v5003_v14 = vpop.f32.mrb[93].mxu1  ;;  %v12696_v23 = vld [vmem:[#allocation23_spill] sm:$0xff] }
 0x752   : > { %8968 = vmatprep.subr.bf16.mxu0 %v11408_v1  ;;  %v5566_v8 = vmul.f32 %v5003_v14, %v11757_v50  ;;  %v5575_v55 = vadd.f32 %v5567_v40, %v11726_v58  ;;  %v8179_v7 = vpop.f32.mrb[94].mxu1  ;;  %v12697_v40 = vld [vmem:[#allocation20_spill] sm:$0xff] }
 0x753   : > { %v5569_v29 = vmul.f32 %v8179_v7, %v11770_v37  ;;  %v12698_v7 = vld [vmem:[#allocation124_spill] sm:$0xff] }
 0x754   : > { %8313 = vmatmul.mubr.f32.gmra.mrb[112].mxu0 %v5305_v5  ;;  %v5574_v9 = vadd.f32 %v5566_v8, %v11729_v21 }
 0x755   : > { %8970 = vmatpush3.bf16.msra.mxu0 %v11408_v1  ;;  %8315 = vmatprep.mubr.f32.mxu0 %v5306_v24  ;;  %v5013_v1 = vpop.f32.mrb[95].mxu1  ;;  %v5577_v41 = vadd.f32 %v5569_v29, %v11734_v35  ;;  %v12699_v29 = vld [vmem:[#allocation24_spill] sm:$0xff] }
 0x756   : > { %8972 = vmatprep.subr.bf16.mxu0 %v11430_v57  ;;  %v5568_v10 = vmul.f32 %v5013_v1, %v11773_v51  ;;  %v8182_v58 = vpop.f32.mrb[96].mxu1 }
 0x757   : > { %v5571_v21 = vmul.f32 %v8182_v58, %v11783_v3  ;;  %v5023_v22 = vpop.f32.mrb[97].mxu1 }
 0x758   : > { %8316 = vmatmul.mubr.f32.gmra.mrb[114].mxu0 %v5307_v46  ;;  %v5576_v50 = vadd.f32 %v5568_v10, %v11737_v63  ;;  %v8185_v51 = vpop.f32.mrb[98].mxu1 }
 0x759   : > { %8974 = vmatpush3.bf16.msra.mxu0 %v11430_v57  ;;  %8394 = vmatprep.mubr.f32.mxu0 %v5574_v9  ;;  %v5570_v57 = vmul.f32 %v5023_v22, %v11787_v59  ;;  %v5579_v37 = vadd.f32 %v5571_v21, %v11740_v42  ;;  %v5573_v35 = vmul.f32 %v8185_v51, %v11797_v49  ;;  %v5033_v63 = vpop.f32.mrb[99].mxu1  ;;  %v5841_v42 = vld [vmem:[%s12352_s9 + $0x8] sm:$0x3] }
 0x75a   : > { %8976 = vmatprep.subr.bf16.mxu0 %v11445_v18 }
 0x75b   : > { %v5578_v30 = vadd.f32 %v5570_v57, %v11743_v33  ;;  %v5581_v3 = vadd.f32 %v5573_v35, %v11747_v61 }
 0x75d   : > { %8978 = vmatpush3.bf16.msra.mxu0 %v11445_v18  ;;  %v5572_v18 = vmul.f32 %v5033_v63, %v11801_v53  ;;  %v12702_v63 = vld [vmem:[#allocation26_spill] sm:$0xff] }
 0x75e   : > { %8980 = vmatprep.subr.bf16.mxu0 %v11465_v0 }
 0x75f   : > { %v5580_v44 = vadd.f32 %v5572_v18, %v12691_v56 }
 0x761   : > { %8982 = vmatpush3.bf16.msra.mxu0 %v11465_v0  ;;  %v5840_v0 = vld [vmem:[%s12352_s9] sm:$0xff] }
 0x762   : > { %8984 = vmatprep.subr.bf16.mxu0 %v11487_v11  ;;  %v11897_v33 = vpack.c.bf16 %v5841_v42, %v5840_v0  ;;  %v12703_v0 = vld [vmem:[#allocation10_spill] sm:$0xff] }
 0x765   : > { %8986 = vmatpush3.bf16.msra.mxu0 %v11487_v11  ;;  %v12692_v11 = vld [vmem:[#allocation125_spill] sm:$0xff] }
 0x766   : > { %8988 = vmatprep.subr.bf16.mxu0 %v11566_v2 }
 0x769   : > { %8990 = vmatpush3.bf16.msra.mxu0 %v11566_v2 }
 0x76a   : > { %9023 = vmatprep.subr.bf16.mxu0 %v12671_v34 }
 0x76c   : > { %8395 = vmatmul.mubr.f32.vlgmr.msra.gmra.mrb[116].mxu0 %v5575_v55 }
 0x76d   : > { %8397 = vmatprep.mubr.f32.mxu0 %v5576_v50  ;;  %9026 = vmatpush3.bf16.msk.msra.mxu0 %vm11110_vm5, %v11897_v33  ;;  %v12700_v50 = vld [vmem:[#allocation27_spill] sm:$0xff] }
 0x76e   : > { %9027 = vmatprep.subr.bf16.mxu0 %v12671_v34 }
 0x770   : > { %8398 = vmatmul.mubr.f32.gmra.mrb[118].mxu0 %v5577_v41 }
 0x771   : > { %8400 = vmatprep.mubr.f32.mxu0 %v5578_v30 }
 0x774   : > { %8401 = vmatmul.mubr.f32.gmra.mrb[120].mxu0 %v5579_v37  ;;  %v12701_v37 = vld [vmem:[#allocation31_spill] sm:$0xff] }
 0x775   : > { %8403 = vmatprep.mubr.f32.mxu0 %v5580_v44 }
 0x778   : > { %8404 = vmatmul.mubr.f32.gmra.mrb[122].mxu0 %v5581_v3 }
 0x779   : > { %8462 = vmatprep.mubr.msk.f32.mxu0 %vm9393_vm15, %v12689_v20 }
 0x77c   : > { %8463 = vmatmul.mubr.msk.f32.vlgmr.msra.gmra.mrb[124].mxu0 %vm3647_vm6, %v12692_v11 }
 0x77d   : > { %8481 = vmatprep.mubr.msk.f32.mxu0 %vm9393_vm15, %v12689_v20 }
 0x7d5   : > { %v11910_v2 = vpop.f32.mrb[100].mxu1 }
 0x7d6   : > { %v11912_v61 = vpop.f32.mrb[101].mxu1  ;;  %v5446_v15 = vmul.f32 %v11910_v2, %v12693_v38  ;;  %v5309_v42 = vmul.f32 %v11910_v2, %v12703_v0 }
 0x7d7   : > { %v5445_v5 = vmul.f32 %v11912_v61, %v12694_v48 }
 0x7d9   : > { %v11914_v59 = vpop.f32.mrb[102].mxu1 }
 0x7da   : > { %v11916_v49 = vpop.f32.mrb[103].mxu1  ;;  %v5448_v46 = vmul.f32 %v11914_v59, %v12696_v23 }
 0x7db   : > { %v5447_v14 = vmul.f32 %v11916_v49, %v12697_v40 }
 0x7dd   : > { %v11918_v53 = vpop.f32.mrb[104].mxu1 }
 0x7de   : > { %v11920_v31 = vpop.f32.mrb[105].mxu1  ;;  %v5450_v1 = vmul.f32 %v11918_v53, %v12699_v29 }
 0x7df   : > { %v5449_v58 = vmul.f32 %v11920_v31, %v12700_v50 }
 0x7e1   : > { %v11922_v28 = vpop.f32.mrb[106].mxu1 }
 0x7e2   : > { %v11924_v52 = vpop.f32.mrb[107].mxu1  ;;  %v5452_v30 = vmul.f32 %v11922_v28, %v12701_v37 }
 0x7e3   : > { %v5451_v18 = vmul.f32 %v11924_v52, %v12702_v63 }
 0x7ff   : > { %v8220_v17 = vpop.f32.mrb[100].mxu0 }
 0x800   : > { %v5132_v25 = vpop.f32.mrb[101].mxu0 }
 0x801   : > { %v8996_v36 = vpack.c.bf16 %v8220_v17, %v5132_v25  ;;  %v12704_v17 = vld [vmem:[#allocation9_spill] sm:$0xff] }
 0x802   : > { %v5308_v25 = vmul.f32 %v11912_v61, %v12704_v17 }
 0x803   : > { %8997 = vmatpush3.bf16.msra.mxu1 %v8996_v36 }
 0x804   : > { %8998 = vmatprep.subr.bf16.mxu1 %v12671_v34 }
 0x806   : > { %v8223_v12 = vpop.f32.mrb[102].mxu0 }
 0x807   : > { %v5142_v62 = vpop.f32.mrb[103].mxu0 }
 0x808   : > { %v8999_v27 = vpack.c.bf16 %v8223_v12, %v5142_v62 }
 0x80a   : > { %v8226_v54 = vpop.f32.mrb[104].mxu0  ;;  %9000 = vmatpush3.bf16.msra.mxu1 %v8999_v27 }
 0x80b   : > { %v5152_v47 = vpop.f32.mrb[105].mxu0  ;;  %9001 = vmatprep.subr.bf16.mxu1 %v12671_v34 }
 0x80c   : > { %v9002_v45 = vpack.c.bf16 %v8226_v54, %v5152_v47  ;;  %v12705_v54 = vld [vmem:[#allocation12_spill] sm:$0xff] }
 0x80d   : > { %v5311_v47 = vmul.f32 %v11914_v59, %v12705_v54 }
 0x80e   : > { %v8229_v13 = vpop.f32.mrb[106].mxu0  ;;  %9003 = vmatpush3.bf16.msra.mxu1 %v9002_v45 }
 0x80f   : > { %v5162_v43 = vpop.f32.mrb[107].mxu0  ;;  %9004 = vmatprep.subr.bf16.mxu1 %v12671_v34  ;;  %v8352_v19 = vpop.f32.mrb[108].mxu1 }
 0x810   : > { %v9005_v60 = vpack.c.bf16 %v8229_v13, %v5162_v43  ;;  %v5525_v32 = vadd.f32 %v8352_v19, %v5446_v15  ;;  %v5519_v6 = vpop.f32.mrb[109].mxu1  ;;  %v12706_v43 = vld [vmem:[#allocation11_spill] sm:$0xff] }
 0x811   : > { %v5520_v16 = vadd.f32 %v5519_v6, %v5445_v5 }
 0x812   : > { %9006 = vmatpush3.bf16.msra.mxu1 %v9005_v60  ;;  %v5310_v60 = vmul.f32 %v11916_v49, %v12706_v43 }
 0x813   : > { %9007 = vmatprep.subr.bf16.mxu1 %v12671_v34  ;;  %v9028_v24 = vpack.c.bf16 %v5525_v32, %v5520_v16  ;;  %v8355_v39 = vpop.f32.mrb[110].mxu1  ;;  %v12707_v32 = vld [vmem:[#allocation14_spill] sm:$0xff] }
 0x814   : > { %v5535_v8 = vadd.f32 %v8355_v39, %v5448_v46  ;;  %v5529_v55 = vpop.f32.mrb[111].mxu1  ;;  %v5313_v6 = vmul.f32 %v11918_v53, %v12707_v32 }
 0x815   : > { %8430 = vmatmul.mubr.msk.f32.vlgmr.msra.gmra.mrb[116].mxu1 %vm3219_vm3, %v12695_v4  ;;  %v5530_v9 = vadd.f32 %v5529_v55, %v5447_v14  ;;  %9029 = vmatpush3.bf16.msra.mxu0 %v9028_v24  ;;  %v12708_v24 = vld [vmem:[#allocation13_spill] sm:$0xff] }
 0x816   : > { %9010 = vmatpush3.bf16.msk.msra.mxu1 %vm11110_vm5, %v11897_v33  ;;  %8436 = vmatprep.mubr.msk.f32.mxu1 %vm9393_vm15, %v12689_v20  ;;  %v5312_v39 = vmul.f32 %v11920_v31, %v12708_v24 }
 0x817   : > { %9011 = vmatprep.subr.bf16.mxu1 %v12671_v34  ;;  %9030 = vmatprep.subr.bf16.mxu0 %v12671_v34  ;;  %v9031_v10 = vpack.c.bf16 %v5535_v8, %v5530_v9  ;;  %v8358_v41 = vpop.f32.mrb[112].mxu1  ;;  %v12709_v9 = vld [vmem:[#allocation16_spill] sm:$0xff] }
 0x818   : > { %v5545_v21 = vadd.f32 %v8358_v41, %v5450_v1  ;;  %v5539_v22 = vpop.f32.mrb[113].mxu1  ;;  %v12710_v41 = vld [vmem:[#allocation15_spill] sm:$0xff] }
 0x819   : > { %8437 = vmatmul.mubr.msk.f32.vlgmr.msra.gmra.mrb[118].mxu1 %vm3647_vm6, %v12698_v7  ;;  %v5540_v57 = vadd.f32 %v5539_v22, %v5449_v58  ;;  %9032 = vmatpush3.bf16.msra.mxu0 %v9031_v10  ;;  %v5315_v7 = vmul.f32 %v11922_v28, %v12709_v9  ;;  %v5314_v58 = vmul.f32 %v11924_v52, %v12710_v41 }
 0x81a   : > { %8455 = vmatprep.mubr.msk.f32.mxu1 %vm9393_vm15, %v12689_v20  ;;  %9033 = vmatprep.subr.bf16.mxu0 %v12671_v34 }
 0x81b   : > { %v9034_v51 = vpack.c.bf16 %v5545_v21, %v5540_v57  ;;  %v8361_v35 = vpop.f32.mrb[114].mxu1 }
 0x81c   : > { %v5555_v3 = vadd.f32 %v8361_v35, %v5452_v30  ;;  %v5549_v56 = vpop.f32.mrb[115].mxu1  ;;  %v12712_v35 = vld [vmem:[#allocation21_spill] sm:$0xff] }
 0x81d   : > { %v5550_v44 = vadd.f32 %v5549_v56, %v5451_v18  ;;  %9035 = vmatpush3.bf16.msra.mxu0 %v9034_v51  ;;  %v12711_v51 = vld [vmem:[#allocation126_spill] sm:$0xff]  ;;  %v5583_v18 = vmul.f32 %v11910_v2, %v12712_v35  ;;  %v12713_v56 = vld [vmem:[#allocation19_spill] sm:$0xff] }
 0x81e   : > { %9036 = vmatprep.subr.bf16.mxu0 %v12671_v34  ;;  %v12716_v2 = vld [vmem:[#allocation30_spill] sm:$0xff] }
 0x81f   : > { %v8308_v11 = vpop.f32.mrb[108].mxu0  ;;  %v9037_v36 = vpack.c.bf16 %v5555_v3, %v5550_v44  ;;  %v5582_v44 = vmul.f32 %v11912_v61, %v12713_v56 }
 0x820   : > { %v5388_v12 = vadd.f32 %v8308_v11, %v5309_v42  ;;  %v5382_v62 = vpop.f32.mrb[109].mxu0 }
 0x821   : > { %v5383_v27 = vadd.f32 %v5382_v62, %v5308_v25  ;;  %9038 = vmatpush3.bf16.msra.mxu0 %v9037_v36  ;;  %v12714_v25 = vld [vmem:[#allocation25_spill] sm:$0xff] }
 0x822   : > { %v5585_v36 = vmul.f32 %v11914_v59, %v12714_v25 }
 0x823   : > { %v9012_v45 = vpack.c.bf16 %v5388_v12, %v5383_v27  ;;  %v8311_v13 = vpop.f32.mrb[110].mxu0  ;;  %v12715_v27 = vld [vmem:[#allocation22_spill] sm:$0xff] }
 0x824   : > { %v5398_v15 = vadd.f32 %v8311_v13, %v5311_v47  ;;  %v5392_v19 = vpop.f32.mrb[111].mxu0  ;;  %8482 = vmatmul.mubr.msk.f32.vlgmr.msra.gmra.mrb[124].mxu0 %vm3219_vm3, %v12695_v4  ;;  %v5584_v47 = vmul.f32 %v11916_v49, %v12715_v27 }
 0x825   : > { %v5393_v5 = vadd.f32 %v5392_v19, %v5310_v60  ;;  %9013 = vmatpush3.bf16.msra.mxu1 %v9012_v45  ;;  %6418 = vmatprep.mubr.f32.mxu0 %v12689_v20 }
 0x826   : > { %9014 = vmatprep.subr.bf16.mxu1 %v12671_v34 }
 0x827   : > { %v9015_v16 = vpack.c.bf16 %v5398_v15, %v5393_v5  ;;  %v8314_v46 = vpop.f32.mrb[112].mxu0  ;;  %v5587_v15 = vmul.f32 %v11918_v53, %v12716_v2  ;;  %v12717_v5 = vld [vmem:[#allocation29_spill] sm:$0xff] }
 0x828   : > { %v5408_v14 = vadd.f32 %v8314_v46, %v5313_v6  ;;  %v5402_v8 = vpop.f32.mrb[113].mxu0  ;;  %v5586_v6 = vmul.f32 %v11920_v31, %v12717_v5 }
 0x829   : > { %v5403_v55 = vadd.f32 %v5402_v8, %v5312_v39  ;;  %9016 = vmatpush3.bf16.msra.mxu1 %v9015_v16  ;;  %v12718_v39 = vld [vmem:[#allocation32_spill] sm:$0xff] }
 0x82a   : > { %9017 = vmatprep.subr.bf16.mxu1 %v12671_v34  ;;  %v5589_v49 = vmul.f32 %v11922_v28, %v12718_v39  ;;  %v2770_v28 = vld [vmem:[%s12358_s15 + $0x8] sm:$0xff] }
 0x82b   : > { %v9018_v1 = vpack.c.bf16 %v5408_v14, %v5403_v55  ;;  %v8317_v10 = vpop.f32.mrb[114].mxu0  ;;  %v12719_v55 = vld [vmem:[#allocation28_spill] sm:$0xff] }
 0x82c   : > { %v5418_v21 = vadd.f32 %v8317_v10, %v5315_v7  ;;  %v5412_v22 = vpop.f32.mrb[115].mxu0  ;;  %v5588_v53 = vmul.f32 %v11924_v52, %v12719_v55  ;;  %v2772_v52 = vld [vmem:[%s12358_s15 + $0x18] sm:$0x3] }
 0x82d   : > { %v5413_v57 = vadd.f32 %v5412_v22, %v5314_v58  ;;  %9019 = vmatpush3.bf16.msra.mxu1 %v9018_v1  ;;  %v9055_v58 = vpack.c.bf16 %v2772_v52, %v2770_v28  ;;  %v2771_v22 = vld [vmem:[%s12358_s15 + $0x10] sm:$0x3] }
 0x82e   : > { %9020 = vmatprep.subr.bf16.mxu1 %v12671_v34 }
 0x82f   : > { %v9021_v30 = vpack.c.bf16 %v5418_v21, %v5413_v57  ;;  %v2769_v21 = vld [vmem:[%s12358_s15] sm:$0xff]  ;;  %9057 = vmatprep.subr.msk.bf16.mxu0 %vm11110_vm5, %v9055_v58 }
 0x830   : > { %v9058_v57 = vpack.c.bf16 %v2771_v22, %v2769_v21 }
 0x831   : > { %9022 = vmatpush3.bf16.msra.mxu1 %v9021_v30 }
 0x832   : > { %9039 = vmatprep.subr.bf16.mxu1 %v12671_v34  ;;  %9060 = vmatpush1.bf16.msk.msra.mxu0 %vm11110_vm5, %v9058_v57 }
 0x834   : > { %8456 = vmatmul.mubr.msk.f32.vlgmr.msra.gmra.mrb[118].mxu1 %vm3219_vm3, %v12695_v4 }
 0x835   : > { %9042 = vmatpush3.bf16.msk.msra.mxu1 %vm11110_vm5, %v11897_v33  ;;  %8488 = vmatprep.mubr.msk.f32.mxu1 %vm9393_vm15, %v12689_v20 }
 0x836   : > { %9043 = vmatprep.subr.bf16.mxu1 %v12671_v34 }
 0x838   : > { %8489 = vmatmul.mubr.msk.f32.vlgmr.msra.gmra.mrb[120].mxu1 %vm3647_vm6, %v12711_v51 }
 0x839   : > { %8507 = vmatprep.mubr.msk.f32.mxu1 %vm9393_vm15, %v12689_v20 }
 0x83f   : > { %v8396_v3 = vpop.f32.mrb[116].mxu0 }
 0x840   : > { %v5662_v42 = vadd.f32 %v8396_v3, %v5583_v18  ;;  %v5656_v33 = vpop.f32.mrb[117].mxu0 }
 0x841   : > { %v5657_v11 = vadd.f32 %v5656_v33, %v5582_v44 }
 0x843   : > { %v9044_v12 = vpack.c.bf16 %v5662_v42, %v5657_v11  ;;  %v8399_v62 = vpop.f32.mrb[118].mxu0 }
 0x844   : > { %v5672_v45 = vadd.f32 %v8399_v62, %v5585_v36  ;;  %v5666_v13 = vpop.f32.mrb[119].mxu0 }
 0x845   : > { %v5667_v60 = vadd.f32 %v5666_v13, %v5584_v47  ;;  %9045 = vmatpush3.bf16.msra.mxu1 %v9044_v12 }
 0x846   : > { %9046 = vmatprep.subr.bf16.mxu1 %v12671_v34 }
 0x847   : > { %v9047_v61 = vpack.c.bf16 %v5672_v45, %v5667_v60  ;;  %v8402_v19 = vpop.f32.mrb[120].mxu0 }
 0x848   : > { %v5682_v59 = vadd.f32 %v8402_v19, %v5587_v15  ;;  %v5676_v16 = vpop.f32.mrb[121].mxu0 }
 0x849   : > { %v5677_v46 = vadd.f32 %v5676_v16, %v5586_v6  ;;  %9048 = vmatpush3.bf16.msra.mxu1 %v9047_v61 }
 0x84a   : > { %9049 = vmatprep.subr.bf16.mxu1 %v12671_v34 }
 0x84b   : > { %v9050_v14 = vpack.c.bf16 %v5682_v59, %v5677_v46  ;;  %v8405_v8 = vpop.f32.mrb[122].mxu0 }
 0x84c   : > { %v5692_v7 = vadd.f32 %v8405_v8, %v5589_v49  ;;  %v5686_v1 = vpop.f32.mrb[123].mxu0 }
 0x84d   : > { %v5687_v10 = vadd.f32 %v5686_v1, %v5588_v53  ;;  %9051 = vmatpush3.bf16.msra.mxu1 %v9050_v14 }
 0x84e   : > { %9052 = vmatprep.subr.bf16.mxu1 %v12671_v34 }
 0x84f   : > { %v9053_v31 = vpack.c.bf16 %v5692_v7, %v5687_v10 }
 0x851   : > { %9054 = vmatpush3.bf16.msra.mxu1 %v9053_v31 }
 0x852   : > { %9063 = vmatprep.subr.msk.bf16.mxu1 %vm11110_vm5, %v9055_v58 }
 0x854   : > { %8508 = vmatmul.mubr.msk.f32.vlgmr.msra.gmra.mrb[120].mxu1 %vm3219_vm3, %v12695_v4 }
 0x855   : > { %6555 = vmatprep.mubr.f32.mxu1 %v12689_v20  ;;  %9066 = vmatpush1.bf16.msk.msra.mxu1 %vm11110_vm5, %v9058_v57 }
 0x856   : > { %9099 = vmatprep.subr.bf16.mxu1 %v12671_v34 }
 0x8e8   : > { %v5836_v30 = vpop.f32.mrb[116].mxu1 }
 0x8e9   : > { %v6265_v51 = vsel %vm3647_vm6, %v5836_v30, 0.0  ;;  %v8431_v18 = vpop.f32.mrb[117].mxu1 }
 0x8ea   : > { %v6266_v3 = vrot.slane %v6265_v51, 4 }
 0x8ec   : > { %v6267_v44 = vadd.f32 %v6266_v3, %v6265_v51 }
 0x8ee   : > { %v6268_v42 = vrot.slane %v6267_v44, 2 }
 0x8f0   : > { %v6269_v33 = vadd.f32 %v6268_v42, %v6267_v44 }
 0x8f2   : > { %v6270_v11 = vrot.slane %v6269_v33, 1 }
 0x8f4   : > { %v6271_v36 = vadd.f32 %v6270_v11, %v6269_v33 }
 0x8f6   : > { %v6272_v12 = vmul.f32 0.125, %v6271_v36 }
 0x8f7   : > { %v6121_v45 = vpop.f32.mrb[124].mxu0 }
 0x8f8   : > { %v6273_v62 = vsub.f32 %v5836_v30, %v6272_v12  ;;  %v8483_v13 = vpop.f32.mrb[125].mxu0  ;;  %v6287_v49 = vmul.f32 %v6121_v45, %v6121_v45  ;;  %v6757_v12 = vld [vmem:[%s12353_s10] sm:$0xff] }
 0x8fa   : > { %v6274_v47 = vmul.f32 %v6273_v62, %v6273_v62 }
 0x8fc   : > { %v6275_v60 = vsel %vm3647_vm6, %v6274_v47, 0.0 }
 0x8fd   : > { %v6276_v15 = vrot.slane %v6275_v60, 4 }
 0x8ff   : > { %v6277_v61 = vadd.f32 %v6276_v15, %v6275_v60 }
 0x901   : > { %v6278_v19 = vrot.slane %v6277_v61, 2 }
 0x903   : > { %v6279_v6 = vadd.f32 %v6278_v19, %v6277_v61 }
 0x905   : > { %v6280_v59 = vrot.slane %v6279_v6, 1 }
 0x907   : > { %v6281_v16 = vadd.f32 %v6280_v59, %v6279_v6  ;;  %v5981_v14 = vpop.f32.mrb[118].mxu1 }
 0x908   : > { %v6286_v53 = vmul.f32 %v5981_v14, %v5981_v14  ;;  %v8457_v7 = vpop.f32.mrb[119].mxu1 }
 0x909   : > { %v6282_v46 = vmul.f32 0.125, %v6281_v16 }
 0x90a   : > { %v6288_v1 = vadd.f32 %v6287_v49, %v6286_v53 }
 0x90b   : > { %v6283_v8 = vadd.f32 1e-05, %v6282_v46 }
 0x90d   : > { %9305 = vrsqrt.f32 %v6283_v8 }
 0x917   : > { %v9306_v10 = vpop.eup %9305 }
 0x918   : > { %v12041_v31 = vmul.f32 %v9306_v10, %v6273_v62  ;;  %v6758_v62 = vld [vmem:[%s12353_s10 + $0x8] sm:$0x3] }
 0x919   : > { %v9100_v6 = vpack.c.bf16 %v6758_v62, %v6757_v12  ;;  %v2777_v12 = vld [vmem:[%s12359_s16 + $0x20] sm:$0xff]  ;;  %v2778_v62 = vld [vmem:[%s12359_s16 + $0x28] sm:$0xff] }
 0x91a   : > { %7317 = vmatmul.mubr.msk.f32.vlgmr.msra.gmra.mrb[126].mxu0 %vm3647_vm6, %v12041_v31 }
 0x91b   : > { %6424 = vmatprep.mubr.f32.mxu0 %v12689_v20 }
 0x91e   : > { %7318 = vmatmul.mubr.msk.f32.gmra.mrb[128].mxu0 %vm3647_vm6, %v12041_v31 }
 0x91f   : > { %6430 = vmatprep.mubr.f32.mxu0 %v12689_v20 }
 0x922   : > { %7319 = vmatmul.mubr.msk.f32.gmra.mrb[130].mxu0 %vm3647_vm6, %v12041_v31 }
 0x923   : > { %6436 = vmatprep.mubr.f32.mxu0 %v12689_v20 }
 0x926   : > { %7320 = vmatmul.mubr.msk.f32.gmra.mrb[132].mxu0 %vm3647_vm6, %v12041_v31 }
 0x927   : > { %6442 = vmatprep.mubr.f32.mxu0 %v12689_v20  ;;  %v6261_v28 = vpop.f32.mrb[120].mxu1 }
 0x928   : > { %v6289_v52 = vmul.f32 %v6261_v28, %v6261_v28  ;;  %v8509_v58 = vpop.f32.mrb[121].mxu1 }
 0x92a   : > { %7321 = vmatmul.mubr.msk.f32.gmra.mrb[134].mxu0 %vm3647_vm6, %v12041_v31  ;;  %v6290_v21 = vadd.f32 %v6289_v52, %v6288_v1 }
 0x92b   : > { %6448 = vmatprep.mubr.f32.mxu0 %v12689_v20 }
 0x92c   : > { %v6291_v22 = vsel %vm3647_vm6, %v6290_v21, 0.0 }
 0x92d   : > { %v6292_v57 = vrot.slane %v6291_v22, 4 }
 0x92e   : > { %7322 = vmatmul.mubr.msk.f32.gmra.mrb[136].mxu0 %vm3647_vm6, %v12041_v31 }
 0x92f   : > { %6454 = vmatprep.mubr.f32.mxu0 %v12689_v20  ;;  %v6293_v30 = vadd.f32 %v6292_v57, %v6291_v22  ;;  %v2791_v57 = vld [vmem:[%s12359_s16 + $0x90] sm:$0xff] }
 0x931   : > { %v6294_v51 = vrot.slane %v6293_v30, 2 }
 0x932   : > { %7323 = vmatmul.mubr.msk.f32.gmra.mrb[138].mxu0 %vm3647_vm6, %v12041_v31 }
 0x933   : > { %6460 = vmatprep.mubr.f32.mxu0 %v12689_v20  ;;  %v6295_v18 = vadd.f32 %v6294_v51, %v6293_v30  ;;  %v2792_v30 = vld [vmem:[%s12359_s16 + $0x98] sm:$0xff] }
 0x935   : > { %v6296_v3 = vrot.slane %v6295_v18, 1 }
 0x936   : > { %7324 = vmatmul.mubr.msk.f32.gmra.mrb[140].mxu0 %vm3647_vm6, %v12041_v31 }
 0x937   : > { %v6297_v44 = vadd.f32 %v6296_v3, %v6295_v18  ;;  %v9071_v18 = vpack.c.bf16 %v2792_v30, %v2791_v57  ;;  %v2775_v3 = vld [vmem:[%s12359_s16 + $0x10] sm:$0xff]  ;;  %v12725_v57 = vld [vmem:[#allocation89_spill] sm:$0xff] }
 0x938   : > { %v2668_v30 = vmul.f32 0.2236068, %v12725_v57  ;;  %v12739_v57 = vld [vmem:[#allocation82_spill] sm:$0xff] }
 0x939   : > { %v6298_v42 = vmul.f32 0.125, %v6297_v44  ;;  %v2776_v44 = vld [vmem:[%s12359_s16 + $0x18] sm:$0xff] }
 0x93b   : > { %v6299_v33 = vmul.f32 0.33333334, %v6298_v42  ;;  %v2793_v42 = vld [vmem:[%s12359_s16 + $0xa0] sm:$0xff] }
 0x93d   : > { %v6300_v11 = vadd.f32 1e-05, %v6299_v33  ;;  %v2794_v33 = vld [vmem:[%s12359_s16 + $0xa8] sm:$0xff] }
 0x93f   : > { %9307 = vrsqrt.f32 %v6300_v11  ;;  %v9073_v11 = vpack.c.bf16 %v2776_v44, %v2775_v3 }
 0x949   : > { %v9308_v36 = vpop.eup %9307 }
 0x94a   : > { %v6302_v47 = vmul.f32 %v9308_v36, %v5981_v14  ;;  %v6303_v13 = vmul.f32 %v9308_v36, %v6121_v45  ;;  %v6304_v60 = vmul.f32 %v9308_v36, %v6261_v28  ;;  %v9075_v36 = vpack.c.bf16 %v2794_v33, %v2793_v42  ;;  %v12726_v42 = vld [vmem:[#allocation64_spill] sm:$0xff] }
 0x94b   : > { %v2678_v33 = vmul.f32 0.2236068, %v12726_v42 }
 0x94c   : > { %v6305_v15 = vmul.f32 %v6302_v47, %v12704_v17  ;;  %v6313_v61 = vmul.f32 %v6303_v13, %v12694_v48  ;;  %v6306_v19 = vmul.f32 %v6302_v47, %v12703_v0  ;;  %v6329_v59 = vmul.f32 %v6304_v60, %v12713_v56 }
 0x94d   : > { %v6314_v16 = vmul.f32 %v6303_v13, %v12693_v38  ;;  %v6307_v46 = vmul.f32 %v6302_v47, %v12706_v43  ;;  %v6315_v49 = vmul.f32 %v6303_v13, %v12697_v40  ;;  %v6330_v14 = vmul.f32 %v6304_v60, %v12712_v35 }
 0x94e   : > { %v6321_v8 = vadd.f32 %v6313_v61, %v6305_v15  ;;  %v6308_v45 = vmul.f32 %v6302_v47, %v12705_v54  ;;  %v6316_v17 = vmul.f32 %v6303_v13, %v12696_v23  ;;  %v6331_v0 = vmul.f32 %v6304_v60, %v12715_v27  ;;  %v2779_v61 = vld [vmem:[%s12359_s16 + $0x30] sm:$0xff] }
 0x94f   : > { %v6322_v53 = vadd.f32 %v6314_v16, %v6306_v19  ;;  %v6323_v48 = vadd.f32 %v6315_v49, %v6307_v46  ;;  %v6309_v7 = vmul.f32 %v6302_v47, %v12708_v24  ;;  %v6332_v38 = vmul.f32 %v6304_v60, %v12714_v25  ;;  %v2780_v19 = vld [vmem:[%s12359_s16 + $0x38] sm:$0xff]  ;;  %v2781_v49 = vld [vmem:[%s12359_s16 + $0x40] sm:$0xff] }
 0x950   : > { %v6337_v56 = vadd.f32 %v6329_v59, %v6321_v8  ;;  %v6324_v1 = vadd.f32 %v6316_v17, %v6308_v45  ;;  %v6317_v43 = vmul.f32 %v6303_v13, %v12700_v50  ;;  %v6310_v35 = vmul.f32 %v6302_v47, %v12707_v32  ;;  %v2798_v59 = vld [vmem:[%s12359_s16 + $0xc8] sm:$0xff]  ;;  %v2800_v45 = vld [vmem:[%s12359_s16 + $0xd8] sm:$0xff] }
 0x951   : > { %v6338_v40 = vadd.f32 %v6330_v14, %v6322_v53  ;;  %v6339_v10 = vadd.f32 %v6331_v0, %v6323_v48  ;;  %v6318_v54 = vmul.f32 %v6303_v13, %v12699_v29  ;;  %v6333_v27 = vmul.f32 %v6304_v60, %v12717_v5  ;;  %v2782_v8 = vld [vmem:[%s12359_s16 + $0x48] sm:$0xff]  ;;  %v2799_v14 = vld [vmem:[%s12359_s16 + $0xd0] sm:$0xff]  ;;  %v2784_v0 = vld [vmem:[%s12359_s16 + $0x58] sm:$0xff] }
 0x952   : > { %7327 = vmatmul.mubr.msk.f32.vlgmr.msra.gmra.mrb[122].mxu1 %vm3647_vm6, %v6337_v56  ;;  %v6340_v23 = vadd.f32 %v6332_v38, %v6324_v1  ;;  %v6325_v28 = vadd.f32 %v6317_v43, %v6309_v7  ;;  %v6311_v24 = vmul.f32 %v6302_v47, %v12710_v41  ;;  %v6334_v25 = vmul.f32 %v6304_v60, %v12716_v2  ;;  %v2783_v48 = vld [vmem:[%s12359_s16 + $0x50] sm:$0xff]  ;;  %v2801_v7 = vld [vmem:[%s12359_s16 + $0xe0] sm:$0xff]  ;;  %v2802_v56 = vld [vmem:[%s12359_s16 + $0xe8] sm:$0xff] }
 0x953   : > { %6561 = vmatprep.mubr.f32.mxu1 %v12689_v20  ;;  %v6326_v52 = vadd.f32 %v6318_v54, %v6310_v35  ;;  %v6319_v50 = vmul.f32 %v6303_v13, %v12702_v63  ;;  %v6312_v58 = vmul.f32 %v6302_v47, %v12709_v9  ;;  %v6320_v29 = vmul.f32 %v6303_v13, %v12701_v37  ;;  %v2790_v37 = vld [vmem:[%s12359_s16 + $0x88] sm:$0xff]  ;;  %v2795_v47 = vld [vmem:[%s12359_s16 + $0xb0] sm:$0xff]  ;;  %v2796_v13 = vld [vmem:[%s12359_s16 + $0xb8] sm:$0xff] }
 0x954   : > { %v6341_v32 = vadd.f32 %v6333_v27, %v6325_v28  ;;  %9102 = vmatpush3.bf16.msk.msra.mxu1 %vm11110_vm5, %v9100_v6  ;;  %v6335_v5 = vmul.f32 %v6304_v60, %v12719_v55  ;;  %v6336_v2 = vmul.f32 %v6304_v60, %v12718_v39  ;;  %v2773_v39 = vld [vmem:[%s12359_s16] sm:$0xff]  ;;  %v9067_v55 = vpack.c.bf16 %v2790_v37, %v2789_v26  ;;  %v2803_v35 = vld [vmem:[%s12359_s16 + $0xf0] sm:$0xff]  ;;  %v2804_v54 = vld [vmem:[%s12359_s16 + $0xf8] sm:$0xff] }
 0x955   : > { %v6342_v21 = vadd.f32 %v6334_v25, %v6326_v52  ;;  %v6327_v22 = vadd.f32 %v6319_v50, %v6311_v24  ;;  %9103 = vmatprep.subr.bf16.mxu1 %v12671_v34  ;;  %v6328_v41 = vadd.f32 %v6320_v29, %v6312_v58  ;;  %v9077_v60 = vpack.c.bf16 %v2778_v62, %v2777_v12  ;;  %v2797_v6 = vld [vmem:[%s12359_s16 + $0xc0] sm:$0xff]  ;;  %v2787_v28 = vld [vmem:[%s12359_s16 + $0x70] sm:$0xff]  ;;  %v2788_v27 = vld [vmem:[%s12359_s16 + $0x78] sm:$0xff] }
 0x956   : > { %7328 = vmatmul.mubr.msk.f32.gmra.mrb[124].mxu1 %vm3647_vm6, %v6338_v40  ;;  %9068 = vmatprep.subr.bf16.mxu0 %v9067_v55  ;;  %v9079_v15 = vpack.c.bf16 %v2796_v13, %v2795_v47  ;;  %v9081_v16 = vpack.c.bf16 %v2780_v19, %v2779_v61  ;;  %v9083_v46 = vpack.c.bf16 %v2798_v59, %v2797_v6  ;;  %v2785_v43 = vld [vmem:[%s12359_s16 + $0x60] sm:$0xff]  ;;  %v2786_v40 = vld [vmem:[%s12359_s16 + $0x68] sm:$0xff] }
 0x957   : > { %6567 = vmatprep.mubr.f32.mxu1 %v12689_v20  ;;  %v6343_v63 = vadd.f32 %v6335_v5, %v6327_v22  ;;  %v6344_v9 = vadd.f32 %v6336_v2, %v6328_v41  ;;  %v9085_v17 = vpack.c.bf16 %v2782_v8, %v2781_v49  ;;  %v9087_v53 = vpack.c.bf16 %v2800_v45, %v2799_v14  ;;  %v12720_v52 = vld [vmem:[#allocation52_spill] sm:$0xff]  ;;  %v12721_v50 = vld [vmem:[#allocation81_spill] sm:$0xff]  ;;  %v12731_v14 = vld [vmem:[#allocation99_spill] sm:$0xff] }
 0x958   : > { %v9089_v1 = vpack.c.bf16 %v2784_v0, %v2783_v48  ;;  %v9091_v38 = vpack.c.bf16 %v2802_v56, %v2801_v7  ;;  %v9097_v24 = vpack.c.bf16 %v2788_v27, %v2787_v28  ;;  %v2645_v25 = vmul.f32 0.2236068, %v12720_v52  ;;  %v12722_v5 = vld [vmem:[#allocation56_spill] sm:$0xff]  ;;  %v12723_v2 = vld [vmem:[#allocation85_spill] sm:$0xff]  ;;  %v12735_v28 = vld [vmem:[#allocation103_spill] sm:$0xff] }
 0x959   : > { %v2646_v58 = vmul.f32 0.2236068, %v12721_v50  ;;  %v2656_v41 = vmul.f32 0.2236068, %v12722_v5  ;;  %v12724_v55 = vld [vmem:[#allocation60_spill] sm:$0xff]  ;;  %v12729_v61 = vld [vmem:[#allocation97_spill] sm:$0xff] }
 0x95a   : > { %7329 = vmatmul.mubr.msk.f32.gmra.mrb[126].mxu1 %vm3647_vm6, %v6339_v10  ;;  %v9093_v10 = vpack.c.bf16 %v2786_v40, %v2785_v43  ;;  %v2690_v19 = vmul.f32 0.2236068, %v12729_v61  ;;  %v12730_v49 = vld [vmem:[#allocation72_spill] sm:$0xff]  ;;  %v2701_v45 = vmul.f32 0.2236068, %v12731_v14  ;;  %v12743_v14 = vld [vmem:[#allocation86_spill] sm:$0xff] }
 0x95b   : > { %6573 = vmatprep.mubr.f32.mxu1 %v12689_v20  ;;  %v2700_v8 = vmul.f32 0.2236068, %v12730_v49  ;;  %v12732_v7 = vld [vmem:[#allocation76_spill] sm:$0xff]  ;;  %v2723_v27 = vmul.f32 0.2236068, %v12735_v28 }
 0x95c   : > { %v2711_v56 = vmul.f32 0.2236068, %v12732_v7 }
 0x95e   : > { %7330 = vmatmul.mubr.msk.f32.gmra.mrb[128].mxu1 %vm3647_vm6, %v6340_v23  ;;  %v9095_v23 = vpack.c.bf16 %v2804_v54, %v2803_v35  ;;  %v12734_v54 = vld [vmem:[#allocation80_spill] sm:$0xff] }
 0x95f   : > { %6579 = vmatprep.mubr.f32.mxu1 %v12689_v20 }
 0x962   : > { %7331 = vmatmul.mubr.msk.f32.gmra.mrb[130].mxu1 %vm3647_vm6, %v6341_v32 }
 0x963   : > { %6585 = vmatprep.mubr.f32.mxu1 %v12689_v20 }
 0x966   : > { %7332 = vmatmul.mubr.msk.f32.gmra.mrb[132].mxu1 %vm3647_vm6, %v6342_v21 }
 0x967   : > { %6591 = vmatprep.mubr.f32.mxu1 %v12689_v20 }
 0x96a   : > { %7333 = vmatmul.mubr.msk.f32.gmra.mrb[134].mxu1 %vm3647_vm6, %v6343_v63  ;;  %v2657_v63 = vmul.f32 0.2236068, %v12723_v2 }
 0x96b   : > { %6597 = vmatprep.mubr.f32.mxu1 %v12689_v20 }
 0x96e   : > { %7334 = vmatmul.mubr.msk.f32.gmra.mrb[136].mxu1 %vm3647_vm6, %v6344_v9 }
 0x96f   : > { %8514 = vmatprep.mubr.msk.f32.mxu1 %vm9393_vm15, %v12689_v20 }
 0x972   : > { %8515 = vmatmul.mubr.msk.f32.vlgmr.msra.gmra.mrb[138].mxu1 %vm3647_vm6, %v12041_v31  ;;  %v2774_v31 = vld [vmem:[%s12359_s16 + $0x8] sm:$0xff] }
 0x973   : > { %8533 = vmatprep.mubr.msk.f32.mxu1 %vm9393_vm15, %v12689_v20  ;;  %v9069_v51 = vpack.c.bf16 %v2774_v31, %v2773_v39  ;;  %v2667_v31 = vmul.f32 0.2236068, %v12724_v55 }
 0x975   : > { %9070 = vmatpush3.bf16.msra.mxu0 %v9069_v51 }
 0x976   : > { %9072 = vmatprep.subr.bf16.mxu0 %v9071_v18 }
 0x979   : > { %9074 = vmatpush3.bf16.msra.mxu0 %v9073_v11  ;;  %v12727_v11 = vld [vmem:[#allocation93_spill] sm:$0xff] }
 0x97a   : > { %9076 = vmatprep.subr.bf16.mxu0 %v9075_v36  ;;  %v2679_v36 = vmul.f32 0.2236068, %v12727_v11 }
 0x97d   : > { %9078 = vmatpush3.bf16.msra.mxu0 %v9077_v60  ;;  %v12728_v60 = vld [vmem:[#allocation68_spill] sm:$0xff] }
 0x97e   : > { %9080 = vmatprep.subr.bf16.mxu0 %v9079_v15  ;;  %v2689_v15 = vmul.f32 0.2236068, %v12728_v60  ;;  %v12741_v60 = vld [vmem:[#allocation88_spill] sm:$0xff] }
 0x981   : > { %9082 = vmatpush3.bf16.msra.mxu0 %v9081_v16 }
 0x982   : > { %9084 = vmatprep.subr.bf16.mxu0 %v9083_v46 }
 0x985   : > { %9086 = vmatpush3.bf16.msra.mxu0 %v9085_v17 }
 0x986   : > { %9088 = vmatprep.subr.bf16.mxu0 %v9087_v53 }
 0x989   : > { %9090 = vmatpush3.bf16.msra.mxu0 %v9089_v1  ;;  %v12733_v1 = vld [vmem:[#allocation101_spill] sm:$0xff] }
 0x98a   : > { %9092 = vmatprep.subr.bf16.mxu0 %v9091_v38  ;;  %v2712_v38 = vmul.f32 0.2236068, %v12733_v1  ;;  %v12744_v1 = vld [vmem:[#allocation98_spill] sm:$0xff] }
 0x98d   : > { %9094 = vmatpush3.bf16.msra.mxu0 %v9093_v10 }
 0x98e   : > { %9096 = vmatprep.subr.bf16.mxu0 %v9095_v23  ;;  %v2722_v23 = vmul.f32 0.2236068, %v12734_v54 }
 0x991   : > { %9098 = vmatpush3.bf16.msra.mxu0 %v9097_v24 }
 0x992   : > { %8536 = vmatprep.subr.mxu0 %v12689_v20 }
 0x9ed   : > { %v6420_v32 = vpop.f32.mrb[126].mxu0 }
 0x9ee   : > { %v6604_v29 = vmul.f32 %v6420_v32, %v2645_v25  ;;  %v6422_v21 = vpop.f32.mrb[127].mxu0 }
 0x9ef   : > { %v6605_v22 = vmul.f32 %v6422_v21, %v2646_v58  ;;  %v12736_v58 = vld [vmem:[#allocation83_spill] sm:$0xff]  ;;  %v12737_v21 = vld [vmem:[#allocation84_spill] sm:$0xff] }
 0x9f0   : > { %v2647_v32 = vmul.f32 0.2236068, %v12736_v58  ;;  %v2648_v5 = vmul.f32 0.2236068, %v12737_v21  ;;  %v12747_v58 = vld [vmem:[#allocation90_spill] sm:$0xff] }
 0x9f1   : > { %v6426_v9 = vpop.f32.mrb[128].mxu0 }
 0x9f2   : > { %v6606_v26 = vmul.f32 %v6426_v9, %v2656_v41  ;;  %v6428_v37 = vpop.f32.mrb[129].mxu0 }
 0x9f3   : > { %v6607_v39 = vmul.f32 %v6428_v37, %v2657_v63  ;;  %v12738_v37 = vld [vmem:[#allocation87_spill] sm:$0xff] }
 0x9f4   : > { %v2658_v55 = vmul.f32 0.2236068, %v12738_v37  ;;  %v12749_v37 = vld [vmem:[#allocation96_spill] sm:$0xff] }
 0x9f5   : > { %v6432_v51 = vpop.f32.mrb[130].mxu0 }
 0x9f6   : > { %v6608_v18 = vmul.f32 %v6432_v51, %v2667_v31  ;;  %v6434_v3 = vpop.f32.mrb[131].mxu0 }
 0x9f7   : > { %v6609_v44 = vmul.f32 %v6434_v3, %v2668_v30  ;;  %v2659_v30 = vmul.f32 0.2236068, %v12739_v57 }
 0x9f9   : > { %v6438_v12 = vpop.f32.mrb[132].mxu0 }
 0x9fa   : > { %v12226_v62 = vmul.f32 %v6438_v12, %v2678_v33  ;;  %v6440_v47 = vpop.f32.mrb[133].mxu0 }
 0x9fb   : > { %v12228_v13 = vmul.f32 %v6440_v47, %v2679_v36  ;;  %v12740_v36 = vld [vmem:[#allocation91_spill] sm:$0xff] }
 0x9fc   : > { %v2669_v12 = vmul.f32 0.2236068, %v12740_v36 }
 0x9fd   : > { %v6444_v6 = vpop.f32.mrb[134].mxu0 }
 0x9fe   : > { %v12232_v59 = vmul.f32 %v6444_v6, %v2689_v15  ;;  %v6446_v16 = vpop.f32.mrb[135].mxu0  ;;  %v2670_v15 = vmul.f32 0.2236068, %v12741_v60 }
 0x9ff   : > { %v12234_v46 = vmul.f32 %v6446_v16, %v2690_v19 }
 0xa01   : > { %v6450_v17 = vpop.f32.mrb[136].mxu0 }
 0xa02   : > { %v12238_v53 = vmul.f32 %v6450_v17, %v2700_v8  ;;  %v6452_v48 = vpop.f32.mrb[137].mxu0 }
 0xa03   : > { %v12240_v0 = vmul.f32 %v6452_v48, %v2701_v45  ;;  %v2681_v45 = vmul.f32 0.2236068, %v12743_v14 }
 0xa05   : > { %v6456_v43 = vpop.f32.mrb[138].mxu0 }
 0xa06   : > { %v12244_v40 = vmul.f32 %v6456_v43, %v2711_v56  ;;  %v6458_v10 = vpop.f32.mrb[139].mxu0  ;;  %v12745_v43 = vld [vmem:[#allocation92_spill] sm:$0xff] }
 0xa07   : > { %v12246_v35 = vmul.f32 %v6458_v10, %v2712_v38  ;;  %v2691_v38 = vmul.f32 0.2236068, %v12744_v1  ;;  %v2692_v10 = vmul.f32 0.2236068, %v12745_v43 }
 0xa09   : > { %v6462_v24 = vpop.f32.mrb[140].mxu0 }
 0xa0a   : > { %v12250_v52 = vmul.f32 %v6462_v24, %v2722_v23  ;;  %v6464_v25 = vpop.f32.mrb[141].mxu0 }
 0xa0b   : > { %v12252_v50 = vmul.f32 %v6464_v25, %v2723_v27 }
 0xa25   : > { %v6557_v41 = vpop.f32.mrb[122].mxu1 }
 0xa26   : > { %v6620_v2 = vmul.f32 %v6557_v41, %v2647_v32  ;;  %v6559_v63 = vpop.f32.mrb[123].mxu1  ;;  %v2703_v32 = vmul.f32 0.2236068, %v12747_v58 }
 0xa27   : > { %v6621_v9 = vmul.f32 %v6559_v63, %v2648_v5 }
 0xa28   : > { %v6636_v31 = vadd.f32 %v6620_v2, %v6604_v29  ;;  %v12742_v29 = vld [vmem:[#allocation95_spill] sm:$0xff] }
 0xa29   : > { %v6637_v51 = vadd.f32 %v6621_v9, %v6605_v22  ;;  %v6563_v3 = vpop.f32.mrb[124].mxu1  ;;  %v2680_v8 = vmul.f32 0.2236068, %v12742_v29 }
 0xa2a   : > { %v6622_v42 = vmul.f32 %v6563_v3, %v2658_v55  ;;  %v6565_v33 = vpop.f32.mrb[125].mxu1  ;;  %v2714_v55 = vmul.f32 0.2236068, %v12749_v37 }
 0xa2b   : > { %v6623_v11 = vmul.f32 %v6565_v33, %v2659_v30  ;;  %6716 = vmatprep.mubr.f32.mxu0 %v6637_v51  ;;  %v12751_v33 = vld [vmem:[#allocation94_spill] sm:$0xff] }
 0xa2c   : > { %v6638_v47 = vadd.f32 %v6622_v42, %v6606_v26  ;;  %6717 = vmatmul.mubr.f32.vlgmr.msra.gmra.mrb[142].mxu0 %v6636_v31 }
 0xa2d   : > { %v6639_v61 = vadd.f32 %v6623_v11, %v6607_v39  ;;  %v6569_v19 = vpop.f32.mrb[126].mxu1  ;;  %v2725_v11 = vmul.f32 0.2236068, %v12751_v33 }
 0xa2e   : > { %v6624_v6 = vmul.f32 %v6569_v19, %v2669_v12  ;;  %v6571_v16 = vpop.f32.mrb[127].mxu1 }
 0xa2f   : > { %v6625_v49 = vmul.f32 %v6571_v16, %v2670_v15  ;;  %6721 = vmatprep.mubr.f32.mxu0 %v6639_v61 }
 0xa30   : > { %v6640_v22 = vadd.f32 %v6624_v6, %v6608_v18  ;;  %6722 = vmatmul.mubr.f32.gmra.mrb[144].mxu0 %v6638_v47 }
 0xa31   : > { %v6641_v17 = vadd.f32 %v6625_v49, %v6609_v44  ;;  %v6575_v48 = vpop.f32.mrb[128].mxu1  ;;  %v12746_v44 = vld [vmem:[#allocation100_spill] sm:$0xff] }
 0xa32   : > { %v6626_v7 = vmul.f32 %v6575_v48, %v2680_v8  ;;  %v6577_v56 = vpop.f32.mrb[129].mxu1  ;;  %v2702_v24 = vmul.f32 0.2236068, %v12746_v44 }
 0xa33   : > { %v6627_v26 = vmul.f32 %v6577_v56, %v2681_v45  ;;  %6726 = vmatprep.mubr.f32.mxu0 %v6641_v17 }
 0xa34   : > { %v6642_v39 = vadd.f32 %v6626_v7, %v12226_v62  ;;  %6727 = vmatmul.mubr.f32.gmra.mrb[146].mxu0 %v6640_v22 }
 0xa35   : > { %v6643_v54 = vadd.f32 %v6627_v26, %v12228_v13  ;;  %v6581_v23 = vpop.f32.mrb[130].mxu1  ;;  %v12748_v13 = vld [vmem:[#allocation102_spill] sm:$0xff] }
 0xa36   : > { %v6628_v18 = vmul.f32 %v6581_v23, %v2691_v38  ;;  %v6583_v28 = vpop.f32.mrb[131].mxu1  ;;  %v2713_v63 = vmul.f32 0.2236068, %v12748_v13 }
 0xa37   : > { %v6629_v27 = vmul.f32 %v6583_v28, %v2692_v10  ;;  %6731 = vmatprep.mubr.f32.mxu0 %v6643_v54 }
 0xa38   : > { %v6644_v25 = vadd.f32 %v6628_v18, %v12232_v59  ;;  %6732 = vmatmul.mubr.f32.gmra.mrb[148].mxu0 %v6642_v39 }
 0xa39   : > { %v6645_v21 = vadd.f32 %v6629_v27, %v12234_v46  ;;  %v6587_v62 = vpop.f32.mrb[132].mxu1  ;;  %v12750_v46 = vld [vmem:[#allocation104_spill] sm:$0xff] }
 0xa3a   : > { %v6630_v5 = vmul.f32 %v6587_v62, %v2702_v24  ;;  %v6589_v41 = vpop.f32.mrb[133].mxu1  ;;  %v2724_v3 = vmul.f32 0.2236068, %v12750_v46 }
 0xa3b   : > { %v6631_v2 = vmul.f32 %v6589_v41, %v2703_v32  ;;  %6736 = vmatprep.mubr.f32.mxu0 %v6645_v21 }
 0xa3c   : > { %v6646_v9 = vadd.f32 %v6630_v5, %v12238_v53  ;;  %6737 = vmatmul.mubr.f32.gmra.mrb[150].mxu0 %v6644_v25 }
 0xa3d   : > { %v6647_v31 = vadd.f32 %v6631_v2, %v12240_v0  ;;  %v6593_v59 = vpop.f32.mrb[134].mxu1 }
 0xa3e   : > { %v6632_v57 = vmul.f32 %v6593_v59, %v2713_v63  ;;  %v6595_v30 = vpop.f32.mrb[135].mxu1 }
 0xa3f   : > { %v6633_v51 = vmul.f32 %v6595_v30, %v2714_v55  ;;  %6741 = vmatprep.mubr.f32.mxu0 %v6647_v31 }
 0xa40   : > { %v6648_v42 = vadd.f32 %v6632_v57, %v12244_v40  ;;  %6742 = vmatmul.mubr.f32.gmra.mrb[152].mxu0 %v6646_v9 }
 0xa41   : > { %v6649_v36 = vadd.f32 %v6633_v51, %v12246_v35  ;;  %v6599_v53 = vpop.f32.mrb[136].mxu1  ;;  %v6923_v51 = vld [vmem:[%s596_s0] sm:$0x3]  ;;  %s9326_s0 = scalar_lea.vmem %s9325_s26, 64 }
 0xa42   : > { %v6634_v12 = vmul.f32 %v6599_v53, %v2724_v3  ;;  %v6601_v47 = vpop.f32.mrb[137].mxu1  ;;  %p9328_p1 = scmp.lt.s32.totalorder %s9326_s0, %s9320_s4 }
 0xa43   : > { %v6635_v60 = vmul.f32 %v6601_v47, %v2725_v11  ;;  %6746 = vmatprep.mubr.f32.mxu0 %v6649_v36 }
 0xa44   : > { %v6650_v0 = vadd.f32 %v6634_v12, %v12250_v52  ;;  %6747 = vmatmul.mubr.f32.gmra.mrb[154].mxu0 %v6648_v42  ;;  %p9329_p2 = por %p9328_p1, %p9327_p0 }
 0xa45   : > { %v6651_v15 = vadd.f32 %v6635_v60, %v12252_v50 }
 0xa46   : > { %p9330_p3 = pnand %p9329_p2, %p9323_p13 }
 0xa47   : > { %6751 = vmatprep.mubr.f32.mxu0 %v6651_v15 }
 0xa48   : > { %6752 = vmatmul.mubr.f32.gmra.mrb[156].mxu0 %v6650_v0 }
 0xa49   : > { %8538 = vmatprep.mubr.msk.f32.mxu0 %vm9393_vm15, %v12689_v20 }
 0xaff   : > { %v7763_v40 = vpop.f32.mrb[142].mxu0 }
 0xb00   : > { %v7764_v61 = vpop.f32.mrb[143].mxu0 }
 0xb01   : > { %v7765_v19 = vadd.f32 %v7764_v61, %v7763_v40 }
 0xb03   : > { %v7766_v6 = vpop.f32.mrb[144].mxu0 }
 0xb04   : > { %v7767_v35 = vpop.f32.mrb[145].mxu0 }
 0xb05   : > { %v7768_v16 = vadd.f32 %v7767_v35, %v7766_v6 }
 0xb07   : > { %v9104_v49 = vpack.c.bf16 %v7768_v16, %v7765_v19  ;;  %v7769_v29 = vpop.f32.mrb[146].mxu0 }
 0xb08   : > { %v7770_v8 = vpop.f32.mrb[147].mxu0 }
 0xb09   : > { %v7771_v22 = vadd.f32 %v7770_v8, %v7769_v29  ;;  %9105 = vmatpush3.bf16.msra.mxu1 %v9104_v49 }
 0xb0a   : > { %9106 = vmatprep.subr.bf16.mxu1 %v12671_v34 }
 0xb0b   : > { %v7772_v52 = vpop.f32.mrb[148].mxu0 }
 0xb0c   : > { %v7773_v50 = vpop.f32.mrb[149].mxu0 }
 0xb0d   : > { %v7774_v14 = vadd.f32 %v7773_v50, %v7772_v52 }
 0xb0f   : > { %v9107_v45 = vpack.c.bf16 %v7774_v14, %v7771_v22  ;;  %v7775_v17 = vpop.f32.mrb[150].mxu0 }
 0xb10   : > { %v7776_v48 = vpop.f32.mrb[151].mxu0 }
 0xb11   : > { %v7777_v20 = vadd.f32 %v7776_v48, %v7775_v17  ;;  %9108 = vmatpush3.bf16.msra.mxu1 %v9107_v45 }
 0xb12   : > { %9109 = vmatprep.subr.bf16.mxu1 %v12671_v34 }
 0xb13   : > { %v7778_v7 = vpop.f32.mrb[152].mxu0 }
 0xb14   : > { %v7779_v56 = vpop.f32.mrb[153].mxu0 }
 0xb15   : > { %v7780_v26 = vadd.f32 %v7779_v56, %v7778_v7 }
 0xb17   : > { %v9110_v1 = vpack.c.bf16 %v7780_v26, %v7777_v20  ;;  %v7781_v38 = vpop.f32.mrb[154].mxu0 }
 0xb18   : > { %v7782_v39 = vpop.f32.mrb[155].mxu0 }
 0xb19   : > { %v7783_v43 = vadd.f32 %v7782_v39, %v7781_v38  ;;  %9111 = vmatpush3.bf16.msra.mxu1 %v9110_v1 }
 0xb1a   : > { %9112 = vmatprep.subr.bf16.mxu1 %v12671_v34 }
 0xb1b   : > { %v7784_v10 = vpop.f32.mrb[156].mxu0 }
 0xb1c   : > { %v7785_v54 = vpop.f32.mrb[157].mxu0 }
 0xb1d   : > { %v7786_v23 = vadd.f32 %v7785_v54, %v7784_v10 }
 0xb1f   : > { %v9113_v18 = vpack.c.bf16 %v7786_v23, %v7783_v43 }
 0xb21   : > { %9114 = vmatpush3.bf16.msra.mxu1 %v9113_v18 }
 0xb24   : > { %8534 = vmatmul.mubr.msk.f32.vlgmr.msra.gmra.mrb[138].mxu1 %vm3219_vm3, %v12695_v4 }
 0xbf7   : > { %v6898_v28 = vpop.f32.mrb[138].mxu1 }
 0xbf8   : > { %v6902_v27 = vsel %vm1500_vm9, %v6898_v28, 0.0  ;;  %v8535_v44 = vpop.f32.mrb[139].mxu1 }
 0xbf9   : > { %v6903_v24 = vrot.slane %v6902_v27, 4 }
 0xbfb   : > { %v6904_v25 = vadd.f32 %v6903_v24, %v6902_v27 }
 0xbfd   : > { %v6905_v58 = vrot.slane %v6904_v25, 2 }
 0xbff   : > { %v6906_v32 = vadd.f32 %v6905_v58, %v6904_v25 }
 0xc01   : > { %v6907_v21 = vrot.slane %v6906_v32, 1 }
 0xc03   : > { %v6908_v62 = vadd.f32 %v6907_v21, %v6906_v32 }
 0xc05   : > { %v6909_v34 = vmul.f32 0.125, %v6908_v62 }
 0xc07   : > { %v6910_v5 = vsub.f32 %v6898_v28, %v6909_v34 }
 0xc09   : > { %v6911_v41 = vmul.f32 %v6910_v5, %v6910_v5 }
 0xc0b   : > { %v6912_v2 = vsel %vm1500_vm9, %v6911_v41, 0.0  ;;  %vm6998_vm9 = vcmask 156672  }
 0xc0c   : > { %v6913_v13 = vrot.slane %v6912_v2, 4 }
 0xc0e   : > { %v6914_v63 = vadd.f32 %v6913_v13, %v6912_v2 }
 0xc10   : > { %v6915_v9 = vrot.slane %v6914_v63, 2 }
 0xc12   : > { %v6916_v4 = vadd.f32 %v6915_v9, %v6914_v63 }
 0xc14   : > { %v6917_v37 = vrot.slane %v6916_v4, 1 }
 0xc16   : > { %v6918_v55 = vadd.f32 %v6917_v37, %v6916_v4 }
 0xc18   : > { %v6919_v31 = vmul.f32 0.125, %v6918_v55 }
 0xc1a   : > { %v6920_v59 = vadd.f32 1e-05, %v6919_v31 }
 0xc1c   : > { %9309 = vrsqrt.f32 %v6920_v59 }
 0xc26   : > { %v9310_v57 = vpop.eup %9309 }
 0xc27   : > { %v6922_v30 = vmul.f32 %v9310_v57, %v6910_v5 }
 0xc29   : > { %8537 = vmatpush3.msra.mxu0 %v6922_v30 }
 0xc2a   : > { %8539 = vmatmul.mubr.msk.f32.vlgmr.msra.gmra.mrb[158].mxu0 %vm6924_vm7, %v6923_v51 }
 0xcfd   : > { %v6994_v46 = vpop.f32.mrb[158].mxu0 }
 0xcfe   : > { %v6999_v3 = vsel %vm6998_vm9, %v6994_v46, -inf  ;;  %v8540_v42 = vpop.f32.mrb[159].mxu0 }
 0xcff   : > { %7000 = vmax.xlane.f32.xlu0 %v6999_v3 }
 0xd8c   : > { %v7001_v33 = vpop.xlane.xlu0 %7000 }
 0xd8d   : > { %v7002_v11 = vsub.f32 %v6994_v46, %v7001_v33 }
 0xd8f   : > { %v7003_v36 = vmul.f32 1.442695, %v7002_v11 }
 0xd91   : > { %9311 = vpow2.f32 %v7003_v36 }
 0xd9b   : > { %v9312_v53 = vpop.eup %9311 }
 0xd9c   : > { %v7005_v12 = vsel %vm6998_vm9, %v9312_v53, 0.0 }
 0xd9d   : > { %7006 = vadd.xlane.f32.xlu1 %v7005_v12 }
 0xe2a   : > { %v7007_v47 = vpop.xlane.xlu1 %7006 }
 0xe2b   : > { %9313 = vrcp.f32 %v7007_v47 }
 0xe35   : > { %v9314_v60 = vpop.eup %9313 }
 0xe36   : > { %v7009_v0 = vmul.f32 %v9314_v60, %v9312_v53 }
 0xe38   : > { %7010 = vst.msk [vmem:[%s582_s29] sm:$0x3] %vm6998_vm9, %v7009_v0 }
 0xe39   : > { %9333 = shalt.err (!%p9330_p3)
}
 0xe3a   : > { %s9334_s21 = scalar_lea.hbm %s12300_s19, 32  ;;  %s9338_s29 = scalar_lea.hbm %s12360_s17, 128 }
 0xe3b   : > { %p9335_p4 = scmp.ne.s32.totalorder %s12300_s19, %s9334_s21  ;;  %p9339_p9 = scmp.lt.u32.totalorder %s12300_s19, %s12360_s17 }
 0xe3c   : > { %p9340_p10 = scmp.lt.u32.totalorder %s9338_s29, %s9334_s21  ;;  %p9342_p12 = scmp.lt.u32.totalorder %s9334_s21, %s12300_s19 }
 0xe3d   : > { %p9336_p7 = pnand %p9335_p4, %p9524_p5 }
 0xe3e   : > { %p9341_p11 = por %p9340_p10, %p9339_p9 }
 0xe3f   : > { %p9337_p8 = pneg %p9336_p7 }
 0xe40   : > { %p9343_p13 = por %p9342_p12, %p9341_p11 }
 0xe42   : > { %p9344_p0 = pnand %p9343_p13, %p9337_p8 }
 0xe44   : > { %9347 = shalt.err (!%p9344_p0)
}
 0xe45   : > { %9127 = dma.vmem_to_hbm [thread:$0]  (%p9524_p5), %s12302_s18, 32, %s12300_s19, %s7012_s30  }
 0xe46 PF: > { %p9133_p1 = scmp.ge.s32.totalorder %s9382_s27, 2  ;;  %s7037_s28 = sand.u32 1, %s9370_s24  }
 0xe47   : > { %s7038_s26 = scalar_lea.sflag [#allocation3], %s7037_s28 }
 0xe48   : > { %p9130_p2 = pnand %p9133_p1, %p9528_p6 }
 0xe4a   : > { %9365 = dma.done.wait (!%p9130_p2), %s7038_s26, 32  }
 0xe4b   : > { %9367 = vsyncadd (!%p9130_p2), %s7038_s26, 4294967264  ;;  %s12753_s27 = sld [smem:[#allocation6_spill]]  ;;  %s12754_s0 = sld [smem:[#allocation5_spill]] }
 0xe4c   : > { %s12755_s26 = sld [smem:[#allocation7_spill]]  ;;  %s12756_s24 = smov %s9374_s25 }
 0xe51   : > { %p27_p3 = scmp.ge.s32.totalorder %s12753_s27, 6   ;;  %s12757_s25 = smov %s12754_s0 }
 0xe53   :  { %29 = sbr.rel (!%p27_p3) target bundleno = 8 (0x8), region = 132 }
 0xe5a   :  { %7043 = vsyncpa [#allocation3], 1 }
 0xe5b   :  { %7045 = vsyncpa [#allocation3 + $0x1], 1 }

</bundles_post_ra>
